<compile_context>
chip_gen: v7x
topology: tpu7x:2x2x1
jax: 0.10.0
libtpu: 0.0.40
codegen_flags: <defaults>
</compile_context>

<pallas_src>
import jax
import jax.numpy as jnp
from jax.experimental import pallas as pl
from jax.experimental.pallas import tpu as pltpu

# ----------------------------- model hyper-params -----------------------------
B = 2            # batch
T = 8            # time
V = 4            # n_vertices
INPUT_DIM = V * 3
H = 32           # hidden_size
NUM_LAYERS = 2   # num_hidden_layers
NHEADS = 4       # num_attention_heads
INTER = 64       # intermediate_size
NEG = 0.2        # relu_negative_slope
FACE_QUAN = 4    # face_quan_num
CODE_DIM = 8     # code_dim  (FACE_QUAN * CODE_DIM == H)
KSIZE = 5        # conv kernel size
LN_EPS = 1e-5
IN_EPS = 1e-5

assert FACE_QUAN * CODE_DIM == H


# ------------------------------- fused Pallas kernel -------------------------------
def fused_kernel(x_ref, tmpl_ref, *refs):
    """Entire VQAutoEncoder forward for one batch element (grid axis = batch)."""
    o_ref = refs[-1]
    w = refs[:-1]

    def leaky(y):
        return jnp.where(y >= 0, y, NEG * y)

    def layer_norm(z, gamma, beta):
        mu = jnp.mean(z, axis=-1, keepdims=True)
        var = jnp.mean((z - mu) ** 2, axis=-1, keepdims=True)
        return (z - mu) * jax.lax.rsqrt(var + LN_EPS) * gamma + beta

    def conv_lrelu_inorm(xv, w_flat, b):
        # Conv1d(k, stride=1, replicate pad) + LeakyReLU + InstanceNorm1d (no affine).
        # xv: (T, Cin); w_flat: (K*Cin, Cout) with row index k*Cin + cin; b: (1, Cout).
        t = xv.shape[0]
        pad = (KSIZE - 1) // 2
        xp = jnp.concatenate([xv[0:1]] * pad + [xv] + [xv[t - 1:t]] * pad, axis=0)   # (T+2p, Cin)
        # im2col: one (T, K*Cin) @ (K*Cin, Cout) MXU push instead of K per-tap dots.
        win = jnp.concatenate([xp[k:k + t] for k in range(KSIZE)], axis=1)           # (T, K*Cin)
        y = jnp.dot(win, w_flat, preferred_element_type=jnp.float32) + b
        y = leaky(y)
        mu = jnp.mean(y, axis=0, keepdims=True)
        var = jnp.mean((y - mu) ** 2, axis=0, keepdims=True)                          # biased var
        return (y - mu) * jax.lax.rsqrt(var + IN_EPS)

    def tf_layer(xv, wqkv, bqkv, wo, bo, ln1, w1, b1, w2, b2, ln2):
        # post-norm transformer encoder layer (no concat: heads accumulate through wo slices)
        t, hdim = xv.shape
        hd = hdim // NHEADS
        scale = 1.0 / jnp.sqrt(jnp.float32(hd))
        qkv = jnp.dot(xv, wqkv, preferred_element_type=jnp.float32) + bqkv
        q, k, v = qkv[:, :hdim], qkv[:, hdim:2 * hdim], qkv[:, 2 * hdim:]
        acc = jnp.zeros((t, hdim), jnp.float32)
        for hh in range(NHEADS):
            lo, hi = hh * hd, (hh + 1) * hd
            s = jnp.dot(q[:, lo:hi], k[:, lo:hi].T, preferred_element_type=jnp.float32) * scale
            p = jax.nn.softmax(s, axis=-1)
            oh = jnp.dot(p, v[:, lo:hi], preferred_element_type=jnp.float32)
            acc = acc + jnp.dot(oh, wo[lo:hi, :], preferred_element_type=jnp.float32)
        attn = acc + bo
        h1 = layer_norm(xv + attn, ln1[0:1], ln1[1:2])
        ff = jnp.dot(h1, w1, preferred_element_type=jnp.float32) + b1
        ff = jnp.maximum(ff, 0.0)
        ff = jnp.dot(ff, w2, preferred_element_type=jnp.float32) + b2
        return layer_norm(h1 + ff, ln2[0:1], ln2[1:2])

    # --- unpack all VMEM-resident weights (order must match wrapper) ---
    idx = 0

    def take(n):
        nonlocal idx
        vals = tuple(w[idx + j][...] for j in range(n))
        idx += n
        return vals

    vm_w, vm_b = take(2)
    enc_cw, enc_cb = take(2)
    enc_lw, enc_lb = take(2)
    (pe,) = take(1)
    enc_layers = [take(10) for _ in range(NUM_LAYERS)]
    q_w, q_b = take(2)
    dec_cw, dec_cb = take(2)
    dec_lw, dec_lb = take(2)
    dec_layers = [take(10) for _ in range(NUM_LAYERS)]
    out_w, out_b = take(2)

    x = x_ref[0]                      # (T, INPUT_DIM)
    tmpl = tmpl_ref[0]                # (1, INPUT_DIM)
    x = x - tmpl                      # x - template

    # ---------------- encoder ----------------
    h = leaky(jnp.dot(x, vm_w, preferred_element_type=jnp.float32) + vm_b)   # vertices_mapping
    h = conv_lrelu_inorm(h, enc_cw, enc_cb)                                  # squasher
    h = jnp.dot(h, enc_lw, preferred_element_type=jnp.float32) + enc_lb      # linear embedding
    h = h + pe                                                               # positional encoding
    for lp in enc_layers:
        h = tf_layer(h, *lp)

    # ---------------- bottleneck quantize ----------------
    # Linear(code_dim, code_dim) applied per code block == block-diagonal (H, H) matmul.
    # The permute(0,2,1) in BottleNeck and its inverse in decode() cancel exactly.
    h = jnp.dot(h, q_w, preferred_element_type=jnp.float32) + q_b

    # ---------------- decoder ----------------
    d = conv_lrelu_inorm(h, dec_cw, dec_cb)                                  # expander
    d = jnp.dot(d, dec_lw, preferred_element_type=jnp.float32) + dec_lb      # linear embedding
    d = d + pe
    for lp in dec_layers:
        d = tf_layer(d, *lp)
    rec = jnp.dot(d, out_w, preferred_element_type=jnp.float32) + out_b      # vertices_map_reverse

    o_ref[0] = rec * 0.001 + tmpl


# ------------------------------- pallas wrapper -------------------------------
def _full_spec(shape):
    n = len(shape)
    return pl.BlockSpec(shape, lambda *_: (0,) * n)


def _layer_arrays(p):
    return [p['wqkv'], p['bqkv'], p['wo'], p['bo'], p['ln1'],
            p['w1'], p['b1'], p['w2'], p['b2'], p['ln2']]


def vq_autoencoder_forward(params, x, template):
    """x: (B, T, V, 3) f32; template: (B, V, 3) f32 -> (dec, emb_loss, info)."""
    bsz, t, nv, _ = x.shape
    in_dim = nv * 3
    x_flat = x.reshape(bsz, t, in_dim)
    tmpl = template.reshape(bsz, 1, in_dim)

    # block-diagonal equivalent of the bottleneck Linear(code_dim, code_dim)
    q_w_bd = jnp.kron(jnp.eye(FACE_QUAN, dtype=jnp.float32), params['q_w'])      # (H, H)
    q_b_tl = jnp.tile(params['q_b'], FACE_QUAN).reshape(1, H)

    weights = [
        params['vm_w'], params['vm_b'].reshape(1, H),
        params['enc_conv_w'].reshape(KSIZE * H, H), params['enc_conv_b'].reshape(1, H),
        params['enc_lin_w'], params['enc_lin_b'].reshape(1, H),
        params['pe'][:t],
    ]
    for lyr in params['enc_layers']:
        weights += _layer_arrays(lyr)
    weights += [q_w_bd, q_b_tl,
                params['dec_conv_w'].reshape(KSIZE * H, H), params['dec_conv_b'].reshape(1, H),
                params['dec_lin_w'], params['dec_lin_b'].reshape(1, H)]
    for lyr in params['dec_layers']:
        weights += _layer_arrays(lyr)
    weights += [params['out_w'], params['out_b'].reshape(1, in_dim)]

    in_specs = ([pl.BlockSpec((1, t, in_dim), lambda i: (i, 0, 0)),
                 pl.BlockSpec((1, 1, in_dim), lambda i: (i, 0, 0))]
                + [_full_spec(wt.shape) for wt in weights])

    out = pl.pallas_call(
        fused_kernel,
        grid=(bsz,),
        out_shape=jax.ShapeDtypeStruct((bsz, t, in_dim), jnp.float32),
        in_specs=in_specs,
        out_specs=pl.BlockSpec((1, t, in_dim), lambda i: (i, 0, 0)),
        compiler_params=pltpu.CompilerParams(dimension_semantics=("parallel",)),
    )(x_flat, tmpl, *weights)

    dec = out.reshape(bsz, t, nv, 3)
    emb_loss = jnp.zeros((), jnp.float32)
    info = ()
    return dec, emb_loss, info


# ------------------------------- parameters ------------------------------------
def sinusoidal_pe(max_len, d_model):
    pos = jnp.arange(max_len, dtype=jnp.float32)[:, None]
    div = jnp.exp(jnp.arange(0, d_model, 2, dtype=jnp.float32) * (-jnp.log(10000.0) / d_model))
    pe = jnp.zeros((max_len, d_model), jnp.float32)
    pe = pe.at[:, 0::2].set(jnp.sin(pos * div))
    pe = pe.at[:, 1::2].set(jnp.cos(pos * div))
    return pe


def init_params(key):
    keys = iter(jax.random.split(key, 128))

    def w(shape, scale=0.05):
        return (scale * jax.random.normal(next(keys), shape)).astype(jnp.float32)

    def zeros(shape):
        return jnp.zeros(shape, jnp.float32)

    def tf_layer():
        return dict(
            wqkv=w((H, 3 * H)), bqkv=zeros((1, 3 * H)),
            wo=w((H, H)), bo=zeros((1, H)),
            ln1=jnp.stack([jnp.ones(H, jnp.float32), jnp.zeros(H, jnp.float32)]),
            w1=w((H, INTER)), b1=zeros((1, INTER)),
            w2=w((INTER, H)), b2=zeros((1, H)),
            ln2=jnp.stack([jnp.ones(H, jnp.float32), jnp.zeros(H, jnp.float32)]),
        )

    return dict(
        # encoder
        vm_w=w((INPUT_DIM, H)), vm_b=w((H,)),
        enc_conv_w=w((KSIZE, H, H)), enc_conv_b=w((H,)),
        enc_lin_w=w((H, H)), enc_lin_b=w((H,)),
        enc_layers=[tf_layer() for _ in range(NUM_LAYERS)],
        # bottleneck quantizer
        q_w=w((CODE_DIM, CODE_DIM)), q_b=w((CODE_DIM,)),
        # decoder
        dec_conv_w=w((KSIZE, H, H)), dec_conv_b=w((H,)),
        dec_lin_w=w((H, H)), dec_lin_b=w((H,)),
        dec_layers=[tf_layer() for _ in range(NUM_LAYERS)],
        out_w=w((H, INPUT_DIM)), out_b=w((INPUT_DIM,)),
        pe=sinusoidal_pe(64, H),
    )


# ----------------------------------- main ---------------------------------------
if __name__ == "__main__":
    key = jax.random.PRNGKey(0)
    k_p, k_x, k_t = jax.random.split(key, 3)
    params = init_params(k_p)
    x = jax.random.normal(k_x, (B, T, V, 3), jnp.float32)
    template = jax.random.normal(k_t, (B, V, 3), jnp.float32)

    fwd = jax.jit(vq_autoencoder_forward)
    dec, emb_loss, info = fwd(params, x, template)
    jax.block_until_ready(dec)
    jax.block_until_ready(emb_loss)

    assert dec.shape == (B, T, V, 3) and dec.dtype == jnp.float32
    print("KERNEL_OK")
</pallas_src>

<mosaic_0001>
module attributes {stable_mosaic.version = 11 : i64} {
  func.func @fused_kernel(%arg0: i32, %arg1: memref<1x8x12xf32, #tpu.memory_space<vmem>>, %arg2: memref<1x1x12xf32, #tpu.memory_space<vmem>>, %arg3: memref<12x32xf32, #tpu.memory_space<vmem>>, %arg4: memref<1x32xf32, #tpu.memory_space<vmem>>, %arg5: memref<160x32xf32, #tpu.memory_space<vmem>>, %arg6: memref<1x32xf32, #tpu.memory_space<vmem>>, %arg7: memref<32x32xf32, #tpu.memory_space<vmem>>, %arg8: memref<1x32xf32, #tpu.memory_space<vmem>>, %arg9: memref<8x32xf32, #tpu.memory_space<vmem>>, %arg10: memref<32x96xf32, #tpu.memory_space<vmem>>, %arg11: memref<1x96xf32, #tpu.memory_space<vmem>>, %arg12: memref<32x32xf32, #tpu.memory_space<vmem>>, %arg13: memref<1x32xf32, #tpu.memory_space<vmem>>, %arg14: memref<2x32xf32, #tpu.memory_space<vmem>>, %arg15: memref<32x64xf32, #tpu.memory_space<vmem>>, %arg16: memref<1x64xf32, #tpu.memory_space<vmem>>, %arg17: memref<64x32xf32, #tpu.memory_space<vmem>>, %arg18: memref<1x32xf32, #tpu.memory_space<vmem>>, %arg19: memref<2x32xf32, #tpu.memory_space<vmem>>, %arg20: memref<32x96xf32, #tpu.memory_space<vmem>>, %arg21: memref<1x96xf32, #tpu.memory_space<vmem>>, %arg22: memref<32x32xf32, #tpu.memory_space<vmem>>, %arg23: memref<1x32xf32, #tpu.memory_space<vmem>>, %arg24: memref<2x32xf32, #tpu.memory_space<vmem>>, %arg25: memref<32x64xf32, #tpu.memory_space<vmem>>, %arg26: memref<1x64xf32, #tpu.memory_space<vmem>>, %arg27: memref<64x32xf32, #tpu.memory_space<vmem>>, %arg28: memref<1x32xf32, #tpu.memory_space<vmem>>, %arg29: memref<2x32xf32, #tpu.memory_space<vmem>>, %arg30: memref<32x32xf32, #tpu.memory_space<vmem>>, %arg31: memref<1x32xf32, #tpu.memory_space<vmem>>, %arg32: memref<160x32xf32, #tpu.memory_space<vmem>>, %arg33: memref<1x32xf32, #tpu.memory_space<vmem>>, %arg34: memref<32x32xf32, #tpu.memory_space<vmem>>, %arg35: memref<1x32xf32, #tpu.memory_space<vmem>>, %arg36: memref<32x96xf32, #tpu.memory_space<vmem>>, %arg37: memref<1x96xf32, #tpu.memory_space<vmem>>, %arg38: memref<32x32xf32, #tpu.memory_space<vmem>>, %arg39: memref<1x32xf32, #tpu.memory_space<vmem>>, %arg40: memref<2x32xf32, #tpu.memory_space<vmem>>, %arg41: memref<32x64xf32, #tpu.memory_space<vmem>>, %arg42: memref<1x64xf32, #tpu.memory_space<vmem>>, %arg43: memref<64x32xf32, #tpu.memory_space<vmem>>, %arg44: memref<1x32xf32, #tpu.memory_space<vmem>>, %arg45: memref<2x32xf32, #tpu.memory_space<vmem>>, %arg46: memref<32x96xf32, #tpu.memory_space<vmem>>, %arg47: memref<1x96xf32, #tpu.memory_space<vmem>>, %arg48: memref<32x32xf32, #tpu.memory_space<vmem>>, %arg49: memref<1x32xf32, #tpu.memory_space<vmem>>, %arg50: memref<2x32xf32, #tpu.memory_space<vmem>>, %arg51: memref<32x64xf32, #tpu.memory_space<vmem>>, %arg52: memref<1x64xf32, #tpu.memory_space<vmem>>, %arg53: memref<64x32xf32, #tpu.memory_space<vmem>>, %arg54: memref<1x32xf32, #tpu.memory_space<vmem>>, %arg55: memref<2x32xf32, #tpu.memory_space<vmem>>, %arg56: memref<32x12xf32, #tpu.memory_space<vmem>>, %arg57: memref<1x12xf32, #tpu.memory_space<vmem>>, %arg58: memref<1x8x12xf32, #tpu.memory_space<vmem>>) attributes {dimension_semantics = [#tpu.dimension_semantics<parallel>], iteration_bounds = array<i64: 2>, scalar_prefetch = 0 : i64, scratch_operands = 0 : i64, tpu.core_type = #tpu.core_type<tc>, window_params = [{transform_indices = @transform_0, window_bounds = array<i64: 1, 8, 12>}, {transform_indices = @transform_1, window_bounds = array<i64: 1, 1, 12>}, {pipeline_mode = #tpu.pipeline_mode<synchronous>, transform_indices = @transform_2, window_bounds = array<i64: 12, 32>}, {pipeline_mode = #tpu.pipeline_mode<synchronous>, transform_indices = @transform_3, window_bounds = array<i64: 1, 32>}, {pipeline_mode = #tpu.pipeline_mode<synchronous>, transform_indices = @transform_4, window_bounds = array<i64: 160, 32>}, {pipeline_mode = #tpu.pipeline_mode<synchronous>, transform_indices = @transform_5, window_bounds = array<i64: 1, 32>}, {pipeline_mode = #tpu.pipeline_mode<synchronous>, transform_indices = @transform_6, window_bounds = array<i64: 32, 32>}, {pipeline_mode = #tpu.pipeline_mode<synchronous>, transform_indices = @transform_7, window_bounds = array<i64: 1, 32>}, {pipeline_mode = #tpu.pipeline_mode<synchronous>, transform_indices = @transform_8, window_bounds = array<i64: 8, 32>}, {pipeline_mode = #tpu.pipeline_mode<synchronous>, transform_indices = @transform_9, window_bounds = array<i64: 32, 96>}, {pipeline_mode = #tpu.pipeline_mode<synchronous>, transform_indices = @transform_10, window_bounds = array<i64: 1, 96>}, {pipeline_mode = #tpu.pipeline_mode<synchronous>, transform_indices = @transform_11, window_bounds = array<i64: 32, 32>}, {pipeline_mode = #tpu.pipeline_mode<synchronous>, transform_indices = @transform_12, window_bounds = array<i64: 1, 32>}, {pipeline_mode = #tpu.pipeline_mode<synchronous>, transform_indices = @transform_13, window_bounds = array<i64: 2, 32>}, {pipeline_mode = #tpu.pipeline_mode<synchronous>, transform_indices = @transform_14, window_bounds = array<i64: 32, 64>}, {pipeline_mode = #tpu.pipeline_mode<synchronous>, transform_indices = @transform_15, window_bounds = array<i64: 1, 64>}, {pipeline_mode = #tpu.pipeline_mode<synchronous>, transform_indices = @transform_16, window_bounds = array<i64: 64, 32>}, {pipeline_mode = #tpu.pipeline_mode<synchronous>, transform_indices = @transform_17, window_bounds = array<i64: 1, 32>}, {pipeline_mode = #tpu.pipeline_mode<synchronous>, transform_indices = @transform_18, window_bounds = array<i64: 2, 32>}, {pipeline_mode = #tpu.pipeline_mode<synchronous>, transform_indices = @transform_19, window_bounds = array<i64: 32, 96>}, {pipeline_mode = #tpu.pipeline_mode<synchronous>, transform_indices = @transform_20, window_bounds = array<i64: 1, 96>}, {pipeline_mode = #tpu.pipeline_mode<synchronous>, transform_indices = @transform_21, window_bounds = array<i64: 32, 32>}, {pipeline_mode = #tpu.pipeline_mode<synchronous>, transform_indices = @transform_22, window_bounds = array<i64: 1, 32>}, {pipeline_mode = #tpu.pipeline_mode<synchronous>, transform_indices = @transform_23, window_bounds = array<i64: 2, 32>}, {pipeline_mode = #tpu.pipeline_mode<synchronous>, transform_indices = @transform_24, window_bounds = array<i64: 32, 64>}, {pipeline_mode = #tpu.pipeline_mode<synchronous>, transform_indices = @transform_25, window_bounds = array<i64: 1, 64>}, {pipeline_mode = #tpu.pipeline_mode<synchronous>, transform_indices = @transform_26, window_bounds = array<i64: 64, 32>}, {pipeline_mode = #tpu.pipeline_mode<synchronous>, transform_indices = @transform_27, window_bounds = array<i64: 1, 32>}, {pipeline_mode = #tpu.pipeline_mode<synchronous>, transform_indices = @transform_28, window_bounds = array<i64: 2, 32>}, {pipeline_mode = #tpu.pipeline_mode<synchronous>, transform_indices = @transform_29, window_bounds = array<i64: 32, 32>}, {pipeline_mode = #tpu.pipeline_mode<synchronous>, transform_indices = @transform_30, window_bounds = array<i64: 1, 32>}, {pipeline_mode = #tpu.pipeline_mode<synchronous>, transform_indices = @transform_31, window_bounds = array<i64: 160, 32>}, {pipeline_mode = #tpu.pipeline_mode<synchronous>, transform_indices = @transform_32, window_bounds = array<i64: 1, 32>}, {pipeline_mode = #tpu.pipeline_mode<synchronous>, transform_indices = @transform_33, window_bounds = array<i64: 32, 32>}, {pipeline_mode = #tpu.pipeline_mode<synchronous>, transform_indices = @transform_34, window_bounds = array<i64: 1, 32>}, {pipeline_mode = #tpu.pipeline_mode<synchronous>, transform_indices = @transform_35, window_bounds = array<i64: 32, 96>}, {pipeline_mode = #tpu.pipeline_mode<synchronous>, transform_indices = @transform_36, window_bounds = array<i64: 1, 96>}, {pipeline_mode = #tpu.pipeline_mode<synchronous>, transform_indices = @transform_37, window_bounds = array<i64: 32, 32>}, {pipeline_mode = #tpu.pipeline_mode<synchronous>, transform_indices = @transform_38, window_bounds = array<i64: 1, 32>}, {pipeline_mode = #tpu.pipeline_mode<synchronous>, transform_indices = @transform_39, window_bounds = array<i64: 2, 32>}, {pipeline_mode = #tpu.pipeline_mode<synchronous>, transform_indices = @transform_40, window_bounds = array<i64: 32, 64>}, {pipeline_mode = #tpu.pipeline_mode<synchronous>, transform_indices = @transform_41, window_bounds = array<i64: 1, 64>}, {pipeline_mode = #tpu.pipeline_mode<synchronous>, transform_indices = @transform_42, window_bounds = array<i64: 64, 32>}, {pipeline_mode = #tpu.pipeline_mode<synchronous>, transform_indices = @transform_43, window_bounds = array<i64: 1, 32>}, {pipeline_mode = #tpu.pipeline_mode<synchronous>, transform_indices = @transform_44, window_bounds = array<i64: 2, 32>}, {pipeline_mode = #tpu.pipeline_mode<synchronous>, transform_indices = @transform_45, window_bounds = array<i64: 32, 96>}, {pipeline_mode = #tpu.pipeline_mode<synchronous>, transform_indices = @transform_46, window_bounds = array<i64: 1, 96>}, {pipeline_mode = #tpu.pipeline_mode<synchronous>, transform_indices = @transform_47, window_bounds = array<i64: 32, 32>}, {pipeline_mode = #tpu.pipeline_mode<synchronous>, transform_indices = @transform_48, window_bounds = array<i64: 1, 32>}, {pipeline_mode = #tpu.pipeline_mode<synchronous>, transform_indices = @transform_49, window_bounds = array<i64: 2, 32>}, {pipeline_mode = #tpu.pipeline_mode<synchronous>, transform_indices = @transform_50, window_bounds = array<i64: 32, 64>}, {pipeline_mode = #tpu.pipeline_mode<synchronous>, transform_indices = @transform_51, window_bounds = array<i64: 1, 64>}, {pipeline_mode = #tpu.pipeline_mode<synchronous>, transform_indices = @transform_52, window_bounds = array<i64: 64, 32>}, {pipeline_mode = #tpu.pipeline_mode<synchronous>, transform_indices = @transform_53, window_bounds = array<i64: 1, 32>}, {pipeline_mode = #tpu.pipeline_mode<synchronous>, transform_indices = @transform_54, window_bounds = array<i64: 2, 32>}, {pipeline_mode = #tpu.pipeline_mode<synchronous>, transform_indices = @transform_55, window_bounds = array<i64: 32, 12>}, {pipeline_mode = #tpu.pipeline_mode<synchronous>, transform_indices = @transform_56, window_bounds = array<i64: 1, 12>}, {transform_indices = @transform_57, window_bounds = array<i64: 1, 8, 12>}]} {
    %c0 = arith.constant 0 : index
    %c0_0 = arith.constant 0 : index
    %0 = vector.load %arg3[%c0, %c0_0] : memref<12x32xf32, #tpu.memory_space<vmem>>, vector<12x32xf32>
    %c0_1 = arith.constant 0 : index
    %c0_2 = arith.constant 0 : index
    %1 = vector.load %arg4[%c0_1, %c0_2] : memref<1x32xf32, #tpu.memory_space<vmem>>, vector<1x32xf32>
    %c0_3 = arith.constant 0 : index
    %c0_4 = arith.constant 0 : index
    %2 = vector.load %arg5[%c0_3, %c0_4] : memref<160x32xf32, #tpu.memory_space<vmem>>, vector<160x32xf32>
    %c0_5 = arith.constant 0 : index
    %c0_6 = arith.constant 0 : index
    %3 = vector.load %arg6[%c0_5, %c0_6] : memref<1x32xf32, #tpu.memory_space<vmem>>, vector<1x32xf32>
    %c0_7 = arith.constant 0 : index
    %c0_8 = arith.constant 0 : index
    %4 = vector.load %arg7[%c0_7, %c0_8] : memref<32x32xf32, #tpu.memory_space<vmem>>, vector<32x32xf32>
    %c0_9 = arith.constant 0 : index
    %c0_10 = arith.constant 0 : index
    %5 = vector.load %arg8[%c0_9, %c0_10] : memref<1x32xf32, #tpu.memory_space<vmem>>, vector<1x32xf32>
    %c0_11 = arith.constant 0 : index
    %c0_12 = arith.constant 0 : index
    %6 = vector.load %arg9[%c0_11, %c0_12] : memref<8x32xf32, #tpu.memory_space<vmem>>, vector<8x32xf32>
    %c0_13 = arith.constant 0 : index
    %c0_14 = arith.constant 0 : index
    %7 = vector.load %arg10[%c0_13, %c0_14] : memref<32x96xf32, #tpu.memory_space<vmem>>, vector<32x96xf32>
    %c0_15 = arith.constant 0 : index
    %c0_16 = arith.constant 0 : index
    %8 = vector.load %arg11[%c0_15, %c0_16] : memref<1x96xf32, #tpu.memory_space<vmem>>, vector<1x96xf32>
    %c0_17 = arith.constant 0 : index
    %c0_18 = arith.constant 0 : index
    %9 = vector.load %arg12[%c0_17, %c0_18] : memref<32x32xf32, #tpu.memory_space<vmem>>, vector<32x32xf32>
    %c0_19 = arith.constant 0 : index
    %c0_20 = arith.constant 0 : index
    %10 = vector.load %arg13[%c0_19, %c0_20] : memref<1x32xf32, #tpu.memory_space<vmem>>, vector<1x32xf32>
    %c0_21 = arith.constant 0 : index
    %c0_22 = arith.constant 0 : index
    %11 = vector.load %arg14[%c0_21, %c0_22] : memref<2x32xf32, #tpu.memory_space<vmem>>, vector<2x32xf32>
    %c0_23 = arith.constant 0 : index
    %c0_24 = arith.constant 0 : index
    %12 = vector.load %arg15[%c0_23, %c0_24] : memref<32x64xf32, #tpu.memory_space<vmem>>, vector<32x64xf32>
    %c0_25 = arith.constant 0 : index
    %c0_26 = arith.constant 0 : index
    %13 = vector.load %arg16[%c0_25, %c0_26] : memref<1x64xf32, #tpu.memory_space<vmem>>, vector<1x64xf32>
    %c0_27 = arith.constant 0 : index
    %c0_28 = arith.constant 0 : index
    %14 = vector.load %arg17[%c0_27, %c0_28] : memref<64x32xf32, #tpu.memory_space<vmem>>, vector<64x32xf32>
    %c0_29 = arith.constant 0 : index
    %c0_30 = arith.constant 0 : index
    %15 = vector.load %arg18[%c0_29, %c0_30] : memref<1x32xf32, #tpu.memory_space<vmem>>, vector<1x32xf32>
    %c0_31 = arith.constant 0 : index
    %c0_32 = arith.constant 0 : index
    %16 = vector.load %arg19[%c0_31, %c0_32] : memref<2x32xf32, #tpu.memory_space<vmem>>, vector<2x32xf32>
    %c0_33 = arith.constant 0 : index
    %c0_34 = arith.constant 0 : index
    %17 = vector.load %arg20[%c0_33, %c0_34] : memref<32x96xf32, #tpu.memory_space<vmem>>, vector<32x96xf32>
    %c0_35 = arith.constant 0 : index
    %c0_36 = arith.constant 0 : index
    %18 = vector.load %arg21[%c0_35, %c0_36] : memref<1x96xf32, #tpu.memory_space<vmem>>, vector<1x96xf32>
    %c0_37 = arith.constant 0 : index
    %c0_38 = arith.constant 0 : index
    %19 = vector.load %arg22[%c0_37, %c0_38] : memref<32x32xf32, #tpu.memory_space<vmem>>, vector<32x32xf32>
    %c0_39 = arith.constant 0 : index
    %c0_40 = arith.constant 0 : index
    %20 = vector.load %arg23[%c0_39, %c0_40] : memref<1x32xf32, #tpu.memory_space<vmem>>, vector<1x32xf32>
    %c0_41 = arith.constant 0 : index
    %c0_42 = arith.constant 0 : index
    %21 = vector.load %arg24[%c0_41, %c0_42] : memref<2x32xf32, #tpu.memory_space<vmem>>, vector<2x32xf32>
    %c0_43 = arith.constant 0 : index
    %c0_44 = arith.constant 0 : index
    %22 = vector.load %arg25[%c0_43, %c0_44] : memref<32x64xf32, #tpu.memory_space<vmem>>, vector<32x64xf32>
    %c0_45 = arith.constant 0 : index
    %c0_46 = arith.constant 0 : index
    %23 = vector.load %arg26[%c0_45, %c0_46] : memref<1x64xf32, #tpu.memory_space<vmem>>, vector<1x64xf32>
    %c0_47 = arith.constant 0 : index
    %c0_48 = arith.constant 0 : index
    %24 = vector.load %arg27[%c0_47, %c0_48] : memref<64x32xf32, #tpu.memory_space<vmem>>, vector<64x32xf32>
    %c0_49 = arith.constant 0 : index
    %c0_50 = arith.constant 0 : index
    %25 = vector.load %arg28[%c0_49, %c0_50] : memref<1x32xf32, #tpu.memory_space<vmem>>, vector<1x32xf32>
    %c0_51 = arith.constant 0 : index
    %c0_52 = arith.constant 0 : index
    %26 = vector.load %arg29[%c0_51, %c0_52] : memref<2x32xf32, #tpu.memory_space<vmem>>, vector<2x32xf32>
    %c0_53 = arith.constant 0 : index
    %c0_54 = arith.constant 0 : index
    %27 = vector.load %arg30[%c0_53, %c0_54] : memref<32x32xf32, #tpu.memory_space<vmem>>, vector<32x32xf32>
    %c0_55 = arith.constant 0 : index
    %c0_56 = arith.constant 0 : index
    %28 = vector.load %arg31[%c0_55, %c0_56] : memref<1x32xf32, #tpu.memory_space<vmem>>, vector<1x32xf32>
    %c0_57 = arith.constant 0 : index
    %c0_58 = arith.constant 0 : index
    %29 = vector.load %arg32[%c0_57, %c0_58] : memref<160x32xf32, #tpu.memory_space<vmem>>, vector<160x32xf32>
    %c0_59 = arith.constant 0 : index
    %c0_60 = arith.constant 0 : index
    %30 = vector.load %arg33[%c0_59, %c0_60] : memref<1x32xf32, #tpu.memory_space<vmem>>, vector<1x32xf32>
    %c0_61 = arith.constant 0 : index
    %c0_62 = arith.constant 0 : index
    %31 = vector.load %arg34[%c0_61, %c0_62] : memref<32x32xf32, #tpu.memory_space<vmem>>, vector<32x32xf32>
    %c0_63 = arith.constant 0 : index
    %c0_64 = arith.constant 0 : index
    %32 = vector.load %arg35[%c0_63, %c0_64] : memref<1x32xf32, #tpu.memory_space<vmem>>, vector<1x32xf32>
    %c0_65 = arith.constant 0 : index
    %c0_66 = arith.constant 0 : index
    %33 = vector.load %arg36[%c0_65, %c0_66] : memref<32x96xf32, #tpu.memory_space<vmem>>, vector<32x96xf32>
    %c0_67 = arith.constant 0 : index
    %c0_68 = arith.constant 0 : index
    %34 = vector.load %arg37[%c0_67, %c0_68] : memref<1x96xf32, #tpu.memory_space<vmem>>, vector<1x96xf32>
    %c0_69 = arith.constant 0 : index
    %c0_70 = arith.constant 0 : index
    %35 = vector.load %arg38[%c0_69, %c0_70] : memref<32x32xf32, #tpu.memory_space<vmem>>, vector<32x32xf32>
    %c0_71 = arith.constant 0 : index
    %c0_72 = arith.constant 0 : index
    %36 = vector.load %arg39[%c0_71, %c0_72] : memref<1x32xf32, #tpu.memory_space<vmem>>, vector<1x32xf32>
    %c0_73 = arith.constant 0 : index
    %c0_74 = arith.constant 0 : index
    %37 = vector.load %arg40[%c0_73, %c0_74] : memref<2x32xf32, #tpu.memory_space<vmem>>, vector<2x32xf32>
    %c0_75 = arith.constant 0 : index
    %c0_76 = arith.constant 0 : index
    %38 = vector.load %arg41[%c0_75, %c0_76] : memref<32x64xf32, #tpu.memory_space<vmem>>, vector<32x64xf32>
    %c0_77 = arith.constant 0 : index
    %c0_78 = arith.constant 0 : index
    %39 = vector.load %arg42[%c0_77, %c0_78] : memref<1x64xf32, #tpu.memory_space<vmem>>, vector<1x64xf32>
    %c0_79 = arith.constant 0 : index
    %c0_80 = arith.constant 0 : index
    %40 = vector.load %arg43[%c0_79, %c0_80] : memref<64x32xf32, #tpu.memory_space<vmem>>, vector<64x32xf32>
    %c0_81 = arith.constant 0 : index
    %c0_82 = arith.constant 0 : index
    %41 = vector.load %arg44[%c0_81, %c0_82] : memref<1x32xf32, #tpu.memory_space<vmem>>, vector<1x32xf32>
    %c0_83 = arith.constant 0 : index
    %c0_84 = arith.constant 0 : index
    %42 = vector.load %arg45[%c0_83, %c0_84] : memref<2x32xf32, #tpu.memory_space<vmem>>, vector<2x32xf32>
    %c0_85 = arith.constant 0 : index
    %c0_86 = arith.constant 0 : index
    %43 = vector.load %arg46[%c0_85, %c0_86] : memref<32x96xf32, #tpu.memory_space<vmem>>, vector<32x96xf32>
    %c0_87 = arith.constant 0 : index
    %c0_88 = arith.constant 0 : index
    %44 = vector.load %arg47[%c0_87, %c0_88] : memref<1x96xf32, #tpu.memory_space<vmem>>, vector<1x96xf32>
    %c0_89 = arith.constant 0 : index
    %c0_90 = arith.constant 0 : index
    %45 = vector.load %arg48[%c0_89, %c0_90] : memref<32x32xf32, #tpu.memory_space<vmem>>, vector<32x32xf32>
    %c0_91 = arith.constant 0 : index
    %c0_92 = arith.constant 0 : index
    %46 = vector.load %arg49[%c0_91, %c0_92] : memref<1x32xf32, #tpu.memory_space<vmem>>, vector<1x32xf32>
    %c0_93 = arith.constant 0 : index
    %c0_94 = arith.constant 0 : index
    %47 = vector.load %arg50[%c0_93, %c0_94] : memref<2x32xf32, #tpu.memory_space<vmem>>, vector<2x32xf32>
    %c0_95 = arith.constant 0 : index
    %c0_96 = arith.constant 0 : index
    %48 = vector.load %arg51[%c0_95, %c0_96] : memref<32x64xf32, #tpu.memory_space<vmem>>, vector<32x64xf32>
    %c0_97 = arith.constant 0 : index
    %c0_98 = arith.constant 0 : index
    %49 = vector.load %arg52[%c0_97, %c0_98] : memref<1x64xf32, #tpu.memory_space<vmem>>, vector<1x64xf32>
    %c0_99 = arith.constant 0 : index
    %c0_100 = arith.constant 0 : index
    %50 = vector.load %arg53[%c0_99, %c0_100] : memref<64x32xf32, #tpu.memory_space<vmem>>, vector<64x32xf32>
    %c0_101 = arith.constant 0 : index
    %c0_102 = arith.constant 0 : index
    %51 = vector.load %arg54[%c0_101, %c0_102] : memref<1x32xf32, #tpu.memory_space<vmem>>, vector<1x32xf32>
    %c0_103 = arith.constant 0 : index
    %c0_104 = arith.constant 0 : index
    %52 = vector.load %arg55[%c0_103, %c0_104] : memref<2x32xf32, #tpu.memory_space<vmem>>, vector<2x32xf32>
    %c0_105 = arith.constant 0 : index
    %c0_106 = arith.constant 0 : index
    %53 = vector.load %arg56[%c0_105, %c0_106] : memref<32x12xf32, #tpu.memory_space<vmem>>, vector<32x12xf32>
    %c0_107 = arith.constant 0 : index
    %c0_108 = arith.constant 0 : index
    %54 = vector.load %arg57[%c0_107, %c0_108] : memref<1x12xf32, #tpu.memory_space<vmem>>, vector<1x12xf32>
    %c0_109 = arith.constant 0 : index
    %c0_110 = arith.constant 0 : index
    %c0_111 = arith.constant 0 : index
    %55 = vector.load %arg1[%c0_109, %c0_110, %c0_111] : memref<1x8x12xf32, #tpu.memory_space<vmem>>, vector<1x8x12xf32>
    %56 = vector.shape_cast %55 : vector<1x8x12xf32> to vector<8x12xf32>
    %c0_112 = arith.constant 0 : index
    %c0_113 = arith.constant 0 : index
    %c0_114 = arith.constant 0 : index
    %57 = vector.load %arg2[%c0_112, %c0_113, %c0_114] : memref<1x1x12xf32, #tpu.memory_space<vmem>>, vector<1x1x12xf32>
    %58 = vector.shape_cast %57 : vector<1x1x12xf32> to vector<1x12xf32>
    %59 = vector.broadcast %58 : vector<1x12xf32> to vector<8x12xf32>
    %60 = arith.subf %56, %59 : vector<8x12xf32>
    %cst = arith.constant dense<0.000000e+00> : vector<8x32xf32>
    %61 = tpu.matmul %60, %0, %cst {dimension_numbers = #tpu.dot_dimension_numbers<[1], [0], [0], [1], [0, 0, 1, 1], [], []>} : vector<8x12xf32>, vector<12x32xf32>, vector<8x32xf32> -> vector<8x32xf32>
    %62 = vector.broadcast %1 : vector<1x32xf32> to vector<8x32xf32>
    %63 = arith.addf %61, %62 : vector<8x32xf32>
    %cst_115 = arith.constant 0.000000e+00 : f32
    %64 = vector.broadcast %cst_115 : f32 to vector<8x32xf32>
    %65 = arith.cmpf oge, %63, %64 : vector<8x32xf32>
    %cst_116 = arith.constant 2.000000e-01 : f32
    %66 = vector.broadcast %cst_116 : f32 to vector<8x32xf32>
    %67 = arith.mulf %66, %63 : vector<8x32xf32>
    %68 = arith.select %65, %63, %67 : vector<8x32xi1>, vector<8x32xf32>
    %69 = vector.extract_strided_slice %68 {offsets = [0, 0], sizes = [1, 32], strides = [1, 1]} : vector<8x32xf32> to vector<1x32xf32>
    %70 = vector.extract_strided_slice %68 {offsets = [7, 0], sizes = [1, 32], strides = [1, 1]} : vector<8x32xf32> to vector<1x32xf32>
    %71 = tpu.concatenate %69, %69, %68, %70, %70 in 0 : vector<1x32xf32>, vector<1x32xf32>, vector<8x32xf32>, vector<1x32xf32>, vector<1x32xf32> -> vector<12x32xf32>
    %72 = vector.extract_strided_slice %71 {offsets = [0, 0], sizes = [8, 32], strides = [1, 1]} : vector<12x32xf32> to vector<8x32xf32>
    %73 = vector.extract_strided_slice %71 {offsets = [1, 0], sizes = [8, 32], strides = [1, 1]} : vector<12x32xf32> to vector<8x32xf32>
    %74 = vector.extract_strided_slice %71 {offsets = [2, 0], sizes = [8, 32], strides = [1, 1]} : vector<12x32xf32> to vector<8x32xf32>
    %75 = vector.extract_strided_slice %71 {offsets = [3, 0], sizes = [8, 32], strides = [1, 1]} : vector<12x32xf32> to vector<8x32xf32>
    %76 = vector.extract_strided_slice %71 {offsets = [4, 0], sizes = [8, 32], strides = [1, 1]} : vector<12x32xf32> to vector<8x32xf32>
    %77 = tpu.concatenate %72, %73, %74, %75, %76 in 1 : vector<8x32xf32>, vector<8x32xf32>, vector<8x32xf32>, vector<8x32xf32>, vector<8x32xf32> -> vector<8x160xf32>
    %cst_117 = arith.constant dense<0.000000e+00> : vector<8x32xf32>
    %78 = tpu.matmul %77, %2, %cst_117 {dimension_numbers = #tpu.dot_dimension_numbers<[1], [0], [0], [1], [0, 0, 1, 1], [], []>} : vector<8x160xf32>, vector<160x32xf32>, vector<8x32xf32> -> vector<8x32xf32>
    %79 = vector.broadcast %3 : vector<1x32xf32> to vector<8x32xf32>
    %80 = arith.addf %78, %79 : vector<8x32xf32>
    %cst_118 = arith.constant 0.000000e+00 : f32
    %81 = vector.broadcast %cst_118 : f32 to vector<8x32xf32>
    %82 = arith.cmpf oge, %80, %81 : vector<8x32xf32>
    %cst_119 = arith.constant 2.000000e-01 : f32
    %83 = vector.broadcast %cst_119 : f32 to vector<8x32xf32>
    %84 = arith.mulf %83, %80 : vector<8x32xf32>
    %85 = arith.select %82, %80, %84 : vector<8x32xi1>, vector<8x32xf32>
    %cst_120 = arith.constant dense<0.000000e+00> : vector<32xf32>
    %86 = vector.multi_reduction <add>, %85, %cst_120 [0] : vector<8x32xf32> to vector<32xf32>
    %87 = vector.shape_cast %86 : vector<32xf32> to vector<1x32xf32>
    %cst_121 = arith.constant 8.000000e+00 : f32
    %88 = vector.broadcast %cst_121 : f32 to vector<1x32xf32>
    %89 = arith.divf %87, %88 : vector<1x32xf32>
    %90 = vector.broadcast %89 : vector<1x32xf32> to vector<8x32xf32>
    %91 = arith.subf %85, %90 : vector<8x32xf32>
    %92 = arith.mulf %91, %91 : vector<8x32xf32>
    %cst_122 = arith.constant dense<0.000000e+00> : vector<32xf32>
    %93 = vector.multi_reduction <add>, %92, %cst_122 [0] : vector<8x32xf32> to vector<32xf32>
    %94 = vector.shape_cast %93 : vector<32xf32> to vector<1x32xf32>
    %cst_123 = arith.constant 8.000000e+00 : f32
    %95 = vector.broadcast %cst_123 : f32 to vector<1x32xf32>
    %96 = arith.divf %94, %95 : vector<1x32xf32>
    %97 = vector.broadcast %89 : vector<1x32xf32> to vector<8x32xf32>
    %98 = arith.subf %85, %97 : vector<8x32xf32>
    %cst_124 = arith.constant 9.99999974E-6 : f32
    %99 = vector.broadcast %cst_124 : f32 to vector<1x32xf32>
    %100 = arith.addf %96, %99 : vector<1x32xf32>
    %101 = math.rsqrt %100 : vector<1x32xf32>
    %102 = vector.broadcast %101 : vector<1x32xf32> to vector<8x32xf32>
    %103 = arith.mulf %98, %102 : vector<8x32xf32>
    %cst_125 = arith.constant dense<0.000000e+00> : vector<8x32xf32>
    %104 = tpu.matmul %103, %4, %cst_125 {dimension_numbers = #tpu.dot_dimension_numbers<[1], [0], [0], [1], [0, 0, 1, 1], [], []>} : vector<8x32xf32>, vector<32x32xf32>, vector<8x32xf32> -> vector<8x32xf32>
    %105 = vector.broadcast %5 : vector<1x32xf32> to vector<8x32xf32>
    %106 = arith.addf %104, %105 : vector<8x32xf32>
    %107 = arith.addf %106, %6 : vector<8x32xf32>
    %cst_126 = arith.constant 8.000000e+00 : f32
    %108 = math.sqrt %cst_126 : f32
    %cst_127 = arith.constant 1.000000e+00 : f32
    %109 = arith.divf %cst_127, %108 : f32
    %cst_128 = arith.constant dense<0.000000e+00> : vector<8x96xf32>
    %110 = tpu.matmul %107, %7, %cst_128 {dimension_numbers = #tpu.dot_dimension_numbers<[1], [0], [0], [1], [0, 0, 1, 1], [], []>} : vector<8x32xf32>, vector<32x96xf32>, vector<8x96xf32> -> vector<8x96xf32>
    %111 = vector.broadcast %8 : vector<1x96xf32> to vector<8x96xf32>
    %112 = arith.addf %110, %111 : vector<8x96xf32>
    %113 = vector.extract_strided_slice %112 {offsets = [0, 0], sizes = [8, 32], strides = [1, 1]} : vector<8x96xf32> to vector<8x32xf32>
    %114 = vector.extract_strided_slice %112 {offsets = [0, 32], sizes = [8, 32], strides = [1, 1]} : vector<8x96xf32> to vector<8x32xf32>
    %115 = vector.extract_strided_slice %112 {offsets = [0, 64], sizes = [8, 32], strides = [1, 1]} : vector<8x96xf32> to vector<8x32xf32>
    %cst_129 = arith.constant 0.000000e+00 : f32
    %116 = vector.broadcast %cst_129 : f32 to vector<8x32xf32>
    %117 = vector.extract_strided_slice %113 {offsets = [0, 0], sizes = [8, 8], strides = [1, 1]} : vector<8x32xf32> to vector<8x8xf32>
    %118 = vector.extract_strided_slice %114 {offsets = [0, 0], sizes = [8, 8], strides = [1, 1]} : vector<8x32xf32> to vector<8x8xf32>
    %119 = tpu.transpose %118, [1, 0] : vector<8x8xf32> -> vector<8x8xf32>
    %cst_130 = arith.constant dense<0.000000e+00> : vector<8x8xf32>
    %120 = tpu.matmul %117, %119, %cst_130 {dimension_numbers = #tpu.dot_dimension_numbers<[1], [0], [0], [1], [0, 0, 1, 1], [], []>} : vector<8x8xf32>, vector<8x8xf32>, vector<8x8xf32> -> vector<8x8xf32>
    %121 = vector.broadcast %109 : f32 to vector<8x8xf32>
    %122 = arith.mulf %120, %121 : vector<8x8xf32>
    %cst_131 = arith.constant dense<0xFF800000> : vector<8xf32>
    %123 = vector.multi_reduction <maximumf>, %122, %cst_131 [1] : vector<8x8xf32> to vector<8xf32>
    %cst_132 = arith.constant 0xFF800000 : f32
    %124 = vector.broadcast %cst_132 : f32 to vector<8xf32>
    %125 = arith.maximumf %124, %123 : vector<8xf32>
    %126 = vector.shape_cast %125 : vector<8xf32> to vector<8x1xf32>
    %127 = vector.broadcast %126 : vector<8x1xf32> to vector<8x8xf32>
    %128 = arith.subf %122, %127 : vector<8x8xf32>
    %129 = math.exp %128 : vector<8x8xf32>
    %cst_133 = arith.constant dense<0.000000e+00> : vector<8xf32>
    %130 = vector.multi_reduction <add>, %129, %cst_133 [1] : vector<8x8xf32> to vector<8xf32>
    %131 = vector.shape_cast %130 : vector<8xf32> to vector<8x1xf32>
    %132 = vector.broadcast %131 : vector<8x1xf32> to vector<8x8xf32>
    %133 = arith.divf %129, %132 : vector<8x8xf32>
    %134 = vector.extract_strided_slice %115 {offsets = [0, 0], sizes = [8, 8], strides = [1, 1]} : vector<8x32xf32> to vector<8x8xf32>
    %cst_134 = arith.constant dense<0.000000e+00> : vector<8x8xf32>
    %135 = tpu.matmul %133, %134, %cst_134 {dimension_numbers = #tpu.dot_dimension_numbers<[1], [0], [0], [1], [0, 0, 1, 1], [], []>} : vector<8x8xf32>, vector<8x8xf32>, vector<8x8xf32> -> vector<8x8xf32>
    %136 = vector.extract_strided_slice %9 {offsets = [0, 0], sizes = [8, 32], strides = [1, 1]} : vector<32x32xf32> to vector<8x32xf32>
    %cst_135 = arith.constant dense<0.000000e+00> : vector<8x32xf32>
    %137 = tpu.matmul %135, %136, %cst_135 {dimension_numbers = #tpu.dot_dimension_numbers<[1], [0], [0], [1], [0, 0, 1, 1], [], []>} : vector<8x8xf32>, vector<8x32xf32>, vector<8x32xf32> -> vector<8x32xf32>
    %138 = arith.addf %116, %137 : vector<8x32xf32>
    %139 = vector.extract_strided_slice %113 {offsets = [0, 8], sizes = [8, 8], strides = [1, 1]} : vector<8x32xf32> to vector<8x8xf32>
    %140 = vector.extract_strided_slice %114 {offsets = [0, 8], sizes = [8, 8], strides = [1, 1]} : vector<8x32xf32> to vector<8x8xf32>
    %141 = tpu.transpose %140, [1, 0] : vector<8x8xf32> -> vector<8x8xf32>
    %cst_136 = arith.constant dense<0.000000e+00> : vector<8x8xf32>
    %142 = tpu.matmul %139, %141, %cst_136 {dimension_numbers = #tpu.dot_dimension_numbers<[1], [0], [0], [1], [0, 0, 1, 1], [], []>} : vector<8x8xf32>, vector<8x8xf32>, vector<8x8xf32> -> vector<8x8xf32>
    %143 = vector.broadcast %109 : f32 to vector<8x8xf32>
    %144 = arith.mulf %142, %143 : vector<8x8xf32>
    %cst_137 = arith.constant dense<0xFF800000> : vector<8xf32>
    %145 = vector.multi_reduction <maximumf>, %144, %cst_137 [1] : vector<8x8xf32> to vector<8xf32>
    %cst_138 = arith.constant 0xFF800000 : f32
    %146 = vector.broadcast %cst_138 : f32 to vector<8xf32>
    %147 = arith.maximumf %146, %145 : vector<8xf32>
    %148 = vector.shape_cast %147 : vector<8xf32> to vector<8x1xf32>
    %149 = vector.broadcast %148 : vector<8x1xf32> to vector<8x8xf32>
    %150 = arith.subf %144, %149 : vector<8x8xf32>
    %151 = math.exp %150 : vector<8x8xf32>
    %cst_139 = arith.constant dense<0.000000e+00> : vector<8xf32>
    %152 = vector.multi_reduction <add>, %151, %cst_139 [1] : vector<8x8xf32> to vector<8xf32>
    %153 = vector.shape_cast %152 : vector<8xf32> to vector<8x1xf32>
    %154 = vector.broadcast %153 : vector<8x1xf32> to vector<8x8xf32>
    %155 = arith.divf %151, %154 : vector<8x8xf32>
    %156 = vector.extract_strided_slice %115 {offsets = [0, 8], sizes = [8, 8], strides = [1, 1]} : vector<8x32xf32> to vector<8x8xf32>
    %cst_140 = arith.constant dense<0.000000e+00> : vector<8x8xf32>
    %157 = tpu.matmul %155, %156, %cst_140 {dimension_numbers = #tpu.dot_dimension_numbers<[1], [0], [0], [1], [0, 0, 1, 1], [], []>} : vector<8x8xf32>, vector<8x8xf32>, vector<8x8xf32> -> vector<8x8xf32>
    %158 = vector.extract_strided_slice %9 {offsets = [8, 0], sizes = [8, 32], strides = [1, 1]} : vector<32x32xf32> to vector<8x32xf32>
    %cst_141 = arith.constant dense<0.000000e+00> : vector<8x32xf32>
    %159 = tpu.matmul %157, %158, %cst_141 {dimension_numbers = #tpu.dot_dimension_numbers<[1], [0], [0], [1], [0, 0, 1, 1], [], []>} : vector<8x8xf32>, vector<8x32xf32>, vector<8x32xf32> -> vector<8x32xf32>
    %160 = arith.addf %138, %159 : vector<8x32xf32>
    %161 = vector.extract_strided_slice %113 {offsets = [0, 16], sizes = [8, 8], strides = [1, 1]} : vector<8x32xf32> to vector<8x8xf32>
    %162 = vector.extract_strided_slice %114 {offsets = [0, 16], sizes = [8, 8], strides = [1, 1]} : vector<8x32xf32> to vector<8x8xf32>
    %163 = tpu.transpose %162, [1, 0] : vector<8x8xf32> -> vector<8x8xf32>
    %cst_142 = arith.constant dense<0.000000e+00> : vector<8x8xf32>
    %164 = tpu.matmul %161, %163, %cst_142 {dimension_numbers = #tpu.dot_dimension_numbers<[1], [0], [0], [1], [0, 0, 1, 1], [], []>} : vector<8x8xf32>, vector<8x8xf32>, vector<8x8xf32> -> vector<8x8xf32>
    %165 = vector.broadcast %109 : f32 to vector<8x8xf32>
    %166 = arith.mulf %164, %165 : vector<8x8xf32>
    %cst_143 = arith.constant dense<0xFF800000> : vector<8xf32>
    %167 = vector.multi_reduction <maximumf>, %166, %cst_143 [1] : vector<8x8xf32> to vector<8xf32>
    %cst_144 = arith.constant 0xFF800000 : f32
    %168 = vector.broadcast %cst_144 : f32 to vector<8xf32>
    %169 = arith.maximumf %168, %167 : vector<8xf32>
    %170 = vector.shape_cast %169 : vector<8xf32> to vector<8x1xf32>
    %171 = vector.broadcast %170 : vector<8x1xf32> to vector<8x8xf32>
    %172 = arith.subf %166, %171 : vector<8x8xf32>
    %173 = math.exp %172 : vector<8x8xf32>
    %cst_145 = arith.constant dense<0.000000e+00> : vector<8xf32>
    %174 = vector.multi_reduction <add>, %173, %cst_145 [1] : vector<8x8xf32> to vector<8xf32>
    %175 = vector.shape_cast %174 : vector<8xf32> to vector<8x1xf32>
    %176 = vector.broadcast %175 : vector<8x1xf32> to vector<8x8xf32>
    %177 = arith.divf %173, %176 : vector<8x8xf32>
    %178 = vector.extract_strided_slice %115 {offsets = [0, 16], sizes = [8, 8], strides = [1, 1]} : vector<8x32xf32> to vector<8x8xf32>
    %cst_146 = arith.constant dense<0.000000e+00> : vector<8x8xf32>
    %179 = tpu.matmul %177, %178, %cst_146 {dimension_numbers = #tpu.dot_dimension_numbers<[1], [0], [0], [1], [0, 0, 1, 1], [], []>} : vector<8x8xf32>, vector<8x8xf32>, vector<8x8xf32> -> vector<8x8xf32>
    %180 = vector.extract_strided_slice %9 {offsets = [16, 0], sizes = [8, 32], strides = [1, 1]} : vector<32x32xf32> to vector<8x32xf32>
    %cst_147 = arith.constant dense<0.000000e+00> : vector<8x32xf32>
    %181 = tpu.matmul %179, %180, %cst_147 {dimension_numbers = #tpu.dot_dimension_numbers<[1], [0], [0], [1], [0, 0, 1, 1], [], []>} : vector<8x8xf32>, vector<8x32xf32>, vector<8x32xf32> -> vector<8x32xf32>
    %182 = arith.addf %160, %181 : vector<8x32xf32>
    %183 = vector.extract_strided_slice %113 {offsets = [0, 24], sizes = [8, 8], strides = [1, 1]} : vector<8x32xf32> to vector<8x8xf32>
    %184 = vector.extract_strided_slice %114 {offsets = [0, 24], sizes = [8, 8], strides = [1, 1]} : vector<8x32xf32> to vector<8x8xf32>
    %185 = tpu.transpose %184, [1, 0] : vector<8x8xf32> -> vector<8x8xf32>
    %cst_148 = arith.constant dense<0.000000e+00> : vector<8x8xf32>
    %186 = tpu.matmul %183, %185, %cst_148 {dimension_numbers = #tpu.dot_dimension_numbers<[1], [0], [0], [1], [0, 0, 1, 1], [], []>} : vector<8x8xf32>, vector<8x8xf32>, vector<8x8xf32> -> vector<8x8xf32>
    %187 = vector.broadcast %109 : f32 to vector<8x8xf32>
    %188 = arith.mulf %186, %187 : vector<8x8xf32>
    %cst_149 = arith.constant dense<0xFF800000> : vector<8xf32>
    %189 = vector.multi_reduction <maximumf>, %188, %cst_149 [1] : vector<8x8xf32> to vector<8xf32>
    %cst_150 = arith.constant 0xFF800000 : f32
    %190 = vector.broadcast %cst_150 : f32 to vector<8xf32>
    %191 = arith.maximumf %190, %189 : vector<8xf32>
    %192 = vector.shape_cast %191 : vector<8xf32> to vector<8x1xf32>
    %193 = vector.broadcast %192 : vector<8x1xf32> to vector<8x8xf32>
    %194 = arith.subf %188, %193 : vector<8x8xf32>
    %195 = math.exp %194 : vector<8x8xf32>
    %cst_151 = arith.constant dense<0.000000e+00> : vector<8xf32>
    %196 = vector.multi_reduction <add>, %195, %cst_151 [1] : vector<8x8xf32> to vector<8xf32>
    %197 = vector.shape_cast %196 : vector<8xf32> to vector<8x1xf32>
    %198 = vector.broadcast %197 : vector<8x1xf32> to vector<8x8xf32>
    %199 = arith.divf %195, %198 : vector<8x8xf32>
    %200 = vector.extract_strided_slice %115 {offsets = [0, 24], sizes = [8, 8], strides = [1, 1]} : vector<8x32xf32> to vector<8x8xf32>
    %cst_152 = arith.constant dense<0.000000e+00> : vector<8x8xf32>
    %201 = tpu.matmul %199, %200, %cst_152 {dimension_numbers = #tpu.dot_dimension_numbers<[1], [0], [0], [1], [0, 0, 1, 1], [], []>} : vector<8x8xf32>, vector<8x8xf32>, vector<8x8xf32> -> vector<8x8xf32>
    %202 = vector.extract_strided_slice %9 {offsets = [24, 0], sizes = [8, 32], strides = [1, 1]} : vector<32x32xf32> to vector<8x32xf32>
    %cst_153 = arith.constant dense<0.000000e+00> : vector<8x32xf32>
    %203 = tpu.matmul %201, %202, %cst_153 {dimension_numbers = #tpu.dot_dimension_numbers<[1], [0], [0], [1], [0, 0, 1, 1], [], []>} : vector<8x8xf32>, vector<8x32xf32>, vector<8x32xf32> -> vector<8x32xf32>
    %204 = arith.addf %182, %203 : vector<8x32xf32>
    %205 = vector.broadcast %10 : vector<1x32xf32> to vector<8x32xf32>
    %206 = arith.addf %204, %205 : vector<8x32xf32>
    %207 = arith.addf %107, %206 : vector<8x32xf32>
    %208 = vector.extract_strided_slice %11 {offsets = [0, 0], sizes = [1, 32], strides = [1, 1]} : vector<2x32xf32> to vector<1x32xf32>
    %209 = vector.extract_strided_slice %11 {offsets = [1, 0], sizes = [1, 32], strides = [1, 1]} : vector<2x32xf32> to vector<1x32xf32>
    %cst_154 = arith.constant dense<0.000000e+00> : vector<8xf32>
    %210 = vector.multi_reduction <add>, %207, %cst_154 [1] : vector<8x32xf32> to vector<8xf32>
    %211 = vector.shape_cast %210 : vector<8xf32> to vector<8x1xf32>
    %cst_155 = arith.constant 3.200000e+01 : f32
    %212 = vector.broadcast %cst_155 : f32 to vector<8x1xf32>
    %213 = arith.divf %211, %212 : vector<8x1xf32>
    %214 = vector.broadcast %213 : vector<8x1xf32> to vector<8x32xf32>
    %215 = arith.subf %207, %214 : vector<8x32xf32>
    %216 = arith.mulf %215, %215 : vector<8x32xf32>
    %cst_156 = arith.constant dense<0.000000e+00> : vector<8xf32>
    %217 = vector.multi_reduction <add>, %216, %cst_156 [1] : vector<8x32xf32> to vector<8xf32>
    %218 = vector.shape_cast %217 : vector<8xf32> to vector<8x1xf32>
    %cst_157 = arith.constant 3.200000e+01 : f32
    %219 = vector.broadcast %cst_157 : f32 to vector<8x1xf32>
    %220 = arith.divf %218, %219 : vector<8x1xf32>
    %221 = vector.broadcast %213 : vector<8x1xf32> to vector<8x32xf32>
    %222 = arith.subf %207, %221 : vector<8x32xf32>
    %cst_158 = arith.constant 9.99999974E-6 : f32
    %223 = vector.broadcast %cst_158 : f32 to vector<8x1xf32>
    %224 = arith.addf %220, %223 : vector<8x1xf32>
    %225 = math.rsqrt %224 : vector<8x1xf32>
    %226 = vector.broadcast %225 : vector<8x1xf32> to vector<8x32xf32>
    %227 = arith.mulf %222, %226 : vector<8x32xf32>
    %228 = vector.broadcast %208 : vector<1x32xf32> to vector<8x32xf32>
    %229 = arith.mulf %227, %228 : vector<8x32xf32>
    %230 = vector.broadcast %209 : vector<1x32xf32> to vector<8x32xf32>
    %231 = arith.addf %229, %230 : vector<8x32xf32>
    %cst_159 = arith.constant dense<0.000000e+00> : vector<8x64xf32>
    %232 = tpu.matmul %231, %12, %cst_159 {dimension_numbers = #tpu.dot_dimension_numbers<[1], [0], [0], [1], [0, 0, 1, 1], [], []>} : vector<8x32xf32>, vector<32x64xf32>, vector<8x64xf32> -> vector<8x64xf32>
    %233 = vector.broadcast %13 : vector<1x64xf32> to vector<8x64xf32>
    %234 = arith.addf %232, %233 : vector<8x64xf32>
    %cst_160 = arith.constant 0.000000e+00 : f32
    %235 = vector.broadcast %cst_160 : f32 to vector<8x64xf32>
    %236 = arith.maximumf %234, %235 : vector<8x64xf32>
    %cst_161 = arith.constant dense<0.000000e+00> : vector<8x32xf32>
    %237 = tpu.matmul %236, %14, %cst_161 {dimension_numbers = #tpu.dot_dimension_numbers<[1], [0], [0], [1], [0, 0, 1, 1], [], []>} : vector<8x64xf32>, vector<64x32xf32>, vector<8x32xf32> -> vector<8x32xf32>
    %238 = vector.broadcast %15 : vector<1x32xf32> to vector<8x32xf32>
    %239 = arith.addf %237, %238 : vector<8x32xf32>
    %240 = arith.addf %231, %239 : vector<8x32xf32>
    %241 = vector.extract_strided_slice %16 {offsets = [0, 0], sizes = [1, 32], strides = [1, 1]} : vector<2x32xf32> to vector<1x32xf32>
    %242 = vector.extract_strided_slice %16 {offsets = [1, 0], sizes = [1, 32], strides = [1, 1]} : vector<2x32xf32> to vector<1x32xf32>
    %cst_162 = arith.constant dense<0.000000e+00> : vector<8xf32>
    %243 = vector.multi_reduction <add>, %240, %cst_162 [1] : vector<8x32xf32> to vector<8xf32>
    %244 = vector.shape_cast %243 : vector<8xf32> to vector<8x1xf32>
    %cst_163 = arith.constant 3.200000e+01 : f32
    %245 = vector.broadcast %cst_163 : f32 to vector<8x1xf32>
    %246 = arith.divf %244, %245 : vector<8x1xf32>
    %247 = vector.broadcast %246 : vector<8x1xf32> to vector<8x32xf32>
    %248 = arith.subf %240, %247 : vector<8x32xf32>
    %249 = arith.mulf %248, %248 : vector<8x32xf32>
    %cst_164 = arith.constant dense<0.000000e+00> : vector<8xf32>
    %250 = vector.multi_reduction <add>, %249, %cst_164 [1] : vector<8x32xf32> to vector<8xf32>
    %251 = vector.shape_cast %250 : vector<8xf32> to vector<8x1xf32>
    %cst_165 = arith.constant 3.200000e+01 : f32
    %252 = vector.broadcast %cst_165 : f32 to vector<8x1xf32>
    %253 = arith.divf %251, %252 : vector<8x1xf32>
    %254 = vector.broadcast %246 : vector<8x1xf32> to vector<8x32xf32>
    %255 = arith.subf %240, %254 : vector<8x32xf32>
    %cst_166 = arith.constant 9.99999974E-6 : f32
    %256 = vector.broadcast %cst_166 : f32 to vector<8x1xf32>
    %257 = arith.addf %253, %256 : vector<8x1xf32>
    %258 = math.rsqrt %257 : vector<8x1xf32>
    %259 = vector.broadcast %258 : vector<8x1xf32> to vector<8x32xf32>
    %260 = arith.mulf %255, %259 : vector<8x32xf32>
    %261 = vector.broadcast %241 : vector<1x32xf32> to vector<8x32xf32>
    %262 = arith.mulf %260, %261 : vector<8x32xf32>
    %263 = vector.broadcast %242 : vector<1x32xf32> to vector<8x32xf32>
    %264 = arith.addf %262, %263 : vector<8x32xf32>
    %cst_167 = arith.constant 8.000000e+00 : f32
    %265 = math.sqrt %cst_167 : f32
    %cst_168 = arith.constant 1.000000e+00 : f32
    %266 = arith.divf %cst_168, %265 : f32
    %cst_169 = arith.constant dense<0.000000e+00> : vector<8x96xf32>
    %267 = tpu.matmul %264, %17, %cst_169 {dimension_numbers = #tpu.dot_dimension_numbers<[1], [0], [0], [1], [0, 0, 1, 1], [], []>} : vector<8x32xf32>, vector<32x96xf32>, vector<8x96xf32> -> vector<8x96xf32>
    %268 = vector.broadcast %18 : vector<1x96xf32> to vector<8x96xf32>
    %269 = arith.addf %267, %268 : vector<8x96xf32>
    %270 = vector.extract_strided_slice %269 {offsets = [0, 0], sizes = [8, 32], strides = [1, 1]} : vector<8x96xf32> to vector<8x32xf32>
    %271 = vector.extract_strided_slice %269 {offsets = [0, 32], sizes = [8, 32], strides = [1, 1]} : vector<8x96xf32> to vector<8x32xf32>
    %272 = vector.extract_strided_slice %269 {offsets = [0, 64], sizes = [8, 32], strides = [1, 1]} : vector<8x96xf32> to vector<8x32xf32>
    %cst_170 = arith.constant 0.000000e+00 : f32
    %273 = vector.broadcast %cst_170 : f32 to vector<8x32xf32>
    %274 = vector.extract_strided_slice %270 {offsets = [0, 0], sizes = [8, 8], strides = [1, 1]} : vector<8x32xf32> to vector<8x8xf32>
    %275 = vector.extract_strided_slice %271 {offsets = [0, 0], sizes = [8, 8], strides = [1, 1]} : vector<8x32xf32> to vector<8x8xf32>
    %276 = tpu.transpose %275, [1, 0] : vector<8x8xf32> -> vector<8x8xf32>
    %cst_171 = arith.constant dense<0.000000e+00> : vector<8x8xf32>
    %277 = tpu.matmul %274, %276, %cst_171 {dimension_numbers = #tpu.dot_dimension_numbers<[1], [0], [0], [1], [0, 0, 1, 1], [], []>} : vector<8x8xf32>, vector<8x8xf32>, vector<8x8xf32> -> vector<8x8xf32>
    %278 = vector.broadcast %266 : f32 to vector<8x8xf32>
    %279 = arith.mulf %277, %278 : vector<8x8xf32>
    %cst_172 = arith.constant dense<0xFF800000> : vector<8xf32>
    %280 = vector.multi_reduction <maximumf>, %279, %cst_172 [1] : vector<8x8xf32> to vector<8xf32>
    %cst_173 = arith.constant 0xFF800000 : f32
    %281 = vector.broadcast %cst_173 : f32 to vector<8xf32>
    %282 = arith.maximumf %281, %280 : vector<8xf32>
    %283 = vector.shape_cast %282 : vector<8xf32> to vector<8x1xf32>
    %284 = vector.broadcast %283 : vector<8x1xf32> to vector<8x8xf32>
    %285 = arith.subf %279, %284 : vector<8x8xf32>
    %286 = math.exp %285 : vector<8x8xf32>
    %cst_174 = arith.constant dense<0.000000e+00> : vector<8xf32>
    %287 = vector.multi_reduction <add>, %286, %cst_174 [1] : vector<8x8xf32> to vector<8xf32>
    %288 = vector.shape_cast %287 : vector<8xf32> to vector<8x1xf32>
    %289 = vector.broadcast %288 : vector<8x1xf32> to vector<8x8xf32>
    %290 = arith.divf %286, %289 : vector<8x8xf32>
    %291 = vector.extract_strided_slice %272 {offsets = [0, 0], sizes = [8, 8], strides = [1, 1]} : vector<8x32xf32> to vector<8x8xf32>
    %cst_175 = arith.constant dense<0.000000e+00> : vector<8x8xf32>
    %292 = tpu.matmul %290, %291, %cst_175 {dimension_numbers = #tpu.dot_dimension_numbers<[1], [0], [0], [1], [0, 0, 1, 1], [], []>} : vector<8x8xf32>, vector<8x8xf32>, vector<8x8xf32> -> vector<8x8xf32>
    %293 = vector.extract_strided_slice %19 {offsets = [0, 0], sizes = [8, 32], strides = [1, 1]} : vector<32x32xf32> to vector<8x32xf32>
    %cst_176 = arith.constant dense<0.000000e+00> : vector<8x32xf32>
    %294 = tpu.matmul %292, %293, %cst_176 {dimension_numbers = #tpu.dot_dimension_numbers<[1], [0], [0], [1], [0, 0, 1, 1], [], []>} : vector<8x8xf32>, vector<8x32xf32>, vector<8x32xf32> -> vector<8x32xf32>
    %295 = arith.addf %273, %294 : vector<8x32xf32>
    %296 = vector.extract_strided_slice %270 {offsets = [0, 8], sizes = [8, 8], strides = [1, 1]} : vector<8x32xf32> to vector<8x8xf32>
    %297 = vector.extract_strided_slice %271 {offsets = [0, 8], sizes = [8, 8], strides = [1, 1]} : vector<8x32xf32> to vector<8x8xf32>
    %298 = tpu.transpose %297, [1, 0] : vector<8x8xf32> -> vector<8x8xf32>
    %cst_177 = arith.constant dense<0.000000e+00> : vector<8x8xf32>
    %299 = tpu.matmul %296, %298, %cst_177 {dimension_numbers = #tpu.dot_dimension_numbers<[1], [0], [0], [1], [0, 0, 1, 1], [], []>} : vector<8x8xf32>, vector<8x8xf32>, vector<8x8xf32> -> vector<8x8xf32>
    %300 = vector.broadcast %266 : f32 to vector<8x8xf32>
    %301 = arith.mulf %299, %300 : vector<8x8xf32>
    %cst_178 = arith.constant dense<0xFF800000> : vector<8xf32>
    %302 = vector.multi_reduction <maximumf>, %301, %cst_178 [1] : vector<8x8xf32> to vector<8xf32>
    %cst_179 = arith.constant 0xFF800000 : f32
    %303 = vector.broadcast %cst_179 : f32 to vector<8xf32>
    %304 = arith.maximumf %303, %302 : vector<8xf32>
    %305 = vector.shape_cast %304 : vector<8xf32> to vector<8x1xf32>
    %306 = vector.broadcast %305 : vector<8x1xf32> to vector<8x8xf32>
    %307 = arith.subf %301, %306 : vector<8x8xf32>
    %308 = math.exp %307 : vector<8x8xf32>
    %cst_180 = arith.constant dense<0.000000e+00> : vector<8xf32>
    %309 = vector.multi_reduction <add>, %308, %cst_180 [1] : vector<8x8xf32> to vector<8xf32>
    %310 = vector.shape_cast %309 : vector<8xf32> to vector<8x1xf32>
    %311 = vector.broadcast %310 : vector<8x1xf32> to vector<8x8xf32>
    %312 = arith.divf %308, %311 : vector<8x8xf32>
    %313 = vector.extract_strided_slice %272 {offsets = [0, 8], sizes = [8, 8], strides = [1, 1]} : vector<8x32xf32> to vector<8x8xf32>
    %cst_181 = arith.constant dense<0.000000e+00> : vector<8x8xf32>
    %314 = tpu.matmul %312, %313, %cst_181 {dimension_numbers = #tpu.dot_dimension_numbers<[1], [0], [0], [1], [0, 0, 1, 1], [], []>} : vector<8x8xf32>, vector<8x8xf32>, vector<8x8xf32> -> vector<8x8xf32>
    %315 = vector.extract_strided_slice %19 {offsets = [8, 0], sizes = [8, 32], strides = [1, 1]} : vector<32x32xf32> to vector<8x32xf32>
    %cst_182 = arith.constant dense<0.000000e+00> : vector<8x32xf32>
    %316 = tpu.matmul %314, %315, %cst_182 {dimension_numbers = #tpu.dot_dimension_numbers<[1], [0], [0], [1], [0, 0, 1, 1], [], []>} : vector<8x8xf32>, vector<8x32xf32>, vector<8x32xf32> -> vector<8x32xf32>
    %317 = arith.addf %295, %316 : vector<8x32xf32>
    %318 = vector.extract_strided_slice %270 {offsets = [0, 16], sizes = [8, 8], strides = [1, 1]} : vector<8x32xf32> to vector<8x8xf32>
    %319 = vector.extract_strided_slice %271 {offsets = [0, 16], sizes = [8, 8], strides = [1, 1]} : vector<8x32xf32> to vector<8x8xf32>
    %320 = tpu.transpose %319, [1, 0] : vector<8x8xf32> -> vector<8x8xf32>
    %cst_183 = arith.constant dense<0.000000e+00> : vector<8x8xf32>
    %321 = tpu.matmul %318, %320, %cst_183 {dimension_numbers = #tpu.dot_dimension_numbers<[1], [0], [0], [1], [0, 0, 1, 1], [], []>} : vector<8x8xf32>, vector<8x8xf32>, vector<8x8xf32> -> vector<8x8xf32>
    %322 = vector.broadcast %266 : f32 to vector<8x8xf32>
    %323 = arith.mulf %321, %322 : vector<8x8xf32>
    %cst_184 = arith.constant dense<0xFF800000> : vector<8xf32>
    %324 = vector.multi_reduction <maximumf>, %323, %cst_184 [1] : vector<8x8xf32> to vector<8xf32>
    %cst_185 = arith.constant 0xFF800000 : f32
    %325 = vector.broadcast %cst_185 : f32 to vector<8xf32>
    %326 = arith.maximumf %325, %324 : vector<8xf32>
    %327 = vector.shape_cast %326 : vector<8xf32> to vector<8x1xf32>
    %328 = vector.broadcast %327 : vector<8x1xf32> to vector<8x8xf32>
    %329 = arith.subf %323, %328 : vector<8x8xf32>
    %330 = math.exp %329 : vector<8x8xf32>
    %cst_186 = arith.constant dense<0.000000e+00> : vector<8xf32>
    %331 = vector.multi_reduction <add>, %330, %cst_186 [1] : vector<8x8xf32> to vector<8xf32>
    %332 = vector.shape_cast %331 : vector<8xf32> to vector<8x1xf32>
    %333 = vector.broadcast %332 : vector<8x1xf32> to vector<8x8xf32>
    %334 = arith.divf %330, %333 : vector<8x8xf32>
    %335 = vector.extract_strided_slice %272 {offsets = [0, 16], sizes = [8, 8], strides = [1, 1]} : vector<8x32xf32> to vector<8x8xf32>
    %cst_187 = arith.constant dense<0.000000e+00> : vector<8x8xf32>
    %336 = tpu.matmul %334, %335, %cst_187 {dimension_numbers = #tpu.dot_dimension_numbers<[1], [0], [0], [1], [0, 0, 1, 1], [], []>} : vector<8x8xf32>, vector<8x8xf32>, vector<8x8xf32> -> vector<8x8xf32>
    %337 = vector.extract_strided_slice %19 {offsets = [16, 0], sizes = [8, 32], strides = [1, 1]} : vector<32x32xf32> to vector<8x32xf32>
    %cst_188 = arith.constant dense<0.000000e+00> : vector<8x32xf32>
    %338 = tpu.matmul %336, %337, %cst_188 {dimension_numbers = #tpu.dot_dimension_numbers<[1], [0], [0], [1], [0, 0, 1, 1], [], []>} : vector<8x8xf32>, vector<8x32xf32>, vector<8x32xf32> -> vector<8x32xf32>
    %339 = arith.addf %317, %338 : vector<8x32xf32>
    %340 = vector.extract_strided_slice %270 {offsets = [0, 24], sizes = [8, 8], strides = [1, 1]} : vector<8x32xf32> to vector<8x8xf32>
    %341 = vector.extract_strided_slice %271 {offsets = [0, 24], sizes = [8, 8], strides = [1, 1]} : vector<8x32xf32> to vector<8x8xf32>
    %342 = tpu.transpose %341, [1, 0] : vector<8x8xf32> -> vector<8x8xf32>
    %cst_189 = arith.constant dense<0.000000e+00> : vector<8x8xf32>
    %343 = tpu.matmul %340, %342, %cst_189 {dimension_numbers = #tpu.dot_dimension_numbers<[1], [0], [0], [1], [0, 0, 1, 1], [], []>} : vector<8x8xf32>, vector<8x8xf32>, vector<8x8xf32> -> vector<8x8xf32>
    %344 = vector.broadcast %266 : f32 to vector<8x8xf32>
    %345 = arith.mulf %343, %344 : vector<8x8xf32>
    %cst_190 = arith.constant dense<0xFF800000> : vector<8xf32>
    %346 = vector.multi_reduction <maximumf>, %345, %cst_190 [1] : vector<8x8xf32> to vector<8xf32>
    %cst_191 = arith.constant 0xFF800000 : f32
    %347 = vector.broadcast %cst_191 : f32 to vector<8xf32>
    %348 = arith.maximumf %347, %346 : vector<8xf32>
    %349 = vector.shape_cast %348 : vector<8xf32> to vector<8x1xf32>
    %350 = vector.broadcast %349 : vector<8x1xf32> to vector<8x8xf32>
    %351 = arith.subf %345, %350 : vector<8x8xf32>
    %352 = math.exp %351 : vector<8x8xf32>
    %cst_192 = arith.constant dense<0.000000e+00> : vector<8xf32>
    %353 = vector.multi_reduction <add>, %352, %cst_192 [1] : vector<8x8xf32> to vector<8xf32>
    %354 = vector.shape_cast %353 : vector<8xf32> to vector<8x1xf32>
    %355 = vector.broadcast %354 : vector<8x1xf32> to vector<8x8xf32>
    %356 = arith.divf %352, %355 : vector<8x8xf32>
    %357 = vector.extract_strided_slice %272 {offsets = [0, 24], sizes = [8, 8], strides = [1, 1]} : vector<8x32xf32> to vector<8x8xf32>
    %cst_193 = arith.constant dense<0.000000e+00> : vector<8x8xf32>
    %358 = tpu.matmul %356, %357, %cst_193 {dimension_numbers = #tpu.dot_dimension_numbers<[1], [0], [0], [1], [0, 0, 1, 1], [], []>} : vector<8x8xf32>, vector<8x8xf32>, vector<8x8xf32> -> vector<8x8xf32>
    %359 = vector.extract_strided_slice %19 {offsets = [24, 0], sizes = [8, 32], strides = [1, 1]} : vector<32x32xf32> to vector<8x32xf32>
    %cst_194 = arith.constant dense<0.000000e+00> : vector<8x32xf32>
    %360 = tpu.matmul %358, %359, %cst_194 {dimension_numbers = #tpu.dot_dimension_numbers<[1], [0], [0], [1], [0, 0, 1, 1], [], []>} : vector<8x8xf32>, vector<8x32xf32>, vector<8x32xf32> -> vector<8x32xf32>
    %361 = arith.addf %339, %360 : vector<8x32xf32>
    %362 = vector.broadcast %20 : vector<1x32xf32> to vector<8x32xf32>
    %363 = arith.addf %361, %362 : vector<8x32xf32>
    %364 = arith.addf %264, %363 : vector<8x32xf32>
    %365 = vector.extract_strided_slice %21 {offsets = [0, 0], sizes = [1, 32], strides = [1, 1]} : vector<2x32xf32> to vector<1x32xf32>
    %366 = vector.extract_strided_slice %21 {offsets = [1, 0], sizes = [1, 32], strides = [1, 1]} : vector<2x32xf32> to vector<1x32xf32>
    %cst_195 = arith.constant dense<0.000000e+00> : vector<8xf32>
    %367 = vector.multi_reduction <add>, %364, %cst_195 [1] : vector<8x32xf32> to vector<8xf32>
    %368 = vector.shape_cast %367 : vector<8xf32> to vector<8x1xf32>
    %cst_196 = arith.constant 3.200000e+01 : f32
    %369 = vector.broadcast %cst_196 : f32 to vector<8x1xf32>
    %370 = arith.divf %368, %369 : vector<8x1xf32>
    %371 = vector.broadcast %370 : vector<8x1xf32> to vector<8x32xf32>
    %372 = arith.subf %364, %371 : vector<8x32xf32>
    %373 = arith.mulf %372, %372 : vector<8x32xf32>
    %cst_197 = arith.constant dense<0.000000e+00> : vector<8xf32>
    %374 = vector.multi_reduction <add>, %373, %cst_197 [1] : vector<8x32xf32> to vector<8xf32>
    %375 = vector.shape_cast %374 : vector<8xf32> to vector<8x1xf32>
    %cst_198 = arith.constant 3.200000e+01 : f32
    %376 = vector.broadcast %cst_198 : f32 to vector<8x1xf32>
    %377 = arith.divf %375, %376 : vector<8x1xf32>
    %378 = vector.broadcast %370 : vector<8x1xf32> to vector<8x32xf32>
    %379 = arith.subf %364, %378 : vector<8x32xf32>
    %cst_199 = arith.constant 9.99999974E-6 : f32
    %380 = vector.broadcast %cst_199 : f32 to vector<8x1xf32>
    %381 = arith.addf %377, %380 : vector<8x1xf32>
    %382 = math.rsqrt %381 : vector<8x1xf32>
    %383 = vector.broadcast %382 : vector<8x1xf32> to vector<8x32xf32>
    %384 = arith.mulf %379, %383 : vector<8x32xf32>
    %385 = vector.broadcast %365 : vector<1x32xf32> to vector<8x32xf32>
    %386 = arith.mulf %384, %385 : vector<8x32xf32>
    %387 = vector.broadcast %366 : vector<1x32xf32> to vector<8x32xf32>
    %388 = arith.addf %386, %387 : vector<8x32xf32>
    %cst_200 = arith.constant dense<0.000000e+00> : vector<8x64xf32>
    %389 = tpu.matmul %388, %22, %cst_200 {dimension_numbers = #tpu.dot_dimension_numbers<[1], [0], [0], [1], [0, 0, 1, 1], [], []>} : vector<8x32xf32>, vector<32x64xf32>, vector<8x64xf32> -> vector<8x64xf32>
    %390 = vector.broadcast %23 : vector<1x64xf32> to vector<8x64xf32>
    %391 = arith.addf %389, %390 : vector<8x64xf32>
    %cst_201 = arith.constant 0.000000e+00 : f32
    %392 = vector.broadcast %cst_201 : f32 to vector<8x64xf32>
    %393 = arith.maximumf %391, %392 : vector<8x64xf32>
    %cst_202 = arith.constant dense<0.000000e+00> : vector<8x32xf32>
    %394 = tpu.matmul %393, %24, %cst_202 {dimension_numbers = #tpu.dot_dimension_numbers<[1], [0], [0], [1], [0, 0, 1, 1], [], []>} : vector<8x64xf32>, vector<64x32xf32>, vector<8x32xf32> -> vector<8x32xf32>
    %395 = vector.broadcast %25 : vector<1x32xf32> to vector<8x32xf32>
    %396 = arith.addf %394, %395 : vector<8x32xf32>
    %397 = arith.addf %388, %396 : vector<8x32xf32>
    %398 = vector.extract_strided_slice %26 {offsets = [0, 0], sizes = [1, 32], strides = [1, 1]} : vector<2x32xf32> to vector<1x32xf32>
    %399 = vector.extract_strided_slice %26 {offsets = [1, 0], sizes = [1, 32], strides = [1, 1]} : vector<2x32xf32> to vector<1x32xf32>
    %cst_203 = arith.constant dense<0.000000e+00> : vector<8xf32>
    %400 = vector.multi_reduction <add>, %397, %cst_203 [1] : vector<8x32xf32> to vector<8xf32>
    %401 = vector.shape_cast %400 : vector<8xf32> to vector<8x1xf32>
    %cst_204 = arith.constant 3.200000e+01 : f32
    %402 = vector.broadcast %cst_204 : f32 to vector<8x1xf32>
    %403 = arith.divf %401, %402 : vector<8x1xf32>
    %404 = vector.broadcast %403 : vector<8x1xf32> to vector<8x32xf32>
    %405 = arith.subf %397, %404 : vector<8x32xf32>
    %406 = arith.mulf %405, %405 : vector<8x32xf32>
    %cst_205 = arith.constant dense<0.000000e+00> : vector<8xf32>
    %407 = vector.multi_reduction <add>, %406, %cst_205 [1] : vector<8x32xf32> to vector<8xf32>
    %408 = vector.shape_cast %407 : vector<8xf32> to vector<8x1xf32>
    %cst_206 = arith.constant 3.200000e+01 : f32
    %409 = vector.broadcast %cst_206 : f32 to vector<8x1xf32>
    %410 = arith.divf %408, %409 : vector<8x1xf32>
    %411 = vector.broadcast %403 : vector<8x1xf32> to vector<8x32xf32>
    %412 = arith.subf %397, %411 : vector<8x32xf32>
    %cst_207 = arith.constant 9.99999974E-6 : f32
    %413 = vector.broadcast %cst_207 : f32 to vector<8x1xf32>
    %414 = arith.addf %410, %413 : vector<8x1xf32>
    %415 = math.rsqrt %414 : vector<8x1xf32>
    %416 = vector.broadcast %415 : vector<8x1xf32> to vector<8x32xf32>
    %417 = arith.mulf %412, %416 : vector<8x32xf32>
    %418 = vector.broadcast %398 : vector<1x32xf32> to vector<8x32xf32>
    %419 = arith.mulf %417, %418 : vector<8x32xf32>
    %420 = vector.broadcast %399 : vector<1x32xf32> to vector<8x32xf32>
    %421 = arith.addf %419, %420 : vector<8x32xf32>
    %cst_208 = arith.constant dense<0.000000e+00> : vector<8x32xf32>
    %422 = tpu.matmul %421, %27, %cst_208 {dimension_numbers = #tpu.dot_dimension_numbers<[1], [0], [0], [1], [0, 0, 1, 1], [], []>} : vector<8x32xf32>, vector<32x32xf32>, vector<8x32xf32> -> vector<8x32xf32>
    %423 = vector.broadcast %28 : vector<1x32xf32> to vector<8x32xf32>
    %424 = arith.addf %422, %423 : vector<8x32xf32>
    %425 = vector.extract_strided_slice %424 {offsets = [0, 0], sizes = [1, 32], strides = [1, 1]} : vector<8x32xf32> to vector<1x32xf32>
    %426 = vector.extract_strided_slice %424 {offsets = [7, 0], sizes = [1, 32], strides = [1, 1]} : vector<8x32xf32> to vector<1x32xf32>
    %427 = tpu.concatenate %425, %425, %424, %426, %426 in 0 : vector<1x32xf32>, vector<1x32xf32>, vector<8x32xf32>, vector<1x32xf32>, vector<1x32xf32> -> vector<12x32xf32>
    %428 = vector.extract_strided_slice %427 {offsets = [0, 0], sizes = [8, 32], strides = [1, 1]} : vector<12x32xf32> to vector<8x32xf32>
    %429 = vector.extract_strided_slice %427 {offsets = [1, 0], sizes = [8, 32], strides = [1, 1]} : vector<12x32xf32> to vector<8x32xf32>
    %430 = vector.extract_strided_slice %427 {offsets = [2, 0], sizes = [8, 32], strides = [1, 1]} : vector<12x32xf32> to vector<8x32xf32>
    %431 = vector.extract_strided_slice %427 {offsets = [3, 0], sizes = [8, 32], strides = [1, 1]} : vector<12x32xf32> to vector<8x32xf32>
    %432 = vector.extract_strided_slice %427 {offsets = [4, 0], sizes = [8, 32], strides = [1, 1]} : vector<12x32xf32> to vector<8x32xf32>
    %433 = tpu.concatenate %428, %429, %430, %431, %432 in 1 : vector<8x32xf32>, vector<8x32xf32>, vector<8x32xf32>, vector<8x32xf32>, vector<8x32xf32> -> vector<8x160xf32>
    %cst_209 = arith.constant dense<0.000000e+00> : vector<8x32xf32>
    %434 = tpu.matmul %433, %29, %cst_209 {dimension_numbers = #tpu.dot_dimension_numbers<[1], [0], [0], [1], [0, 0, 1, 1], [], []>} : vector<8x160xf32>, vector<160x32xf32>, vector<8x32xf32> -> vector<8x32xf32>
    %435 = vector.broadcast %30 : vector<1x32xf32> to vector<8x32xf32>
    %436 = arith.addf %434, %435 : vector<8x32xf32>
    %cst_210 = arith.constant 0.000000e+00 : f32
    %437 = vector.broadcast %cst_210 : f32 to vector<8x32xf32>
    %438 = arith.cmpf oge, %436, %437 : vector<8x32xf32>
    %cst_211 = arith.constant 2.000000e-01 : f32
    %439 = vector.broadcast %cst_211 : f32 to vector<8x32xf32>
    %440 = arith.mulf %439, %436 : vector<8x32xf32>
    %441 = arith.select %438, %436, %440 : vector<8x32xi1>, vector<8x32xf32>
    %cst_212 = arith.constant dense<0.000000e+00> : vector<32xf32>
    %442 = vector.multi_reduction <add>, %441, %cst_212 [0] : vector<8x32xf32> to vector<32xf32>
    %443 = vector.shape_cast %442 : vector<32xf32> to vector<1x32xf32>
    %cst_213 = arith.constant 8.000000e+00 : f32
    %444 = vector.broadcast %cst_213 : f32 to vector<1x32xf32>
    %445 = arith.divf %443, %444 : vector<1x32xf32>
    %446 = vector.broadcast %445 : vector<1x32xf32> to vector<8x32xf32>
    %447 = arith.subf %441, %446 : vector<8x32xf32>
    %448 = arith.mulf %447, %447 : vector<8x32xf32>
    %cst_214 = arith.constant dense<0.000000e+00> : vector<32xf32>
    %449 = vector.multi_reduction <add>, %448, %cst_214 [0] : vector<8x32xf32> to vector<32xf32>
    %450 = vector.shape_cast %449 : vector<32xf32> to vector<1x32xf32>
    %cst_215 = arith.constant 8.000000e+00 : f32
    %451 = vector.broadcast %cst_215 : f32 to vector<1x32xf32>
    %452 = arith.divf %450, %451 : vector<1x32xf32>
    %453 = vector.broadcast %445 : vector<1x32xf32> to vector<8x32xf32>
    %454 = arith.subf %441, %453 : vector<8x32xf32>
    %cst_216 = arith.constant 9.99999974E-6 : f32
    %455 = vector.broadcast %cst_216 : f32 to vector<1x32xf32>
    %456 = arith.addf %452, %455 : vector<1x32xf32>
    %457 = math.rsqrt %456 : vector<1x32xf32>
    %458 = vector.broadcast %457 : vector<1x32xf32> to vector<8x32xf32>
    %459 = arith.mulf %454, %458 : vector<8x32xf32>
    %cst_217 = arith.constant dense<0.000000e+00> : vector<8x32xf32>
    %460 = tpu.matmul %459, %31, %cst_217 {dimension_numbers = #tpu.dot_dimension_numbers<[1], [0], [0], [1], [0, 0, 1, 1], [], []>} : vector<8x32xf32>, vector<32x32xf32>, vector<8x32xf32> -> vector<8x32xf32>
    %461 = vector.broadcast %32 : vector<1x32xf32> to vector<8x32xf32>
    %462 = arith.addf %460, %461 : vector<8x32xf32>
    %463 = arith.addf %462, %6 : vector<8x32xf32>
    %cst_218 = arith.constant 8.000000e+00 : f32
    %464 = math.sqrt %cst_218 : f32
    %cst_219 = arith.constant 1.000000e+00 : f32
    %465 = arith.divf %cst_219, %464 : f32
    %cst_220 = arith.constant dense<0.000000e+00> : vector<8x96xf32>
    %466 = tpu.matmul %463, %33, %cst_220 {dimension_numbers = #tpu.dot_dimension_numbers<[1], [0], [0], [1], [0, 0, 1, 1], [], []>} : vector<8x32xf32>, vector<32x96xf32>, vector<8x96xf32> -> vector<8x96xf32>
    %467 = vector.broadcast %34 : vector<1x96xf32> to vector<8x96xf32>
    %468 = arith.addf %466, %467 : vector<8x96xf32>
    %469 = vector.extract_strided_slice %468 {offsets = [0, 0], sizes = [8, 32], strides = [1, 1]} : vector<8x96xf32> to vector<8x32xf32>
    %470 = vector.extract_strided_slice %468 {offsets = [0, 32], sizes = [8, 32], strides = [1, 1]} : vector<8x96xf32> to vector<8x32xf32>
    %471 = vector.extract_strided_slice %468 {offsets = [0, 64], sizes = [8, 32], strides = [1, 1]} : vector<8x96xf32> to vector<8x32xf32>
    %cst_221 = arith.constant 0.000000e+00 : f32
    %472 = vector.broadcast %cst_221 : f32 to vector<8x32xf32>
    %473 = vector.extract_strided_slice %469 {offsets = [0, 0], sizes = [8, 8], strides = [1, 1]} : vector<8x32xf32> to vector<8x8xf32>
    %474 = vector.extract_strided_slice %470 {offsets = [0, 0], sizes = [8, 8], strides = [1, 1]} : vector<8x32xf32> to vector<8x8xf32>
    %475 = tpu.transpose %474, [1, 0] : vector<8x8xf32> -> vector<8x8xf32>
    %cst_222 = arith.constant dense<0.000000e+00> : vector<8x8xf32>
    %476 = tpu.matmul %473, %475, %cst_222 {dimension_numbers = #tpu.dot_dimension_numbers<[1], [0], [0], [1], [0, 0, 1, 1], [], []>} : vector<8x8xf32>, vector<8x8xf32>, vector<8x8xf32> -> vector<8x8xf32>
    %477 = vector.broadcast %465 : f32 to vector<8x8xf32>
    %478 = arith.mulf %476, %477 : vector<8x8xf32>
    %cst_223 = arith.constant dense<0xFF800000> : vector<8xf32>
    %479 = vector.multi_reduction <maximumf>, %478, %cst_223 [1] : vector<8x8xf32> to vector<8xf32>
    %cst_224 = arith.constant 0xFF800000 : f32
    %480 = vector.broadcast %cst_224 : f32 to vector<8xf32>
    %481 = arith.maximumf %480, %479 : vector<8xf32>
    %482 = vector.shape_cast %481 : vector<8xf32> to vector<8x1xf32>
    %483 = vector.broadcast %482 : vector<8x1xf32> to vector<8x8xf32>
    %484 = arith.subf %478, %483 : vector<8x8xf32>
    %485 = math.exp %484 : vector<8x8xf32>
    %cst_225 = arith.constant dense<0.000000e+00> : vector<8xf32>
    %486 = vector.multi_reduction <add>, %485, %cst_225 [1] : vector<8x8xf32> to vector<8xf32>
    %487 = vector.shape_cast %486 : vector<8xf32> to vector<8x1xf32>
    %488 = vector.broadcast %487 : vector<8x1xf32> to vector<8x8xf32>
    %489 = arith.divf %485, %488 : vector<8x8xf32>
    %490 = vector.extract_strided_slice %471 {offsets = [0, 0], sizes = [8, 8], strides = [1, 1]} : vector<8x32xf32> to vector<8x8xf32>
    %cst_226 = arith.constant dense<0.000000e+00> : vector<8x8xf32>
    %491 = tpu.matmul %489, %490, %cst_226 {dimension_numbers = #tpu.dot_dimension_numbers<[1], [0], [0], [1], [0, 0, 1, 1], [], []>} : vector<8x8xf32>, vector<8x8xf32>, vector<8x8xf32> -> vector<8x8xf32>
    %492 = vector.extract_strided_slice %35 {offsets = [0, 0], sizes = [8, 32], strides = [1, 1]} : vector<32x32xf32> to vector<8x32xf32>
    %cst_227 = arith.constant dense<0.000000e+00> : vector<8x32xf32>
    %493 = tpu.matmul %491, %492, %cst_227 {dimension_numbers = #tpu.dot_dimension_numbers<[1], [0], [0], [1], [0, 0, 1, 1], [], []>} : vector<8x8xf32>, vector<8x32xf32>, vector<8x32xf32> -> vector<8x32xf32>
    %494 = arith.addf %472, %493 : vector<8x32xf32>
    %495 = vector.extract_strided_slice %469 {offsets = [0, 8], sizes = [8, 8], strides = [1, 1]} : vector<8x32xf32> to vector<8x8xf32>
    %496 = vector.extract_strided_slice %470 {offsets = [0, 8], sizes = [8, 8], strides = [1, 1]} : vector<8x32xf32> to vector<8x8xf32>
    %497 = tpu.transpose %496, [1, 0] : vector<8x8xf32> -> vector<8x8xf32>
    %cst_228 = arith.constant dense<0.000000e+00> : vector<8x8xf32>
    %498 = tpu.matmul %495, %497, %cst_228 {dimension_numbers = #tpu.dot_dimension_numbers<[1], [0], [0], [1], [0, 0, 1, 1], [], []>} : vector<8x8xf32>, vector<8x8xf32>, vector<8x8xf32> -> vector<8x8xf32>
    %499 = vector.broadcast %465 : f32 to vector<8x8xf32>
    %500 = arith.mulf %498, %499 : vector<8x8xf32>
    %cst_229 = arith.constant dense<0xFF800000> : vector<8xf32>
    %501 = vector.multi_reduction <maximumf>, %500, %cst_229 [1] : vector<8x8xf32> to vector<8xf32>
    %cst_230 = arith.constant 0xFF800000 : f32
    %502 = vector.broadcast %cst_230 : f32 to vector<8xf32>
    %503 = arith.maximumf %502, %501 : vector<8xf32>
    %504 = vector.shape_cast %503 : vector<8xf32> to vector<8x1xf32>
    %505 = vector.broadcast %504 : vector<8x1xf32> to vector<8x8xf32>
    %506 = arith.subf %500, %505 : vector<8x8xf32>
    %507 = math.exp %506 : vector<8x8xf32>
    %cst_231 = arith.constant dense<0.000000e+00> : vector<8xf32>
    %508 = vector.multi_reduction <add>, %507, %cst_231 [1] : vector<8x8xf32> to vector<8xf32>
    %509 = vector.shape_cast %508 : vector<8xf32> to vector<8x1xf32>
    %510 = vector.broadcast %509 : vector<8x1xf32> to vector<8x8xf32>
    %511 = arith.divf %507, %510 : vector<8x8xf32>
    %512 = vector.extract_strided_slice %471 {offsets = [0, 8], sizes = [8, 8], strides = [1, 1]} : vector<8x32xf32> to vector<8x8xf32>
    %cst_232 = arith.constant dense<0.000000e+00> : vector<8x8xf32>
    %513 = tpu.matmul %511, %512, %cst_232 {dimension_numbers = #tpu.dot_dimension_numbers<[1], [0], [0], [1], [0, 0, 1, 1], [], []>} : vector<8x8xf32>, vector<8x8xf32>, vector<8x8xf32> -> vector<8x8xf32>
    %514 = vector.extract_strided_slice %35 {offsets = [8, 0], sizes = [8, 32], strides = [1, 1]} : vector<32x32xf32> to vector<8x32xf32>
    %cst_233 = arith.constant dense<0.000000e+00> : vector<8x32xf32>
    %515 = tpu.matmul %513, %514, %cst_233 {dimension_numbers = #tpu.dot_dimension_numbers<[1], [0], [0], [1], [0, 0, 1, 1], [], []>} : vector<8x8xf32>, vector<8x32xf32>, vector<8x32xf32> -> vector<8x32xf32>
    %516 = arith.addf %494, %515 : vector<8x32xf32>
    %517 = vector.extract_strided_slice %469 {offsets = [0, 16], sizes = [8, 8], strides = [1, 1]} : vector<8x32xf32> to vector<8x8xf32>
    %518 = vector.extract_strided_slice %470 {offsets = [0, 16], sizes = [8, 8], strides = [1, 1]} : vector<8x32xf32> to vector<8x8xf32>
    %519 = tpu.transpose %518, [1, 0] : vector<8x8xf32> -> vector<8x8xf32>
    %cst_234 = arith.constant dense<0.000000e+00> : vector<8x8xf32>
    %520 = tpu.matmul %517, %519, %cst_234 {dimension_numbers = #tpu.dot_dimension_numbers<[1], [0], [0], [1], [0, 0, 1, 1], [], []>} : vector<8x8xf32>, vector<8x8xf32>, vector<8x8xf32> -> vector<8x8xf32>
    %521 = vector.broadcast %465 : f32 to vector<8x8xf32>
    %522 = arith.mulf %520, %521 : vector<8x8xf32>
    %cst_235 = arith.constant dense<0xFF800000> : vector<8xf32>
    %523 = vector.multi_reduction <maximumf>, %522, %cst_235 [1] : vector<8x8xf32> to vector<8xf32>
    %cst_236 = arith.constant 0xFF800000 : f32
    %524 = vector.broadcast %cst_236 : f32 to vector<8xf32>
    %525 = arith.maximumf %524, %523 : vector<8xf32>
    %526 = vector.shape_cast %525 : vector<8xf32> to vector<8x1xf32>
    %527 = vector.broadcast %526 : vector<8x1xf32> to vector<8x8xf32>
    %528 = arith.subf %522, %527 : vector<8x8xf32>
    %529 = math.exp %528 : vector<8x8xf32>
    %cst_237 = arith.constant dense<0.000000e+00> : vector<8xf32>
    %530 = vector.multi_reduction <add>, %529, %cst_237 [1] : vector<8x8xf32> to vector<8xf32>
    %531 = vector.shape_cast %530 : vector<8xf32> to vector<8x1xf32>
    %532 = vector.broadcast %531 : vector<8x1xf32> to vector<8x8xf32>
    %533 = arith.divf %529, %532 : vector<8x8xf32>
    %534 = vector.extract_strided_slice %471 {offsets = [0, 16], sizes = [8, 8], strides = [1, 1]} : vector<8x32xf32> to vector<8x8xf32>
    %cst_238 = arith.constant dense<0.000000e+00> : vector<8x8xf32>
    %535 = tpu.matmul %533, %534, %cst_238 {dimension_numbers = #tpu.dot_dimension_numbers<[1], [0], [0], [1], [0, 0, 1, 1], [], []>} : vector<8x8xf32>, vector<8x8xf32>, vector<8x8xf32> -> vector<8x8xf32>
    %536 = vector.extract_strided_slice %35 {offsets = [16, 0], sizes = [8, 32], strides = [1, 1]} : vector<32x32xf32> to vector<8x32xf32>
    %cst_239 = arith.constant dense<0.000000e+00> : vector<8x32xf32>
    %537 = tpu.matmul %535, %536, %cst_239 {dimension_numbers = #tpu.dot_dimension_numbers<[1], [0], [0], [1], [0, 0, 1, 1], [], []>} : vector<8x8xf32>, vector<8x32xf32>, vector<8x32xf32> -> vector<8x32xf32>
    %538 = arith.addf %516, %537 : vector<8x32xf32>
    %539 = vector.extract_strided_slice %469 {offsets = [0, 24], sizes = [8, 8], strides = [1, 1]} : vector<8x32xf32> to vector<8x8xf32>
    %540 = vector.extract_strided_slice %470 {offsets = [0, 24], sizes = [8, 8], strides = [1, 1]} : vector<8x32xf32> to vector<8x8xf32>
    %541 = tpu.transpose %540, [1, 0] : vector<8x8xf32> -> vector<8x8xf32>
    %cst_240 = arith.constant dense<0.000000e+00> : vector<8x8xf32>
    %542 = tpu.matmul %539, %541, %cst_240 {dimension_numbers = #tpu.dot_dimension_numbers<[1], [0], [0], [1], [0, 0, 1, 1], [], []>} : vector<8x8xf32>, vector<8x8xf32>, vector<8x8xf32> -> vector<8x8xf32>
    %543 = vector.broadcast %465 : f32 to vector<8x8xf32>
    %544 = arith.mulf %542, %543 : vector<8x8xf32>
    %cst_241 = arith.constant dense<0xFF800000> : vector<8xf32>
    %545 = vector.multi_reduction <maximumf>, %544, %cst_241 [1] : vector<8x8xf32> to vector<8xf32>
    %cst_242 = arith.constant 0xFF800000 : f32
    %546 = vector.broadcast %cst_242 : f32 to vector<8xf32>
    %547 = arith.maximumf %546, %545 : vector<8xf32>
    %548 = vector.shape_cast %547 : vector<8xf32> to vector<8x1xf32>
    %549 = vector.broadcast %548 : vector<8x1xf32> to vector<8x8xf32>
    %550 = arith.subf %544, %549 : vector<8x8xf32>
    %551 = math.exp %550 : vector<8x8xf32>
    %cst_243 = arith.constant dense<0.000000e+00> : vector<8xf32>
    %552 = vector.multi_reduction <add>, %551, %cst_243 [1] : vector<8x8xf32> to vector<8xf32>
    %553 = vector.shape_cast %552 : vector<8xf32> to vector<8x1xf32>
    %554 = vector.broadcast %553 : vector<8x1xf32> to vector<8x8xf32>
    %555 = arith.divf %551, %554 : vector<8x8xf32>
    %556 = vector.extract_strided_slice %471 {offsets = [0, 24], sizes = [8, 8], strides = [1, 1]} : vector<8x32xf32> to vector<8x8xf32>
    %cst_244 = arith.constant dense<0.000000e+00> : vector<8x8xf32>
    %557 = tpu.matmul %555, %556, %cst_244 {dimension_numbers = #tpu.dot_dimension_numbers<[1], [0], [0], [1], [0, 0, 1, 1], [], []>} : vector<8x8xf32>, vector<8x8xf32>, vector<8x8xf32> -> vector<8x8xf32>
    %558 = vector.extract_strided_slice %35 {offsets = [24, 0], sizes = [8, 32], strides = [1, 1]} : vector<32x32xf32> to vector<8x32xf32>
    %cst_245 = arith.constant dense<0.000000e+00> : vector<8x32xf32>
    %559 = tpu.matmul %557, %558, %cst_245 {dimension_numbers = #tpu.dot_dimension_numbers<[1], [0], [0], [1], [0, 0, 1, 1], [], []>} : vector<8x8xf32>, vector<8x32xf32>, vector<8x32xf32> -> vector<8x32xf32>
    %560 = arith.addf %538, %559 : vector<8x32xf32>
    %561 = vector.broadcast %36 : vector<1x32xf32> to vector<8x32xf32>
    %562 = arith.addf %560, %561 : vector<8x32xf32>
    %563 = arith.addf %463, %562 : vector<8x32xf32>
    %564 = vector.extract_strided_slice %37 {offsets = [0, 0], sizes = [1, 32], strides = [1, 1]} : vector<2x32xf32> to vector<1x32xf32>
    %565 = vector.extract_strided_slice %37 {offsets = [1, 0], sizes = [1, 32], strides = [1, 1]} : vector<2x32xf32> to vector<1x32xf32>
    %cst_246 = arith.constant dense<0.000000e+00> : vector<8xf32>
    %566 = vector.multi_reduction <add>, %563, %cst_246 [1] : vector<8x32xf32> to vector<8xf32>
    %567 = vector.shape_cast %566 : vector<8xf32> to vector<8x1xf32>
    %cst_247 = arith.constant 3.200000e+01 : f32
    %568 = vector.broadcast %cst_247 : f32 to vector<8x1xf32>
    %569 = arith.divf %567, %568 : vector<8x1xf32>
    %570 = vector.broadcast %569 : vector<8x1xf32> to vector<8x32xf32>
    %571 = arith.subf %563, %570 : vector<8x32xf32>
    %572 = arith.mulf %571, %571 : vector<8x32xf32>
    %cst_248 = arith.constant dense<0.000000e+00> : vector<8xf32>
    %573 = vector.multi_reduction <add>, %572, %cst_248 [1] : vector<8x32xf32> to vector<8xf32>
    %574 = vector.shape_cast %573 : vector<8xf32> to vector<8x1xf32>
    %cst_249 = arith.constant 3.200000e+01 : f32
    %575 = vector.broadcast %cst_249 : f32 to vector<8x1xf32>
    %576 = arith.divf %574, %575 : vector<8x1xf32>
    %577 = vector.broadcast %569 : vector<8x1xf32> to vector<8x32xf32>
    %578 = arith.subf %563, %577 : vector<8x32xf32>
    %cst_250 = arith.constant 9.99999974E-6 : f32
    %579 = vector.broadcast %cst_250 : f32 to vector<8x1xf32>
    %580 = arith.addf %576, %579 : vector<8x1xf32>
    %581 = math.rsqrt %580 : vector<8x1xf32>
    %582 = vector.broadcast %581 : vector<8x1xf32> to vector<8x32xf32>
    %583 = arith.mulf %578, %582 : vector<8x32xf32>
    %584 = vector.broadcast %564 : vector<1x32xf32> to vector<8x32xf32>
    %585 = arith.mulf %583, %584 : vector<8x32xf32>
    %586 = vector.broadcast %565 : vector<1x32xf32> to vector<8x32xf32>
    %587 = arith.addf %585, %586 : vector<8x32xf32>
    %cst_251 = arith.constant dense<0.000000e+00> : vector<8x64xf32>
    %588 = tpu.matmul %587, %38, %cst_251 {dimension_numbers = #tpu.dot_dimension_numbers<[1], [0], [0], [1], [0, 0, 1, 1], [], []>} : vector<8x32xf32>, vector<32x64xf32>, vector<8x64xf32> -> vector<8x64xf32>
    %589 = vector.broadcast %39 : vector<1x64xf32> to vector<8x64xf32>
    %590 = arith.addf %588, %589 : vector<8x64xf32>
    %cst_252 = arith.constant 0.000000e+00 : f32
    %591 = vector.broadcast %cst_252 : f32 to vector<8x64xf32>
    %592 = arith.maximumf %590, %591 : vector<8x64xf32>
    %cst_253 = arith.constant dense<0.000000e+00> : vector<8x32xf32>
    %593 = tpu.matmul %592, %40, %cst_253 {dimension_numbers = #tpu.dot_dimension_numbers<[1], [0], [0], [1], [0, 0, 1, 1], [], []>} : vector<8x64xf32>, vector<64x32xf32>, vector<8x32xf32> -> vector<8x32xf32>
    %594 = vector.broadcast %41 : vector<1x32xf32> to vector<8x32xf32>
    %595 = arith.addf %593, %594 : vector<8x32xf32>
    %596 = arith.addf %587, %595 : vector<8x32xf32>
    %597 = vector.extract_strided_slice %42 {offsets = [0, 0], sizes = [1, 32], strides = [1, 1]} : vector<2x32xf32> to vector<1x32xf32>
    %598 = vector.extract_strided_slice %42 {offsets = [1, 0], sizes = [1, 32], strides = [1, 1]} : vector<2x32xf32> to vector<1x32xf32>
    %cst_254 = arith.constant dense<0.000000e+00> : vector<8xf32>
    %599 = vector.multi_reduction <add>, %596, %cst_254 [1] : vector<8x32xf32> to vector<8xf32>
    %600 = vector.shape_cast %599 : vector<8xf32> to vector<8x1xf32>
    %cst_255 = arith.constant 3.200000e+01 : f32
    %601 = vector.broadcast %cst_255 : f32 to vector<8x1xf32>
    %602 = arith.divf %600, %601 : vector<8x1xf32>
    %603 = vector.broadcast %602 : vector<8x1xf32> to vector<8x32xf32>
    %604 = arith.subf %596, %603 : vector<8x32xf32>
    %605 = arith.mulf %604, %604 : vector<8x32xf32>
    %cst_256 = arith.constant dense<0.000000e+00> : vector<8xf32>
    %606 = vector.multi_reduction <add>, %605, %cst_256 [1] : vector<8x32xf32> to vector<8xf32>
    %607 = vector.shape_cast %606 : vector<8xf32> to vector<8x1xf32>
    %cst_257 = arith.constant 3.200000e+01 : f32
    %608 = vector.broadcast %cst_257 : f32 to vector<8x1xf32>
    %609 = arith.divf %607, %608 : vector<8x1xf32>
    %610 = vector.broadcast %602 : vector<8x1xf32> to vector<8x32xf32>
    %611 = arith.subf %596, %610 : vector<8x32xf32>
    %cst_258 = arith.constant 9.99999974E-6 : f32
    %612 = vector.broadcast %cst_258 : f32 to vector<8x1xf32>
    %613 = arith.addf %609, %612 : vector<8x1xf32>
    %614 = math.rsqrt %613 : vector<8x1xf32>
    %615 = vector.broadcast %614 : vector<8x1xf32> to vector<8x32xf32>
    %616 = arith.mulf %611, %615 : vector<8x32xf32>
    %617 = vector.broadcast %597 : vector<1x32xf32> to vector<8x32xf32>
    %618 = arith.mulf %616, %617 : vector<8x32xf32>
    %619 = vector.broadcast %598 : vector<1x32xf32> to vector<8x32xf32>
    %620 = arith.addf %618, %619 : vector<8x32xf32>
    %cst_259 = arith.constant 8.000000e+00 : f32
    %621 = math.sqrt %cst_259 : f32
    %cst_260 = arith.constant 1.000000e+00 : f32
    %622 = arith.divf %cst_260, %621 : f32
    %cst_261 = arith.constant dense<0.000000e+00> : vector<8x96xf32>
    %623 = tpu.matmul %620, %43, %cst_261 {dimension_numbers = #tpu.dot_dimension_numbers<[1], [0], [0], [1], [0, 0, 1, 1], [], []>} : vector<8x32xf32>, vector<32x96xf32>, vector<8x96xf32> -> vector<8x96xf32>
    %624 = vector.broadcast %44 : vector<1x96xf32> to vector<8x96xf32>
    %625 = arith.addf %623, %624 : vector<8x96xf32>
    %626 = vector.extract_strided_slice %625 {offsets = [0, 0], sizes = [8, 32], strides = [1, 1]} : vector<8x96xf32> to vector<8x32xf32>
    %627 = vector.extract_strided_slice %625 {offsets = [0, 32], sizes = [8, 32], strides = [1, 1]} : vector<8x96xf32> to vector<8x32xf32>
    %628 = vector.extract_strided_slice %625 {offsets = [0, 64], sizes = [8, 32], strides = [1, 1]} : vector<8x96xf32> to vector<8x32xf32>
    %cst_262 = arith.constant 0.000000e+00 : f32
    %629 = vector.broadcast %cst_262 : f32 to vector<8x32xf32>
    %630 = vector.extract_strided_slice %626 {offsets = [0, 0], sizes = [8, 8], strides = [1, 1]} : vector<8x32xf32> to vector<8x8xf32>
    %631 = vector.extract_strided_slice %627 {offsets = [0, 0], sizes = [8, 8], strides = [1, 1]} : vector<8x32xf32> to vector<8x8xf32>
    %632 = tpu.transpose %631, [1, 0] : vector<8x8xf32> -> vector<8x8xf32>
    %cst_263 = arith.constant dense<0.000000e+00> : vector<8x8xf32>
    %633 = tpu.matmul %630, %632, %cst_263 {dimension_numbers = #tpu.dot_dimension_numbers<[1], [0], [0], [1], [0, 0, 1, 1], [], []>} : vector<8x8xf32>, vector<8x8xf32>, vector<8x8xf32> -> vector<8x8xf32>
    %634 = vector.broadcast %622 : f32 to vector<8x8xf32>
    %635 = arith.mulf %633, %634 : vector<8x8xf32>
    %cst_264 = arith.constant dense<0xFF800000> : vector<8xf32>
    %636 = vector.multi_reduction <maximumf>, %635, %cst_264 [1] : vector<8x8xf32> to vector<8xf32>
    %cst_265 = arith.constant 0xFF800000 : f32
    %637 = vector.broadcast %cst_265 : f32 to vector<8xf32>
    %638 = arith.maximumf %637, %636 : vector<8xf32>
    %639 = vector.shape_cast %638 : vector<8xf32> to vector<8x1xf32>
    %640 = vector.broadcast %639 : vector<8x1xf32> to vector<8x8xf32>
    %641 = arith.subf %635, %640 : vector<8x8xf32>
    %642 = math.exp %641 : vector<8x8xf32>
    %cst_266 = arith.constant dense<0.000000e+00> : vector<8xf32>
    %643 = vector.multi_reduction <add>, %642, %cst_266 [1] : vector<8x8xf32> to vector<8xf32>
    %644 = vector.shape_cast %643 : vector<8xf32> to vector<8x1xf32>
    %645 = vector.broadcast %644 : vector<8x1xf32> to vector<8x8xf32>
    %646 = arith.divf %642, %645 : vector<8x8xf32>
    %647 = vector.extract_strided_slice %628 {offsets = [0, 0], sizes = [8, 8], strides = [1, 1]} : vector<8x32xf32> to vector<8x8xf32>
    %cst_267 = arith.constant dense<0.000000e+00> : vector<8x8xf32>
    %648 = tpu.matmul %646, %647, %cst_267 {dimension_numbers = #tpu.dot_dimension_numbers<[1], [0], [0], [1], [0, 0, 1, 1], [], []>} : vector<8x8xf32>, vector<8x8xf32>, vector<8x8xf32> -> vector<8x8xf32>
    %649 = vector.extract_strided_slice %45 {offsets = [0, 0], sizes = [8, 32], strides = [1, 1]} : vector<32x32xf32> to vector<8x32xf32>
    %cst_268 = arith.constant dense<0.000000e+00> : vector<8x32xf32>
    %650 = tpu.matmul %648, %649, %cst_268 {dimension_numbers = #tpu.dot_dimension_numbers<[1], [0], [0], [1], [0, 0, 1, 1], [], []>} : vector<8x8xf32>, vector<8x32xf32>, vector<8x32xf32> -> vector<8x32xf32>
    %651 = arith.addf %629, %650 : vector<8x32xf32>
    %652 = vector.extract_strided_slice %626 {offsets = [0, 8], sizes = [8, 8], strides = [1, 1]} : vector<8x32xf32> to vector<8x8xf32>
    %653 = vector.extract_strided_slice %627 {offsets = [0, 8], sizes = [8, 8], strides = [1, 1]} : vector<8x32xf32> to vector<8x8xf32>
    %654 = tpu.transpose %653, [1, 0] : vector<8x8xf32> -> vector<8x8xf32>
    %cst_269 = arith.constant dense<0.000000e+00> : vector<8x8xf32>
    %655 = tpu.matmul %652, %654, %cst_269 {dimension_numbers = #tpu.dot_dimension_numbers<[1], [0], [0], [1], [0, 0, 1, 1], [], []>} : vector<8x8xf32>, vector<8x8xf32>, vector<8x8xf32> -> vector<8x8xf32>
    %656 = vector.broadcast %622 : f32 to vector<8x8xf32>
    %657 = arith.mulf %655, %656 : vector<8x8xf32>
    %cst_270 = arith.constant dense<0xFF800000> : vector<8xf32>
    %658 = vector.multi_reduction <maximumf>, %657, %cst_270 [1] : vector<8x8xf32> to vector<8xf32>
    %cst_271 = arith.constant 0xFF800000 : f32
    %659 = vector.broadcast %cst_271 : f32 to vector<8xf32>
    %660 = arith.maximumf %659, %658 : vector<8xf32>
    %661 = vector.shape_cast %660 : vector<8xf32> to vector<8x1xf32>
    %662 = vector.broadcast %661 : vector<8x1xf32> to vector<8x8xf32>
    %663 = arith.subf %657, %662 : vector<8x8xf32>
    %664 = math.exp %663 : vector<8x8xf32>
    %cst_272 = arith.constant dense<0.000000e+00> : vector<8xf32>
    %665 = vector.multi_reduction <add>, %664, %cst_272 [1] : vector<8x8xf32> to vector<8xf32>
    %666 = vector.shape_cast %665 : vector<8xf32> to vector<8x1xf32>
    %667 = vector.broadcast %666 : vector<8x1xf32> to vector<8x8xf32>
    %668 = arith.divf %664, %667 : vector<8x8xf32>
    %669 = vector.extract_strided_slice %628 {offsets = [0, 8], sizes = [8, 8], strides = [1, 1]} : vector<8x32xf32> to vector<8x8xf32>
    %cst_273 = arith.constant dense<0.000000e+00> : vector<8x8xf32>
    %670 = tpu.matmul %668, %669, %cst_273 {dimension_numbers = #tpu.dot_dimension_numbers<[1], [0], [0], [1], [0, 0, 1, 1], [], []>} : vector<8x8xf32>, vector<8x8xf32>, vector<8x8xf32> -> vector<8x8xf32>
    %671 = vector.extract_strided_slice %45 {offsets = [8, 0], sizes = [8, 32], strides = [1, 1]} : vector<32x32xf32> to vector<8x32xf32>
    %cst_274 = arith.constant dense<0.000000e+00> : vector<8x32xf32>
    %672 = tpu.matmul %670, %671, %cst_274 {dimension_numbers = #tpu.dot_dimension_numbers<[1], [0], [0], [1], [0, 0, 1, 1], [], []>} : vector<8x8xf32>, vector<8x32xf32>, vector<8x32xf32> -> vector<8x32xf32>
    %673 = arith.addf %651, %672 : vector<8x32xf32>
    %674 = vector.extract_strided_slice %626 {offsets = [0, 16], sizes = [8, 8], strides = [1, 1]} : vector<8x32xf32> to vector<8x8xf32>
    %675 = vector.extract_strided_slice %627 {offsets = [0, 16], sizes = [8, 8], strides = [1, 1]} : vector<8x32xf32> to vector<8x8xf32>
    %676 = tpu.transpose %675, [1, 0] : vector<8x8xf32> -> vector<8x8xf32>
    %cst_275 = arith.constant dense<0.000000e+00> : vector<8x8xf32>
    %677 = tpu.matmul %674, %676, %cst_275 {dimension_numbers = #tpu.dot_dimension_numbers<[1], [0], [0], [1], [0, 0, 1, 1], [], []>} : vector<8x8xf32>, vector<8x8xf32>, vector<8x8xf32> -> vector<8x8xf32>
    %678 = vector.broadcast %622 : f32 to vector<8x8xf32>
    %679 = arith.mulf %677, %678 : vector<8x8xf32>
    %cst_276 = arith.constant dense<0xFF800000> : vector<8xf32>
    %680 = vector.multi_reduction <maximumf>, %679, %cst_276 [1] : vector<8x8xf32> to vector<8xf32>
    %cst_277 = arith.constant 0xFF800000 : f32
    %681 = vector.broadcast %cst_277 : f32 to vector<8xf32>
    %682 = arith.maximumf %681, %680 : vector<8xf32>
    %683 = vector.shape_cast %682 : vector<8xf32> to vector<8x1xf32>
    %684 = vector.broadcast %683 : vector<8x1xf32> to vector<8x8xf32>
    %685 = arith.subf %679, %684 : vector<8x8xf32>
    %686 = math.exp %685 : vector<8x8xf32>
    %cst_278 = arith.constant dense<0.000000e+00> : vector<8xf32>
    %687 = vector.multi_reduction <add>, %686, %cst_278 [1] : vector<8x8xf32> to vector<8xf32>
    %688 = vector.shape_cast %687 : vector<8xf32> to vector<8x1xf32>
    %689 = vector.broadcast %688 : vector<8x1xf32> to vector<8x8xf32>
    %690 = arith.divf %686, %689 : vector<8x8xf32>
    %691 = vector.extract_strided_slice %628 {offsets = [0, 16], sizes = [8, 8], strides = [1, 1]} : vector<8x32xf32> to vector<8x8xf32>
    %cst_279 = arith.constant dense<0.000000e+00> : vector<8x8xf32>
    %692 = tpu.matmul %690, %691, %cst_279 {dimension_numbers = #tpu.dot_dimension_numbers<[1], [0], [0], [1], [0, 0, 1, 1], [], []>} : vector<8x8xf32>, vector<8x8xf32>, vector<8x8xf32> -> vector<8x8xf32>
    %693 = vector.extract_strided_slice %45 {offsets = [16, 0], sizes = [8, 32], strides = [1, 1]} : vector<32x32xf32> to vector<8x32xf32>
    %cst_280 = arith.constant dense<0.000000e+00> : vector<8x32xf32>
    %694 = tpu.matmul %692, %693, %cst_280 {dimension_numbers = #tpu.dot_dimension_numbers<[1], [0], [0], [1], [0, 0, 1, 1], [], []>} : vector<8x8xf32>, vector<8x32xf32>, vector<8x32xf32> -> vector<8x32xf32>
    %695 = arith.addf %673, %694 : vector<8x32xf32>
    %696 = vector.extract_strided_slice %626 {offsets = [0, 24], sizes = [8, 8], strides = [1, 1]} : vector<8x32xf32> to vector<8x8xf32>
    %697 = vector.extract_strided_slice %627 {offsets = [0, 24], sizes = [8, 8], strides = [1, 1]} : vector<8x32xf32> to vector<8x8xf32>
    %698 = tpu.transpose %697, [1, 0] : vector<8x8xf32> -> vector<8x8xf32>
    %cst_281 = arith.constant dense<0.000000e+00> : vector<8x8xf32>
    %699 = tpu.matmul %696, %698, %cst_281 {dimension_numbers = #tpu.dot_dimension_numbers<[1], [0], [0], [1], [0, 0, 1, 1], [], []>} : vector<8x8xf32>, vector<8x8xf32>, vector<8x8xf32> -> vector<8x8xf32>
    %700 = vector.broadcast %622 : f32 to vector<8x8xf32>
    %701 = arith.mulf %699, %700 : vector<8x8xf32>
    %cst_282 = arith.constant dense<0xFF800000> : vector<8xf32>
    %702 = vector.multi_reduction <maximumf>, %701, %cst_282 [1] : vector<8x8xf32> to vector<8xf32>
    %cst_283 = arith.constant 0xFF800000 : f32
    %703 = vector.broadcast %cst_283 : f32 to vector<8xf32>
    %704 = arith.maximumf %703, %702 : vector<8xf32>
    %705 = vector.shape_cast %704 : vector<8xf32> to vector<8x1xf32>
    %706 = vector.broadcast %705 : vector<8x1xf32> to vector<8x8xf32>
    %707 = arith.subf %701, %706 : vector<8x8xf32>
    %708 = math.exp %707 : vector<8x8xf32>
    %cst_284 = arith.constant dense<0.000000e+00> : vector<8xf32>
    %709 = vector.multi_reduction <add>, %708, %cst_284 [1] : vector<8x8xf32> to vector<8xf32>
    %710 = vector.shape_cast %709 : vector<8xf32> to vector<8x1xf32>
    %711 = vector.broadcast %710 : vector<8x1xf32> to vector<8x8xf32>
    %712 = arith.divf %708, %711 : vector<8x8xf32>
    %713 = vector.extract_strided_slice %628 {offsets = [0, 24], sizes = [8, 8], strides = [1, 1]} : vector<8x32xf32> to vector<8x8xf32>
    %cst_285 = arith.constant dense<0.000000e+00> : vector<8x8xf32>
    %714 = tpu.matmul %712, %713, %cst_285 {dimension_numbers = #tpu.dot_dimension_numbers<[1], [0], [0], [1], [0, 0, 1, 1], [], []>} : vector<8x8xf32>, vector<8x8xf32>, vector<8x8xf32> -> vector<8x8xf32>
    %715 = vector.extract_strided_slice %45 {offsets = [24, 0], sizes = [8, 32], strides = [1, 1]} : vector<32x32xf32> to vector<8x32xf32>
    %cst_286 = arith.constant dense<0.000000e+00> : vector<8x32xf32>
    %716 = tpu.matmul %714, %715, %cst_286 {dimension_numbers = #tpu.dot_dimension_numbers<[1], [0], [0], [1], [0, 0, 1, 1], [], []>} : vector<8x8xf32>, vector<8x32xf32>, vector<8x32xf32> -> vector<8x32xf32>
    %717 = arith.addf %695, %716 : vector<8x32xf32>
    %718 = vector.broadcast %46 : vector<1x32xf32> to vector<8x32xf32>
    %719 = arith.addf %717, %718 : vector<8x32xf32>
    %720 = arith.addf %620, %719 : vector<8x32xf32>
    %721 = vector.extract_strided_slice %47 {offsets = [0, 0], sizes = [1, 32], strides = [1, 1]} : vector<2x32xf32> to vector<1x32xf32>
    %722 = vector.extract_strided_slice %47 {offsets = [1, 0], sizes = [1, 32], strides = [1, 1]} : vector<2x32xf32> to vector<1x32xf32>
    %cst_287 = arith.constant dense<0.000000e+00> : vector<8xf32>
    %723 = vector.multi_reduction <add>, %720, %cst_287 [1] : vector<8x32xf32> to vector<8xf32>
    %724 = vector.shape_cast %723 : vector<8xf32> to vector<8x1xf32>
    %cst_288 = arith.constant 3.200000e+01 : f32
    %725 = vector.broadcast %cst_288 : f32 to vector<8x1xf32>
    %726 = arith.divf %724, %725 : vector<8x1xf32>
    %727 = vector.broadcast %726 : vector<8x1xf32> to vector<8x32xf32>
    %728 = arith.subf %720, %727 : vector<8x32xf32>
    %729 = arith.mulf %728, %728 : vector<8x32xf32>
    %cst_289 = arith.constant dense<0.000000e+00> : vector<8xf32>
    %730 = vector.multi_reduction <add>, %729, %cst_289 [1] : vector<8x32xf32> to vector<8xf32>
    %731 = vector.shape_cast %730 : vector<8xf32> to vector<8x1xf32>
    %cst_290 = arith.constant 3.200000e+01 : f32
    %732 = vector.broadcast %cst_290 : f32 to vector<8x1xf32>
    %733 = arith.divf %731, %732 : vector<8x1xf32>
    %734 = vector.broadcast %726 : vector<8x1xf32> to vector<8x32xf32>
    %735 = arith.subf %720, %734 : vector<8x32xf32>
    %cst_291 = arith.constant 9.99999974E-6 : f32
    %736 = vector.broadcast %cst_291 : f32 to vector<8x1xf32>
    %737 = arith.addf %733, %736 : vector<8x1xf32>
    %738 = math.rsqrt %737 : vector<8x1xf32>
    %739 = vector.broadcast %738 : vector<8x1xf32> to vector<8x32xf32>
    %740 = arith.mulf %735, %739 : vector<8x32xf32>
    %741 = vector.broadcast %721 : vector<1x32xf32> to vector<8x32xf32>
    %742 = arith.mulf %740, %741 : vector<8x32xf32>
    %743 = vector.broadcast %722 : vector<1x32xf32> to vector<8x32xf32>
    %744 = arith.addf %742, %743 : vector<8x32xf32>
    %cst_292 = arith.constant dense<0.000000e+00> : vector<8x64xf32>
    %745 = tpu.matmul %744, %48, %cst_292 {dimension_numbers = #tpu.dot_dimension_numbers<[1], [0], [0], [1], [0, 0, 1, 1], [], []>} : vector<8x32xf32>, vector<32x64xf32>, vector<8x64xf32> -> vector<8x64xf32>
    %746 = vector.broadcast %49 : vector<1x64xf32> to vector<8x64xf32>
    %747 = arith.addf %745, %746 : vector<8x64xf32>
    %cst_293 = arith.constant 0.000000e+00 : f32
    %748 = vector.broadcast %cst_293 : f32 to vector<8x64xf32>
    %749 = arith.maximumf %747, %748 : vector<8x64xf32>
    %cst_294 = arith.constant dense<0.000000e+00> : vector<8x32xf32>
    %750 = tpu.matmul %749, %50, %cst_294 {dimension_numbers = #tpu.dot_dimension_numbers<[1], [0], [0], [1], [0, 0, 1, 1], [], []>} : vector<8x64xf32>, vector<64x32xf32>, vector<8x32xf32> -> vector<8x32xf32>
    %751 = vector.broadcast %51 : vector<1x32xf32> to vector<8x32xf32>
    %752 = arith.addf %750, %751 : vector<8x32xf32>
    %753 = arith.addf %744, %752 : vector<8x32xf32>
    %754 = vector.extract_strided_slice %52 {offsets = [0, 0], sizes = [1, 32], strides = [1, 1]} : vector<2x32xf32> to vector<1x32xf32>
    %755 = vector.extract_strided_slice %52 {offsets = [1, 0], sizes = [1, 32], strides = [1, 1]} : vector<2x32xf32> to vector<1x32xf32>
    %cst_295 = arith.constant dense<0.000000e+00> : vector<8xf32>
    %756 = vector.multi_reduction <add>, %753, %cst_295 [1] : vector<8x32xf32> to vector<8xf32>
    %757 = vector.shape_cast %756 : vector<8xf32> to vector<8x1xf32>
    %cst_296 = arith.constant 3.200000e+01 : f32
    %758 = vector.broadcast %cst_296 : f32 to vector<8x1xf32>
    %759 = arith.divf %757, %758 : vector<8x1xf32>
    %760 = vector.broadcast %759 : vector<8x1xf32> to vector<8x32xf32>
    %761 = arith.subf %753, %760 : vector<8x32xf32>
    %762 = arith.mulf %761, %761 : vector<8x32xf32>
    %cst_297 = arith.constant dense<0.000000e+00> : vector<8xf32>
    %763 = vector.multi_reduction <add>, %762, %cst_297 [1] : vector<8x32xf32> to vector<8xf32>
    %764 = vector.shape_cast %763 : vector<8xf32> to vector<8x1xf32>
    %cst_298 = arith.constant 3.200000e+01 : f32
    %765 = vector.broadcast %cst_298 : f32 to vector<8x1xf32>
    %766 = arith.divf %764, %765 : vector<8x1xf32>
    %767 = vector.broadcast %759 : vector<8x1xf32> to vector<8x32xf32>
    %768 = arith.subf %753, %767 : vector<8x32xf32>
    %cst_299 = arith.constant 9.99999974E-6 : f32
    %769 = vector.broadcast %cst_299 : f32 to vector<8x1xf32>
    %770 = arith.addf %766, %769 : vector<8x1xf32>
    %771 = math.rsqrt %770 : vector<8x1xf32>
    %772 = vector.broadcast %771 : vector<8x1xf32> to vector<8x32xf32>
    %773 = arith.mulf %768, %772 : vector<8x32xf32>
    %774 = vector.broadcast %754 : vector<1x32xf32> to vector<8x32xf32>
    %775 = arith.mulf %773, %774 : vector<8x32xf32>
    %776 = vector.broadcast %755 : vector<1x32xf32> to vector<8x32xf32>
    %777 = arith.addf %775, %776 : vector<8x32xf32>
    %cst_300 = arith.constant dense<0.000000e+00> : vector<8x12xf32>
    %778 = tpu.matmul %777, %53, %cst_300 {dimension_numbers = #tpu.dot_dimension_numbers<[1], [0], [0], [1], [0, 0, 1, 1], [], []>} : vector<8x32xf32>, vector<32x12xf32>, vector<8x12xf32> -> vector<8x12xf32>
    %779 = vector.broadcast %54 : vector<1x12xf32> to vector<8x12xf32>
    %780 = arith.addf %778, %779 : vector<8x12xf32>
    %cst_301 = arith.constant 1.000000e-03 : f32
    %781 = vector.broadcast %cst_301 : f32 to vector<8x12xf32>
    %782 = arith.mulf %780, %781 : vector<8x12xf32>
    %783 = vector.broadcast %58 : vector<1x12xf32> to vector<8x12xf32>
    %784 = arith.addf %782, %783 : vector<8x12xf32>
    %c0_302 = arith.constant 0 : index
    %c0_303 = arith.constant 0 : index
    %c0_304 = arith.constant 0 : index
    %785 = vector.load %arg58[%c0_302, %c0_303, %c0_304] : memref<1x8x12xf32, #tpu.memory_space<vmem>>, vector<1x8x12xf32>
    %786 = vector.shape_cast %785 : vector<1x8x12xf32> to vector<8x12xf32>
    %787 = vector.shape_cast %784 : vector<8x12xf32> to vector<1x8x12xf32>
    tpu.vector_store %arg58[%c0_302, %c0_303, %c0_304], %787 {strides = array<i32>} : memref<1x8x12xf32, #tpu.memory_space<vmem>>, vector<1x8x12xf32>,
    return
  }
  func.func @transform_0(%arg0: i32) -> (i32, i32, i32) {
    %c0_i32 = arith.constant 0 : i32
    %c0_i32_0 = arith.constant 0 : i32
    %c0_i32_1 = arith.constant 0 : i32
    return %arg0, %c0_i32, %c0_i32_0 : i32, i32, i32
  }
  func.func @transform_1(%arg0: i32) -> (i32, i32, i32) {
    %c0_i32 = arith.constant 0 : i32
    %c0_i32_0 = arith.constant 0 : i32
    %c0_i32_1 = arith.constant 0 : i32
    return %arg0, %c0_i32, %c0_i32_0 : i32, i32, i32
  }
  func.func @transform_2(%arg0: i32) -> (i32, i32) {
    %c0_i32 = arith.constant 0 : i32
    %c0_i32_0 = arith.constant 0 : i32
    %c0_i32_1 = arith.constant 0 : i32
    return %c0_i32, %c0_i32_0 : i32, i32
  }
  func.func @transform_3(%arg0: i32) -> (i32, i32) {
    %c0_i32 = arith.constant 0 : i32
    %c0_i32_0 = arith.constant 0 : i32
    %c0_i32_1 = arith.constant 0 : i32
    return %c0_i32, %c0_i32_0 : i32, i32
  }
  func.func @transform_4(%arg0: i32) -> (i32, i32) {
    %c0_i32 = arith.constant 0 : i32
    %c0_i32_0 = arith.constant 0 : i32
    %c0_i32_1 = arith.constant 0 : i32
    return %c0_i32, %c0_i32_0 : i32, i32
  }
  func.func @transform_5(%arg0: i32) -> (i32, i32) {
    %c0_i32 = arith.constant 0 : i32
    %c0_i32_0 = arith.constant 0 : i32
    %c0_i32_1 = arith.constant 0 : i32
    return %c0_i32, %c0_i32_0 : i32, i32
  }
  func.func @transform_6(%arg0: i32) -> (i32, i32) {
    %c0_i32 = arith.constant 0 : i32
    %c0_i32_0 = arith.constant 0 : i32
    %c0_i32_1 = arith.constant 0 : i32
    return %c0_i32, %c0_i32_0 : i32, i32
  }
  func.func @transform_7(%arg0: i32) -> (i32, i32) {
    %c0_i32 = arith.constant 0 : i32
    %c0_i32_0 = arith.constant 0 : i32
    %c0_i32_1 = arith.constant 0 : i32
    return %c0_i32, %c0_i32_0 : i32, i32
  }
  func.func @transform_8(%arg0: i32) -> (i32, i32) {
    %c0_i32 = arith.constant 0 : i32
    %c0_i32_0 = arith.constant 0 : i32
    %c0_i32_1 = arith.constant 0 : i32
    return %c0_i32, %c0_i32_0 : i32, i32
  }
  func.func @transform_9(%arg0: i32) -> (i32, i32) {
    %c0_i32 = arith.constant 0 : i32
    %c0_i32_0 = arith.constant 0 : i32
    %c0_i32_1 = arith.constant 0 : i32
    return %c0_i32, %c0_i32_0 : i32, i32
  }
  func.func @transform_10(%arg0: i32) -> (i32, i32) {
    %c0_i32 = arith.constant 0 : i32
    %c0_i32_0 = arith.constant 0 : i32
    %c0_i32_1 = arith.constant 0 : i32
    return %c0_i32, %c0_i32_0 : i32, i32
  }
  func.func @transform_11(%arg0: i32) -> (i32, i32) {
    %c0_i32 = arith.constant 0 : i32
    %c0_i32_0 = arith.constant 0 : i32
    %c0_i32_1 = arith.constant 0 : i32
    return %c0_i32, %c0_i32_0 : i32, i32
  }
  func.func @transform_12(%arg0: i32) -> (i32, i32) {
    %c0_i32 = arith.constant 0 : i32
    %c0_i32_0 = arith.constant 0 : i32
    %c0_i32_1 = arith.constant 0 : i32
    return %c0_i32, %c0_i32_0 : i32, i32
  }
  func.func @transform_13(%arg0: i32) -> (i32, i32) {
    %c0_i32 = arith.constant 0 : i32
    %c0_i32_0 = arith.constant 0 : i32
    %c0_i32_1 = arith.constant 0 : i32
    return %c0_i32, %c0_i32_0 : i32, i32
  }
  func.func @transform_14(%arg0: i32) -> (i32, i32) {
    %c0_i32 = arith.constant 0 : i32
    %c0_i32_0 = arith.constant 0 : i32
    %c0_i32_1 = arith.constant 0 : i32
    return %c0_i32, %c0_i32_0 : i32, i32
  }
  func.func @transform_15(%arg0: i32) -> (i32, i32) {
    %c0_i32 = arith.constant 0 : i32
    %c0_i32_0 = arith.constant 0 : i32
    %c0_i32_1 = arith.constant 0 : i32
    return %c0_i32, %c0_i32_0 : i32, i32
  }
  func.func @transform_16(%arg0: i32) -> (i32, i32) {
    %c0_i32 = arith.constant 0 : i32
    %c0_i32_0 = arith.constant 0 : i32
    %c0_i32_1 = arith.constant 0 : i32
    return %c0_i32, %c0_i32_0 : i32, i32
  }
  func.func @transform_17(%arg0: i32) -> (i32, i32) {
    %c0_i32 = arith.constant 0 : i32
    %c0_i32_0 = arith.constant 0 : i32
    %c0_i32_1 = arith.constant 0 : i32
    return %c0_i32, %c0_i32_0 : i32, i32
  }
  func.func @transform_18(%arg0: i32) -> (i32, i32) {
    %c0_i32 = arith.constant 0 : i32
    %c0_i32_0 = arith.constant 0 : i32
    %c0_i32_1 = arith.constant 0 : i32
    return %c0_i32, %c0_i32_0 : i32, i32
  }
  func.func @transform_19(%arg0: i32) -> (i32, i32) {
    %c0_i32 = arith.constant 0 : i32
    %c0_i32_0 = arith.constant 0 : i32
    %c0_i32_1 = arith.constant 0 : i32
    return %c0_i32, %c0_i32_0 : i32, i32
  }
  func.func @transform_20(%arg0: i32) -> (i32, i32) {
    %c0_i32 = arith.constant 0 : i32
    %c0_i32_0 = arith.constant 0 : i32
    %c0_i32_1 = arith.constant 0 : i32
    return %c0_i32, %c0_i32_0 : i32, i32
  }
  func.func @transform_21(%arg0: i32) -> (i32, i32) {
    %c0_i32 = arith.constant 0 : i32
    %c0_i32_0 = arith.constant 0 : i32
    %c0_i32_1 = arith.constant 0 : i32
    return %c0_i32, %c0_i32_0 : i32, i32
  }
  func.func @transform_22(%arg0: i32) -> (i32, i32) {
    %c0_i32 = arith.constant 0 : i32
    %c0_i32_0 = arith.constant 0 : i32
    %c0_i32_1 = arith.constant 0 : i32
    return %c0_i32, %c0_i32_0 : i32, i32
  }
  func.func @transform_23(%arg0: i32) -> (i32, i32) {
    %c0_i32 = arith.constant 0 : i32
    %c0_i32_0 = arith.constant 0 : i32
    %c0_i32_1 = arith.constant 0 : i32
    return %c0_i32, %c0_i32_0 : i32, i32
  }
  func.func @transform_24(%arg0: i32) -> (i32, i32) {
    %c0_i32 = arith.constant 0 : i32
    %c0_i32_0 = arith.constant 0 : i32
    %c0_i32_1 = arith.constant 0 : i32
    return %c0_i32, %c0_i32_0 : i32, i32
  }
  func.func @transform_25(%arg0: i32) -> (i32, i32) {
    %c0_i32 = arith.constant 0 : i32
    %c0_i32_0 = arith.constant 0 : i32
    %c0_i32_1 = arith.constant 0 : i32
    return %c0_i32, %c0_i32_0 : i32, i32
  }
  func.func @transform_26(%arg0: i32) -> (i32, i32) {
    %c0_i32 = arith.constant 0 : i32
    %c0_i32_0 = arith.constant 0 : i32
    %c0_i32_1 = arith.constant 0 : i32
    return %c0_i32, %c0_i32_0 : i32, i32
  }
  func.func @transform_27(%arg0: i32) -> (i32, i32) {
    %c0_i32 = arith.constant 0 : i32
    %c0_i32_0 = arith.constant 0 : i32
    %c0_i32_1 = arith.constant 0 : i32
    return %c0_i32, %c0_i32_0 : i32, i32
  }
  func.func @transform_28(%arg0: i32) -> (i32, i32) {
    %c0_i32 = arith.constant 0 : i32
    %c0_i32_0 = arith.constant 0 : i32
    %c0_i32_1 = arith.constant 0 : i32
    return %c0_i32, %c0_i32_0 : i32, i32
  }
  func.func @transform_29(%arg0: i32) -> (i32, i32) {
    %c0_i32 = arith.constant 0 : i32
    %c0_i32_0 = arith.constant 0 : i32
    %c0_i32_1 = arith.constant 0 : i32
    return %c0_i32, %c0_i32_0 : i32, i32
  }
  func.func @transform_30(%arg0: i32) -> (i32, i32) {
    %c0_i32 = arith.constant 0 : i32
    %c0_i32_0 = arith.constant 0 : i32
    %c0_i32_1 = arith.constant 0 : i32
    return %c0_i32, %c0_i32_0 : i32, i32
  }
  func.func @transform_31(%arg0: i32) -> (i32, i32) {
    %c0_i32 = arith.constant 0 : i32
    %c0_i32_0 = arith.constant 0 : i32
    %c0_i32_1 = arith.constant 0 : i32
    return %c0_i32, %c0_i32_0 : i32, i32
  }
  func.func @transform_32(%arg0: i32) -> (i32, i32) {
    %c0_i32 = arith.constant 0 : i32
    %c0_i32_0 = arith.constant 0 : i32
    %c0_i32_1 = arith.constant 0 : i32
    return %c0_i32, %c0_i32_0 : i32, i32
  }
  func.func @transform_33(%arg0: i32) -> (i32, i32) {
    %c0_i32 = arith.constant 0 : i32
    %c0_i32_0 = arith.constant 0 : i32
    %c0_i32_1 = arith.constant 0 : i32
    return %c0_i32, %c0_i32_0 : i32, i32
  }
  func.func @transform_34(%arg0: i32) -> (i32, i32) {
    %c0_i32 = arith.constant 0 : i32
    %c0_i32_0 = arith.constant 0 : i32
    %c0_i32_1 = arith.constant 0 : i32
    return %c0_i32, %c0_i32_0 : i32, i32
  }
  func.func @transform_35(%arg0: i32) -> (i32, i32) {
    %c0_i32 = arith.constant 0 : i32
    %c0_i32_0 = arith.constant 0 : i32
    %c0_i32_1 = arith.constant 0 : i32
    return %c0_i32, %c0_i32_0 : i32, i32
  }
  func.func @transform_36(%arg0: i32) -> (i32, i32) {
    %c0_i32 = arith.constant 0 : i32
    %c0_i32_0 = arith.constant 0 : i32
    %c0_i32_1 = arith.constant 0 : i32
    return %c0_i32, %c0_i32_0 : i32, i32
  }
  func.func @transform_37(%arg0: i32) -> (i32, i32) {
    %c0_i32 = arith.constant 0 : i32
    %c0_i32_0 = arith.constant 0 : i32
    %c0_i32_1 = arith.constant 0 : i32
    return %c0_i32, %c0_i32_0 : i32, i32
  }
  func.func @transform_38(%arg0: i32) -> (i32, i32) {
    %c0_i32 = arith.constant 0 : i32
    %c0_i32_0 = arith.constant 0 : i32
    %c0_i32_1 = arith.constant 0 : i32
    return %c0_i32, %c0_i32_0 : i32, i32
  }
  func.func @transform_39(%arg0: i32) -> (i32, i32) {
    %c0_i32 = arith.constant 0 : i32
    %c0_i32_0 = arith.constant 0 : i32
    %c0_i32_1 = arith.constant 0 : i32
    return %c0_i32, %c0_i32_0 : i32, i32
  }
  func.func @transform_40(%arg0: i32) -> (i32, i32) {
    %c0_i32 = arith.constant 0 : i32
    %c0_i32_0 = arith.constant 0 : i32
    %c0_i32_1 = arith.constant 0 : i32
    return %c0_i32, %c0_i32_0 : i32, i32
  }
  func.func @transform_41(%arg0: i32) -> (i32, i32) {
    %c0_i32 = arith.constant 0 : i32
    %c0_i32_0 = arith.constant 0 : i32
    %c0_i32_1 = arith.constant 0 : i32
    return %c0_i32, %c0_i32_0 : i32, i32
  }
  func.func @transform_42(%arg0: i32) -> (i32, i32) {
    %c0_i32 = arith.constant 0 : i32
    %c0_i32_0 = arith.constant 0 : i32
    %c0_i32_1 = arith.constant 0 : i32
    return %c0_i32, %c0_i32_0 : i32, i32
  }
  func.func @transform_43(%arg0: i32) -> (i32, i32) {
    %c0_i32 = arith.constant 0 : i32
    %c0_i32_0 = arith.constant 0 : i32
    %c0_i32_1 = arith.constant 0 : i32
    return %c0_i32, %c0_i32_0 : i32, i32
  }
  func.func @transform_44(%arg0: i32) -> (i32, i32) {
    %c0_i32 = arith.constant 0 : i32
    %c0_i32_0 = arith.constant 0 : i32
    %c0_i32_1 = arith.constant 0 : i32
    return %c0_i32, %c0_i32_0 : i32, i32
  }
  func.func @transform_45(%arg0: i32) -> (i32, i32) {
    %c0_i32 = arith.constant 0 : i32
    %c0_i32_0 = arith.constant 0 : i32
    %c0_i32_1 = arith.constant 0 : i32
    return %c0_i32, %c0_i32_0 : i32, i32
  }
  func.func @transform_46(%arg0: i32) -> (i32, i32) {
    %c0_i32 = arith.constant 0 : i32
    %c0_i32_0 = arith.constant 0 : i32
    %c0_i32_1 = arith.constant 0 : i32
    return %c0_i32, %c0_i32_0 : i32, i32
  }
  func.func @transform_47(%arg0: i32) -> (i32, i32) {
    %c0_i32 = arith.constant 0 : i32
    %c0_i32_0 = arith.constant 0 : i32
    %c0_i32_1 = arith.constant 0 : i32
    return %c0_i32, %c0_i32_0 : i32, i32
  }
  func.func @transform_48(%arg0: i32) -> (i32, i32) {
    %c0_i32 = arith.constant 0 : i32
    %c0_i32_0 = arith.constant 0 : i32
    %c0_i32_1 = arith.constant 0 : i32
    return %c0_i32, %c0_i32_0 : i32, i32
  }
  func.func @transform_49(%arg0: i32) -> (i32, i32) {
    %c0_i32 = arith.constant 0 : i32
    %c0_i32_0 = arith.constant 0 : i32
    %c0_i32_1 = arith.constant 0 : i32
    return %c0_i32, %c0_i32_0 : i32, i32
  }
  func.func @transform_50(%arg0: i32) -> (i32, i32) {
    %c0_i32 = arith.constant 0 : i32
    %c0_i32_0 = arith.constant 0 : i32
    %c0_i32_1 = arith.constant 0 : i32
    return %c0_i32, %c0_i32_0 : i32, i32
  }
  func.func @transform_51(%arg0: i32) -> (i32, i32) {
    %c0_i32 = arith.constant 0 : i32
    %c0_i32_0 = arith.constant 0 : i32
    %c0_i32_1 = arith.constant 0 : i32
    return %c0_i32, %c0_i32_0 : i32, i32
  }
  func.func @transform_52(%arg0: i32) -> (i32, i32) {
    %c0_i32 = arith.constant 0 : i32
    %c0_i32_0 = arith.constant 0 : i32
    %c0_i32_1 = arith.constant 0 : i32
    return %c0_i32, %c0_i32_0 : i32, i32
  }
  func.func @transform_53(%arg0: i32) -> (i32, i32) {
    %c0_i32 = arith.constant 0 : i32
    %c0_i32_0 = arith.constant 0 : i32
    %c0_i32_1 = arith.constant 0 : i32
    return %c0_i32, %c0_i32_0 : i32, i32
  }
  func.func @transform_54(%arg0: i32) -> (i32, i32) {
    %c0_i32 = arith.constant 0 : i32
    %c0_i32_0 = arith.constant 0 : i32
    %c0_i32_1 = arith.constant 0 : i32
    return %c0_i32, %c0_i32_0 : i32, i32
  }
  func.func @transform_55(%arg0: i32) -> (i32, i32) {
    %c0_i32 = arith.constant 0 : i32
    %c0_i32_0 = arith.constant 0 : i32
    %c0_i32_1 = arith.constant 0 : i32
    return %c0_i32, %c0_i32_0 : i32, i32
  }
  func.func @transform_56(%arg0: i32) -> (i32, i32) {
    %c0_i32 = arith.constant 0 : i32
    %c0_i32_0 = arith.constant 0 : i32
    %c0_i32_1 = arith.constant 0 : i32
    return %c0_i32, %c0_i32_0 : i32, i32
  }
  func.func @transform_57(%arg0: i32) -> (i32, i32, i32) {
    %c0_i32 = arith.constant 0 : i32
    %c0_i32_0 = arith.constant 0 : i32
    %c0_i32_1 = arith.constant 0 : i32
    return %arg0, %c0_i32, %c0_i32_0 : i32, i32, i32
  }
}

</mosaic_0001>

<bundles_post_ra>
// kernel: tile.8
= control target key start
LH: loop header
LB: loop body
LE: loop exit
PB: predicated region body
PF: predicated region fallthrough
CT: control target
= control target key end

     0   :  { %s22_s0 = inlined_call_operand.vmem [shape: f32[8], index: 0, kind: input, shape index: {}]   ;;  %s23_s1 = inlined_call_operand.vmem [shape: f32[4,8], index: 1, kind: output, shape index: {}]  }
   0x1   :  { %v4_v0 = vld [vmem:[%s22_s0] ss:$0 sm:$0xff] }
   0x2   :  { %5 = vst [vmem:[%s23_s1] sm:$0xf] %v4_v0 }

// kernel: tile.9
= control target key start
LH: loop header
LB: loop body
LE: loop exit
PB: predicated region body
PF: predicated region fallthrough
CT: control target
= control target key end

     0   :  { %vm7_vm0 = vcmask 64512   ;;  %s37_s8 = smov 8   ;;  %s38_s9 = smov 16   ;;  %vm13_vm1 = vcmask 261312   ;;  %vm19_vm2 = vcmask 195712   ;;  %vm25_vm3 = vcmask 130112   ;;  %s55_s0 = inlined_call_operand.vmem [shape: f32[4,8], index: 0, kind: input, shape index: {}]   ;;  %s56_s1 = inlined_call_operand.vmem [shape: f32[1,32], index: 1, kind: output, shape index: {}]  }
   0x1   :  { %v4_v0 = vld [vmem:[%s55_s0] sm:$0xf]  ;;  %s36_s0 = smov 24  }
   0x2   :  { %5 = vst [vmem:[#allocation1] sm:$0xf] %v4_v0 }
   0x9   :  { %v10_v1 = vld [vmem:[#allocation1 + $0x3] sm:$0x1]   ;;  %v22_v2 = vld [vmem:[#allocation1 + $0x1] sm:$0x1]   ;;  %v6_v3 = vld [vmem:[#allocation1] sm:$0x1]  }
   0xa   :  { %11 = vrot.lane.b32.xlu0 %v10_v1, %s36_s0  ;;  %23 = vrot.lane.b32.xlu1 %v22_v2, %s37_s8  ;;  %v16_v4 = vld [vmem:[#allocation1 + $0x2] sm:$0x1]   ;;  %8 = vst.msk [vmem:[#allocation0] sm:$0x1] %vm7_vm0, %v6_v3  }
   0xe   :  { %17 = vrot.lane.b32.xlu0 %v16_v4, %s38_s9 }
  0x7c   :  { %v12_v5 = vpop.permute.xlu0 %11   ;;  %v24_v6 = vpop.permute.xlu1 %23  }
  0x7d   :  { %14 = vst.msk [vmem:[#allocation0] sm:$0x1] %vm13_vm1, %v12_v5  }
  0x80   :  { %v18_v7 = vpop.permute.xlu0 %17  }
  0x81   :  { %20 = vst.msk [vmem:[#allocation0] sm:$0x1] %vm19_vm2, %v18_v7  }
  0x82   :  { %26 = vst.msk [vmem:[#allocation0] sm:$0x1] %vm25_vm3, %v24_v6  }
  0x89   :  { %v30_v8 = vld [vmem:[#allocation0] sm:$0x1] }
  0x8a   :  { %32 = vst [vmem:[%s56_s1] sm:$0x1] %v30_v8 }

// kernel: vq_autoencoder_forward.1
= control target key start
LH: loop header
LB: loop body
LE: loop exit
PB: predicated region body
PF: predicated region fallthrough
CT: control target
= control target key end

     0   :  { %s9920_s6 = smov 1   ;;  %s9921_s10 = smov 2   ;;  %s11319_s0 = inlined_call_operand.smem [shape: u32[58], index: -1, kind: input, shape index: {}] }
   0x1   :  { %s10020_s5 = sld [smem:[%s11319_s0]]   ;;  %s9922_s14 = smov 3  }
   0x2   :  { %s10025_s9 = sld [smem:[%s11319_s0 + %s9920_s6]]   ;;  %s9923_s18 = smov 4  }
   0x3   :  { %s10030_s13 = sld [smem:[%s11319_s0 + %s9921_s10]]   ;;  %s9924_s22 = smov 5  }
   0x4   :  { %s10035_s17 = sld [smem:[%s11319_s0 + %s9922_s14]]   ;;  %s9925_s26 = smov 6  }
   0x5   :  { %s10040_s21 = sld [smem:[%s11319_s0 + %s9923_s18]]   ;;  %s9926_s30 = smov 7  }
   0x6   :  { %s10045_s25 = sld [smem:[%s11319_s0 + %s9924_s22]]   ;;  %s9927_s4 = smov 8  }
   0x7   :  { %11393 = sst [smem:[#allocation37_spill]] %s10020_s5  ;;  %s9928_s10 = smov 9  }
   0x8   :  { %11394 = sst [smem:[#allocation38_spill]] %s10025_s9  ;;  %s9929_s15 = smov 10  }
   0x9   :  { %11395 = sst [smem:[#allocation39_spill]] %s10030_s13  ;;  %s9930_s20 = smov 11  }
   0xa   :  { %11396 = sst [smem:[#allocation40_spill]] %s10035_s17  ;;  %s9932_s1 = smov 13  }
   0xb   :  { %11397 = sst [smem:[#allocation41_spill]] %s10040_s21  ;;  %s9933_s7 = smov 14  }
   0xc   :  { %11398 = sst [smem:[#allocation42_spill]] %s10045_s25  ;;  %s9935_s22 = smov 16  }
   0xd   :  { %s10050_s29 = sld [smem:[%s11319_s0 + %s9925_s26]]   ;;  %s9931_s26 = smov 12  }
   0xe   :  { %s10055_s3 = sld [smem:[%s11319_s0 + %s9926_s30]]   ;;  %s9936_s28 = smov 17  }
   0xf   :  { %s10060_s8 = sld [smem:[%s11319_s0 + %s9927_s4]]  }
  0x10   :  { %s10065_s14 = sld [smem:[%s11319_s0 + %s9928_s10]]  }
  0x11   :  { %s10070_s19 = sld [smem:[%s11319_s0 + %s9929_s15]]   ;;  %s9934_s15 = smov 15  }
  0x12   :  { %s10075_s24 = sld [smem:[%s11319_s0 + %s9930_s20]]  }
  0x13   :  { %11399 = sst [smem:[#allocation43_spill]] %s10050_s29 }
  0x14   :  { %11400 = sst [smem:[#allocation44_spill]] %s10055_s3 }
  0x15   :  { %11401 = sst [smem:[#allocation45_spill]] %s10060_s8 }
  0x16   :  { %11402 = sst [smem:[#allocation46_spill]] %s10065_s14 }
  0x17   :  { %s10080_s30 = sld [smem:[%s11319_s0 + %s9931_s26]]  }
  0x18   :  { %11403 = sst [smem:[#allocation47_spill]] %s10075_s24 }
  0x19   :  { %s10085_s6 = sld [smem:[%s11319_s0 + %s9932_s1]]  }
  0x1a   :  { %s10090_s12 = sld [smem:[%s11319_s0 + %s9933_s7]]   ;;  %s9937_s7 = smov 18  }
  0x1b   :  { %s10095_s20 = sld [smem:[%s11319_s0 + %s9934_s15]]   ;;  %s9938_s15 = smov 19  }
  0x1c   :  { %s10100_s27 = sld [smem:[%s11319_s0 + %s9935_s22]]   ;;  %s9939_s22 = smov 20  }
  0x1d   :  { %11404 = sst [smem:[#allocation48_spill]] %s10080_s30 }
  0x1e   :  { %s10105_s4 = sld [smem:[%s11319_s0 + %s9936_s28]]   ;;  %s9940_s28 = smov 21  }
  0x1f   :  { %11405 = sst [smem:[#allocation49_spill]] %s10085_s6 }
  0x20   :  { %11406 = sst [smem:[#allocation50_spill]] %s10090_s12 }
  0x21   :  { %11407 = sst [smem:[#allocation51_spill]] %s10095_s20 }
  0x22   :  { %11408 = sst [smem:[#allocation52_spill]] %s10100_s27 }
  0x23   :  { %s10110_s6 = sld [smem:[%s11319_s0 + %s9937_s7]]   ;;  %s9941_s7 = smov 22  }
  0x24   :  { %11409 = sst [smem:[#allocation53_spill]] %s10105_s4 }
  0x25   :  { %s10115_s20 = sld [smem:[%s11319_s0 + %s9938_s15]]   ;;  %s9942_s15 = smov 23  }
  0x26   :  { %s10120_s27 = sld [smem:[%s11319_s0 + %s9939_s22]]   ;;  %s9943_s22 = smov 24  }
  0x27   :  { %s10125_s4 = sld [smem:[%s11319_s0 + %s9940_s28]]   ;;  %s9944_s28 = smov 25  }
  0x28   :  { %s10140_s12 = sld [smem:[%s11319_s0 + %s9943_s22]]   ;;  %s9947_s22 = smov 28  }
  0x29   :  { %11410 = sst [smem:[#allocation54_spill]] %s10110_s6 }
  0x2a   :  { %s10130_s6 = sld [smem:[%s11319_s0 + %s9941_s7]]   ;;  %s9945_s7 = smov 26  }
  0x2b   :  { %11411 = sst [smem:[#allocation55_spill]] %s10115_s20 }
  0x2c   :  { %s10135_s20 = sld [smem:[%s11319_s0 + %s9942_s15]]   ;;  %s9946_s15 = smov 27  }
  0x2d   :  { %11412 = sst [smem:[#allocation56_spill]] %s10125_s4 }
  0x2e   :  { %11414 = sst [smem:[#allocation58_spill]] %s10140_s12 }
  0x2f   :  { %s10145_s4 = sld [smem:[%s11319_s0 + %s9944_s28]]   ;;  %s9948_s28 = smov 29  }
  0x30   :  { %11413 = sst [smem:[#allocation57_spill]] %s10130_s6 }
  0x31   :  { %s10150_s30 = sld [smem:[%s11319_s0 + %s9945_s7]]   ;;  %s9949_s7 = smov 30  }
  0x32   :  { %s10155_s24 = sld [smem:[%s11319_s0 + %s9946_s15]]   ;;  %s9950_s15 = smov 31  }
  0x33   :  { %s10160_s12 = sld [smem:[%s11319_s0 + %s9947_s22]]   ;;  %s9951_s22 = smov 32  }
  0x34   :  { %s10165_s8 = sld [smem:[%s11319_s0 + %s9948_s28]]   ;;  %s9952_s28 = smov 33  }
  0x35   :  { %11415 = sst [smem:[#allocation59_spill]] %s10145_s4 }
  0x36   :  { %s10175_s3 = sld [smem:[%s11319_s0 + %s9950_s15]]   ;;  %s9954_s15 = smov 35  }
  0x37   :  { %11416 = sst [smem:[#allocation60_spill]] %s10150_s30 }
  0x38   :  { %s10170_s30 = sld [smem:[%s11319_s0 + %s9949_s7]]   ;;  %s9953_s7 = smov 34  }
  0x39   :  { %11417 = sst [smem:[#allocation61_spill]] %s10160_s12 }
  0x3a   :  { %11418 = sst [smem:[#allocation62_spill]] %s10165_s8 }
  0x3b   :  { %s10180_s14 = sld [smem:[%s11319_s0 + %s9951_s22]]   ;;  %s9955_s22 = smov 36  }
  0x3c   :  { %11420 = sst [smem:[#allocation64_spill]] %s10175_s3 }
  0x3d   :  { %s10185_s8 = sld [smem:[%s11319_s0 + %s9952_s28]]   ;;  %s9956_s28 = smov 37  }
  0x3e   :  { %11419 = sst [smem:[#allocation63_spill]] %s10170_s30 }
  0x3f   :  { %s10190_s30 = sld [smem:[%s11319_s0 + %s9953_s7]]   ;;  %s9957_s7 = smov 38  }
  0x40   :  { %s10195_s3 = sld [smem:[%s11319_s0 + %s9954_s15]]   ;;  %s9958_s15 = smov 39  }
  0x41   :  { %11421 = sst [smem:[#allocation65_spill]] %s10180_s14 }
  0x42   :  { %s10200_s14 = sld [smem:[%s11319_s0 + %s9955_s22]]   ;;  %s9959_s22 = smov 40  }
  0x43   :  { %11422 = sst [smem:[#allocation66_spill]] %s10185_s8 }
  0x44   :  { %s10205_s8 = sld [smem:[%s11319_s0 + %s9956_s28]]   ;;  %s9960_s28 = smov 41  }
  0x45   :  { %11423 = sst [smem:[#allocation67_spill]] %s10190_s30 }
  0x46   :  { %11424 = sst [smem:[#allocation68_spill]] %s10195_s3 }
  0x47   :  { %s10210_s30 = sld [smem:[%s11319_s0 + %s9957_s7]]   ;;  %s9961_s7 = smov 42  }
  0x48   :  { %11425 = sst [smem:[#allocation69_spill]] %s10200_s14 }
  0x49   :  { %s10215_s3 = sld [smem:[%s11319_s0 + %s9958_s15]]   ;;  %s9962_s15 = smov 43  }
  0x4a   :  { %11426 = sst [smem:[#allocation70_spill]] %s10205_s8 }
  0x4b   :  { %s10220_s25 = sld [smem:[%s11319_s0 + %s9959_s22]]   ;;  %s9963_s22 = smov 44  }
  0x4c   :  { %s10225_s8 = sld [smem:[%s11319_s0 + %s9960_s28]]   ;;  %s9964_s28 = smov 45  }
  0x4d   :  { %s10230_s29 = sld [smem:[%s11319_s0 + %s9961_s7]]   ;;  %s9965_s7 = smov 46  }
  0x4e   :  { %s10245_s17 = sld [smem:[%s11319_s0 + %s9964_s28]]   ;;  %s9968_s28 = smov 49  }
  0x4f   :  { %11427 = sst [smem:[#allocation71_spill]] %s10215_s3 }
  0x50   :  { %s10235_s3 = sld [smem:[%s11319_s0 + %s9962_s15]]   ;;  %s9966_s15 = smov 47  }
  0x51   :  { %11428 = sst [smem:[#allocation72_spill]] %s10220_s25 }
  0x52   :  { %11429 = sst [smem:[#allocation73_spill]] %s10225_s8 }
  0x53   :  { %11430 = sst [smem:[#allocation74_spill]] %s10230_s29 }
  0x54   :  { %s10240_s25 = sld [smem:[%s11319_s0 + %s9963_s22]]   ;;  %s9967_s22 = smov 48  }
  0x55   :  { %11433 = sst [smem:[#allocation77_spill]] %s10245_s17 }
  0x56   :  { %11431 = sst [smem:[#allocation75_spill]] %s10235_s3 }
  0x57   :  { %s10250_s29 = sld [smem:[%s11319_s0 + %s9965_s7]]   ;;  %s9969_s7 = smov 50  }
  0x58   :  { %s10255_s21 = sld [smem:[%s11319_s0 + %s9966_s15]]   ;;  %s9970_s15 = smov 51  }
  0x59   :  { %s10265_s17 = sld [smem:[%s11319_s0 + %s9968_s28]]   ;;  %s9972_s28 = smov 53  }
  0x5a   :  { %11432 = sst [smem:[#allocation76_spill]] %s10240_s25 }
  0x5b   :  { %s10260_s25 = sld [smem:[%s11319_s0 + %s9967_s22]]   ;;  %s9971_s22 = smov 52  }
  0x5c   :  { %s10270_s5 = sld [smem:[%s11319_s0 + %s9969_s7]]   ;;  %s9973_s7 = smov 54  }
  0x5d   :  { %11434 = sst [smem:[#allocation78_spill]] %s10250_s29 }
  0x5e   :  { %11435 = sst [smem:[#allocation79_spill]] %s10255_s21 }
  0x5f   :  { %11436 = sst [smem:[#allocation80_spill]] %s10265_s17 }
  0x60   :  { %s10275_s21 = sld [smem:[%s11319_s0 + %s9970_s15]]   ;;  %s9974_s15 = smov 55  }
  0x61   :  { %s10280_s9 = sld [smem:[%s11319_s0 + %s9971_s22]]   ;;  %s9975_s22 = smov 56  }
  0x62   :  { %11437 = sst [smem:[#allocation81_spill]] %s10270_s5 }
  0x63   :  { %s10285_s17 = sld [smem:[%s11319_s0 + %s9972_s28]]   ;;  %s9976_s28 = smov 57  }
  0x64   :  { %s10290_s5 = sld [smem:[%s11319_s0 + %s9973_s7]]  }
  0x65   :  { %s10305_s29 = sld [smem:[%s11319_s0 + %s9976_s28]]  }
  0x66   :  { %11438 = sst [smem:[#allocation82_spill]] %s10275_s21 }
  0x67   :  { %11439 = sst [smem:[#allocation83_spill]] %s10280_s9 }
  0x68   :  { %s10295_s21 = sld [smem:[%s11319_s0 + %s9974_s15]]  }
  0x69   :  { %11440 = sst [smem:[#allocation84_spill]] %s10285_s17 }
  0x6a   :  { %s10300_s9 = sld [smem:[%s11319_s0 + %s9975_s22]]  }
  0x70   :  { %11441 = sst [smem:[#allocation85_spill]] %s10300_s9 }
  0x71   :  { %120 = vsyncpa [#allocation3], 0 }
  0x72   :  { %121 = vsyncpa [#allocation5], 0 }
  0x73   :  { %122 = vsyncpa [#allocation8], 0 }
  0x74   :  { %123 = vsyncpa [#allocation11], 0 }
  0x75   :  { %124 = vsyncpa [#allocation14], 0 }
  0x76   :  { %125 = vsyncpa [#allocation17], 0 }
  0x77   :  { %126 = vsyncpa [#allocation20], 0 }
  0x78   :  { %127 = vsyncpa [#allocation23], 0 }
  0x79   :  { %128 = vsyncpa [#allocation26], 0  ;;  %s10307_s7 = smov 0  }
  0x7a LB: > { %s11442_s17 = sld [smem:[#allocation84_spill]]  ;;  %s11443_s14 = sld [smem:[#allocation69_spill]]  ;;  %s9918_s7 = sphi %s10307_s7, %s134_s7  }
  0x7b   : > { %s11444_s13 = sld [smem:[#allocation39_spill]]  ;;  %s11445_s12 = sld [smem:[#allocation61_spill]] }
  0x7c   : > { %s11446_s9 = sld [smem:[#allocation85_spill]]  ;;  %s11447_s8 = sld [smem:[#allocation73_spill]] }
  0x7d   : > { %s11448_s6 = sld [smem:[#allocation57_spill]]  ;;  %s11449_s4 = sld [smem:[#allocation59_spill]] }
  0x7e   : > { %s11450_s3 = sld [smem:[#allocation75_spill]]  ;;  %s9977_s0 = smov [#allocation4]  }
  0x7f   : > { %s1419_s10 = sshll.u32 %s9977_s0, 4  ;;  %s10313_s11 = sadd.s32 4294967295, %s9918_s7   ;;  %s10318_s10 = int_to_ptr.vmem [resolvable:$true] %s1419_s10 }
  0x80   : > { %p8077_p0 = scmp.ge.s32.totalorder %s9918_s7, 1  ;;  %p1372_p1 = scmp.lt.s32.totalorder %s9918_s7, 3 }
  0x81   : > { %p11344_p2 = scmp.eq.s32.totalorder %s10313_s11, 0  ;;  %s9978_s16 = smov [#allocation7]  }
  0x82   : > { %p10320_p3 = pnand %p8077_p0, %p1372_p1  ;;  %s1471_s18 = sshll.u32 %s9978_s16, 4  ;;  %s10326_s18 = int_to_ptr.vmem [resolvable:$true] %s1471_s18 }
  0x83   : > { %s9979_s22 = smov [#allocation10]   ;;  %s9980_s28 = smov [#allocation13]  }
  0x84   : > { %s11451_s15 = scalar_select %p10320_p3, 1, 0 }
  0x85   : > { %p9128_p4 = pneg %p10320_p3  ;;  %s1496_s23 = sshll.u32 %s9979_s22, 4  ;;  %s10334_s23 = int_to_ptr.vmem [resolvable:$true] %s1496_s23 }
  0x86   : > { %s1521_s1 = sshll.u32 %s9980_s28, 4  ;;  %s9400_s2 = scalar_lea.hbm %s10070_s19, 16  ;;  %s10336_s1 = int_to_ptr.vmem [resolvable:$true] %s1521_s1 }
  0x87   : > { %p10330_p5 = pnand %p11344_p2, %p9128_p4  ;;  %p9401_p6 = scmp.ne.s32.totalorder %s10070_s19, %s9400_s2 }
  0x88   : > { %p9407_p10 = scmp.lt.u32.totalorder %s9400_s2, %s10070_s19 }
  0x89   : > { %p10342_p7 = pneg %p10330_p5 }
  0x8b   : > { %p9403_p8 = pnand %p10342_p7, %p9401_p6 }
  0x8d   : > { %p9404_p9 = pneg %p9403_p8 }
  0x8f   : > { %p9409_p11 = pnand %p9407_p10, %p9404_p9 }
  0x91   : > { %9412 = shalt.err (!%p9409_p11)
}
  0x92   : > { %s9413_s16 = scalar_lea.vmem %s10318_s10, 16  ;;  %s9420_s22 = scalar_lea.vmem %s10318_s10, 32 }
  0x93   : > { %p9414_p12 = scmp.ne.s32.totalorder %s10318_s10, %s9413_s16  ;;  %p9421_p1 = scmp.lt.s32.totalorder %s10318_s10, %s10318_s10 }
  0x94   : > { %p9422_p4 = scmp.lt.s32.totalorder %s9420_s22, %s9413_s16 }
  0x95   : > { %p9416_p13 = pnand %p9414_p12, %p10342_p7 }
  0x96   : > { %p9423_p2 = por %p9422_p4, %p9421_p1 }
  0x97   : > { %p9417_p0 = pneg %p9416_p13 }
  0x99   : > { %p9424_p6 = pnand %p9423_p2, %p9417_p0 }
  0x9b   : > { %9427 = shalt.err (!%p9424_p6)
}
  0x9c   : > { %9134 = dma.hbm_to_vmem [thread:$0]  (!%p10330_p5), %s10070_s19, 16, %s10318_s10, [#allocation5]  }
  0x9d   : > { %s9428_s28 = scalar_lea.hbm %s11448_s6, 16 }
  0x9e   : > { %p9429_p8 = scmp.ne.s32.totalorder %s11448_s6, %s9428_s28  ;;  %p9435_p11 = scmp.lt.u32.totalorder %s9428_s28, %s11448_s6 }
  0xa0   : > { %p9431_p9 = pnand %p9429_p8, %p10342_p7 }
  0xa2   : > { %p9432_p10 = pneg %p9431_p9 }
  0xa4   : > { %p9437_p12 = pnand %p9435_p11, %p9432_p10 }
  0xa6   : > { %9440 = shalt.err (!%p9437_p12)
}
  0xa7   : > { %s9441_s2 = scalar_lea.vmem %s10326_s18, 16  ;;  %s9448_s16 = scalar_lea.vmem %s10326_s18, 32 }
  0xa8   : > { %p9442_p2 = scmp.ne.s32.totalorder %s10326_s18, %s9441_s2  ;;  %p9449_p1 = scmp.lt.s32.totalorder %s10326_s18, %s10326_s18 }
  0xa9   : > { %p9450_p4 = scmp.lt.s32.totalorder %s9448_s16, %s9441_s2 }
  0xaa   : > { %p9444_p13 = pnand %p9442_p2, %p10342_p7 }
  0xab   : > { %p9451_p6 = por %p9450_p4, %p9449_p1 }
  0xac   : > { %p9445_p0 = pneg %p9444_p13 }
  0xae   : > { %p9452_p8 = pnand %p9451_p6, %p9445_p0 }
  0xb0   : > { %9455 = shalt.err (!%p9452_p8)
}
  0xb1   : > { %9140 = dma.hbm_to_vmem [thread:$0]  (!%p10330_p5), %s11448_s6, 16, %s10326_s18, [#allocation8]  }
  0xb2   : > { %s9456_s10 = scalar_lea.hbm %s11449_s4, 16 }
  0xb3   : > { %p9457_p9 = scmp.ne.s32.totalorder %s11449_s4, %s9456_s10  ;;  %p9463_p12 = scmp.lt.u32.totalorder %s9456_s10, %s11449_s4 }
  0xb5   : > { %p9459_p10 = pnand %p9457_p9, %p10342_p7 }
  0xb7   : > { %p9460_p11 = pneg %p9459_p10 }
  0xb9   : > { %p9465_p2 = pnand %p9463_p12, %p9460_p11 }
  0xbb   : > { %9468 = shalt.err (!%p9465_p2)
}
  0xbc   : > { %s9469_s22 = scalar_lea.vmem %s10334_s23, 16  ;;  %s9476_s28 = scalar_lea.vmem %s10334_s23, 32 }
  0xbd   : > { %p9470_p13 = scmp.ne.s32.totalorder %s10334_s23, %s9469_s22  ;;  %p9477_p4 = scmp.lt.s32.totalorder %s10334_s23, %s10334_s23 }
  0xbe   : > { %p9478_p6 = scmp.lt.s32.totalorder %s9476_s28, %s9469_s22 }
  0xbf   : > { %p9472_p0 = pnand %p9470_p13, %p10342_p7 }
  0xc0   : > { %p9479_p8 = por %p9478_p6, %p9477_p4 }
  0xc1   : > { %p9473_p1 = pneg %p9472_p0 }
  0xc3   : > { %p9480_p9 = pnand %p9479_p8, %p9473_p1 }
  0xc5   : > { %9483 = shalt.err (!%p9480_p9)
}
  0xc6   : > { %9146 = dma.hbm_to_vmem [thread:$0]  (!%p10330_p5), %s11449_s4, 16, %s10334_s23, [#allocation11]  }
  0xc7   : > { %s9484_s18 = scalar_lea.hbm %s11445_s12, 32 }
  0xc8   : > { %p9485_p10 = scmp.ne.s32.totalorder %s11445_s12, %s9484_s18  ;;  %p9491_p2 = scmp.lt.u32.totalorder %s9484_s18, %s11445_s12 }
  0xca   : > { %p9487_p11 = pnand %p9485_p10, %p10342_p7 }
  0xcc   : > { %p9488_p12 = pneg %p9487_p11 }
  0xce   : > { %p9493_p13 = pnand %p9491_p2, %p9488_p12 }
  0xd0   : > { %9496 = shalt.err (!%p9493_p13)
}
  0xd1   : > { %s9497_s2 = scalar_lea.vmem %s10336_s1, 32  ;;  %p9505_p6 = scmp.lt.s32.totalorder %s10336_s1, %s10336_s1 }
  0xd2   : > { %p9498_p0 = scmp.ne.s32.totalorder %s10336_s1, %s9497_s2  ;;  %p9506_p8 = scmp.lt.s32.totalorder %s9497_s2, %s9497_s2 }
  0xd4   : > { %p9500_p1 = pnand %p9498_p0, %p10342_p7  ;;  %p9507_p9 = por %p9506_p8, %p9505_p6 }
  0xd6   : > { %p9501_p4 = pneg %p9500_p1 }
  0xd8   : > { %p9508_p3 = pnand %p9507_p9, %p9501_p4 }
  0xda   : > { %9511 = shalt.err (!%p9508_p3)
}
  0xdb   : > { %9152 = dma.hbm_to_vmem [thread:$0]  (!%p10330_p5), %s11445_s12, 32, %s10336_s1, [#allocation14]  }
  0xdc   : > { %s9981_s23 = smov [#allocation16]   ;;  %s9982_s10 = smov [#allocation19]  }
  0xdd   : > { %s1567_s16 = sshll.u32 %s9981_s23, 4  ;;  %s1598_s22 = sshll.u32 %s9982_s10, 4  ;;  %s1568_s16 = int_to_ptr.vmem [resolvable:$true] %s1567_s16  ;;  %s1599_s22 = int_to_ptr.vmem [resolvable:$true] %s1598_s22 }
  0xde   : > { %s9512_s28 = scalar_lea.hbm %s10210_s30, 16 }
  0xdf   : > { %p9513_p10 = scmp.ne.s32.totalorder %s10210_s30, %s9512_s28  ;;  %p9519_p3 = scmp.lt.u32.totalorder %s9512_s28, %s10210_s30 }
  0xe1   : > { %p9515_p11 = pnand %p9513_p10, %p10342_p7 }
  0xe3   : > { %p9516_p12 = pneg %p9515_p11 }
  0xe5   : > { %p9521_p2 = pnand %p9519_p3, %p9516_p12 }
  0xe7   : > { %9524 = shalt.err (!%p9521_p2)
}
  0xe8   : > { %s9525_s18 = scalar_lea.vmem %s1568_s16, 16  ;;  %s9532_s1 = scalar_lea.vmem %s1568_s16, 32 }
  0xe9   : > { %p9526_p13 = scmp.ne.s32.totalorder %s1568_s16, %s9525_s18  ;;  %p9533_p4 = scmp.lt.s32.totalorder %s1568_s16, %s1568_s16 }
  0xea   : > { %p9534_p6 = scmp.lt.s32.totalorder %s9532_s1, %s9525_s18 }
  0xeb   : > { %p9528_p0 = pnand %p9526_p13, %p10342_p7 }
  0xec   : > { %p9535_p8 = por %p9534_p6, %p9533_p4 }
  0xed   : > { %p9529_p1 = pneg %p9528_p0 }
  0xef   : > { %p9536_p9 = pnand %p9535_p8, %p9529_p1 }
  0xf1   : > { %9539 = shalt.err (!%p9536_p9)
}
  0xf2   : > { %9158 = dma.hbm_to_vmem [thread:$0]  (!%p10330_p5), %s10210_s30, 16, %s1568_s16, [#allocation17]  }
  0xf3   : > { %s9540_s2 = scalar_lea.hbm %s11450_s3, 16 }
  0xf4   : > { %p9541_p10 = scmp.ne.s32.totalorder %s11450_s3, %s9540_s2  ;;  %p9547_p3 = scmp.lt.u32.totalorder %s9540_s2, %s11450_s3 }
  0xf6   : > { %p9543_p11 = pnand %p9541_p10, %p10342_p7 }
  0xf8   : > { %p9544_p12 = pneg %p9543_p11 }
  0xfa   : > { %p9549_p2 = pnand %p9547_p3, %p9544_p12 }
  0xfc   : > { %9552 = shalt.err (!%p9549_p2)
}
  0xfd   : > { %s9553_s23 = scalar_lea.vmem %s1599_s22, 16  ;;  %s9560_s10 = scalar_lea.vmem %s1599_s22, 32 }
  0xfe   : > { %p9554_p13 = scmp.ne.s32.totalorder %s1599_s22, %s9553_s23  ;;  %p9561_p4 = scmp.lt.s32.totalorder %s1599_s22, %s1599_s22 }
  0xff   : > { %p9562_p6 = scmp.lt.s32.totalorder %s9560_s10, %s9553_s23 }
 0x100   : > { %p9556_p0 = pnand %p9554_p13, %p10342_p7 }
 0x101   : > { %p9563_p8 = por %p9562_p6, %p9561_p4 }
 0x102   : > { %p9557_p1 = pneg %p9556_p0 }
 0x104   : > { %p9564_p9 = pnand %p9563_p8, %p9557_p1 }
 0x106   : > { %9567 = shalt.err (!%p9564_p9)
}
 0x107   : > { %9164 = dma.hbm_to_vmem [thread:$0]  (!%p10330_p5), %s11450_s3, 16, %s1599_s22, [#allocation20]  }
 0x108   : > { %s9983_s16 = smov [#allocation22]   ;;  %s9984_s18 = smov [#allocation25]  }
 0x109   : > { %s1629_s28 = sshll.u32 %s9983_s16, 4  ;;  %s1660_s1 = sshll.u32 %s9984_s18, 4  ;;  %s1630_s28 = int_to_ptr.vmem [resolvable:$true] %s1629_s28  ;;  %s1661_s1 = int_to_ptr.vmem [resolvable:$true] %s1660_s1 }
 0x10a   : > { %s9568_s2 = scalar_lea.hbm %s10260_s25, 16 }
 0x10b   : > { %p9569_p10 = scmp.ne.s32.totalorder %s10260_s25, %s9568_s2  ;;  %p9575_p3 = scmp.lt.u32.totalorder %s9568_s2, %s10260_s25 }
 0x10d   : > { %p9571_p11 = pnand %p9569_p10, %p10342_p7 }
 0x10f   : > { %p9572_p12 = pneg %p9571_p11 }
 0x111   : > { %p9577_p2 = pnand %p9575_p3, %p9572_p12 }
 0x113   : > { %9580 = shalt.err (!%p9577_p2)
}
 0x114   : > { %s9581_s23 = scalar_lea.vmem %s1630_s28, 16  ;;  %s9588_s22 = scalar_lea.vmem %s1630_s28, 32 }
 0x115   : > { %p9582_p13 = scmp.ne.s32.totalorder %s1630_s28, %s9581_s23  ;;  %p9589_p4 = scmp.lt.s32.totalorder %s1630_s28, %s1630_s28 }
 0x116   : > { %p9590_p6 = scmp.lt.s32.totalorder %s9588_s22, %s9581_s23 }
 0x117   : > { %p9584_p0 = pnand %p9582_p13, %p10342_p7 }
 0x118   : > { %p9591_p8 = por %p9590_p6, %p9589_p4 }
 0x119   : > { %p9585_p1 = pneg %p9584_p0 }
 0x11b   : > { %p9592_p9 = pnand %p9591_p8, %p9585_p1 }
 0x11d   : > { %9595 = shalt.err (!%p9592_p9)
}
 0x11e   : > { %9170 = dma.hbm_to_vmem [thread:$0]  (!%p10330_p5), %s10260_s25, 16, %s1630_s28, [#allocation23]  }
 0x11f   : > { %s9596_s10 = scalar_lea.hbm %s11442_s17, 16 }
 0x120   : > { %p9597_p10 = scmp.ne.s32.totalorder %s11442_s17, %s9596_s10  ;;  %p9603_p3 = scmp.lt.u32.totalorder %s9596_s10, %s11442_s17 }
 0x122   : > { %p9599_p11 = pnand %p9597_p10, %p10342_p7 }
 0x124   : > { %p9600_p12 = pneg %p9599_p11 }
 0x126   : > { %p9605_p2 = pnand %p9603_p3, %p9600_p12 }
 0x128   : > { %9608 = shalt.err (!%p9605_p2)
}
 0x129   : > { %s9609_s16 = scalar_lea.vmem %s1661_s1, 16  ;;  %s9616_s18 = scalar_lea.vmem %s1661_s1, 32 }
 0x12a   : > { %p9610_p13 = scmp.ne.s32.totalorder %s1661_s1, %s9609_s16  ;;  %p9617_p4 = scmp.lt.s32.totalorder %s1661_s1, %s1661_s1 }
 0x12b   : > { %p9618_p6 = scmp.lt.s32.totalorder %s9616_s18, %s9609_s16 }
 0x12c   : > { %p9612_p0 = pnand %p9610_p13, %p10342_p7 }
 0x12d   : > { %p9619_p8 = por %p9618_p6, %p9617_p4 }
 0x12e   : > { %p9613_p1 = pneg %p9612_p0 }
 0x130   : > { %p9620_p9 = pnand %p9619_p8, %p9613_p1 }
 0x132   : > { %9623 = shalt.err (!%p9620_p9)
}
 0x133   : > { %9176 = dma.hbm_to_vmem [thread:$0]  (!%p10330_p5), %s11442_s17, 16, %s1661_s1, [#allocation26]  }
 0x134   : > { %s9985_s28 = smov [#allocation2]   ;;  %s9624_s23 = scalar_lea.hbm %s11444_s13, 256 }
 0x135   : > { %s1384_s2 = sshll.u32 %s9985_s28, 4  ;;  %p9625_p10 = scmp.ne.s32.totalorder %s11444_s13, %s9624_s23  ;;  %s1385_s2 = int_to_ptr.vmem [resolvable:$true] %s1384_s2 }
 0x136   : > { %p9631_p3 = scmp.lt.u32.totalorder %s9624_s23, %s11444_s13 }
 0x137   : > { %p9627_p11 = pnand %p9625_p10, %p10342_p7 }
 0x139   : > { %p9628_p12 = pneg %p9627_p11 }
 0x13b   : > { %p9633_p2 = pnand %p9631_p3, %p9628_p12 }
 0x13d   : > { %9636 = shalt.err (!%p9633_p2)
}
 0x13e   : > { %s9637_s22 = scalar_lea.vmem %s1385_s2, 256  ;;  %p9645_p4 = scmp.lt.s32.totalorder %s1385_s2, %s1385_s2 }
 0x13f   : > { %p9638_p13 = scmp.ne.s32.totalorder %s1385_s2, %s9637_s22  ;;  %p9646_p6 = scmp.lt.s32.totalorder %s9637_s22, %s9637_s22 }
 0x141   : > { %p9640_p0 = pnand %p9638_p13, %p10342_p7  ;;  %p9647_p8 = por %p9646_p6, %p9645_p4 }
 0x143   : > { %p9641_p1 = pneg %p9640_p0 }
 0x145   : > { %p9648_p9 = pnand %p9647_p8, %p9641_p1 }
 0x147   : > { %9651 = shalt.err (!%p9648_p9)
}
 0x148   : > { %s9986_s1 = smov 128   ;;  %s9987_s10 = smov 8  }
 0x149   : > { %9131 = dma.hbm_to_vmem [thread:$0]  (!%p10330_p5), %s11444_s13, 256, %s1385_s2, [#allocation3], %s9986_s1, %s9986_s1, %s9987_s10  }
 0x14a   : > { %s9988_s16 = smov [#allocation6]   ;;  %s9989_s28 = smov [#allocation9]  }
 0x14b   : > { %s1457_s18 = sshll.u32 %s9988_s16, 4  ;;  %s1482_s23 = sshll.u32 %s9989_s28, 4  ;;  %s1458_s18 = int_to_ptr.vmem [resolvable:$true] %s1457_s18  ;;  %s10457_s23 = int_to_ptr.vmem [resolvable:$true] %s1482_s23 }
 0x14c   : > { %s9652_s22 = scalar_lea.hbm %s10120_s27, 16 }
 0x14d   : > { %p9653_p10 = scmp.ne.s32.totalorder %s10120_s27, %s9652_s22  ;;  %p9659_p3 = scmp.lt.u32.totalorder %s9652_s22, %s10120_s27 }
 0x14f   : > { %p9655_p11 = pnand %p9653_p10, %p10342_p7 }
 0x151   : > { %p9656_p12 = pneg %p9655_p11 }
 0x153   : > { %p9661_p2 = pnand %p9659_p3, %p9656_p12 }
 0x155   : > { %9664 = shalt.err (!%p9661_p2)
}
 0x156   : > { %s9665_s3 = scalar_lea.vmem %s1458_s18, 16  ;;  %s9672_s2 = scalar_lea.vmem %s1458_s18, 32 }
 0x157   : > { %p9666_p13 = scmp.ne.s32.totalorder %s1458_s18, %s9665_s3  ;;  %p9673_p4 = scmp.lt.s32.totalorder %s1458_s18, %s1458_s18 }
 0x158   : > { %p9674_p6 = scmp.lt.s32.totalorder %s9672_s2, %s9665_s3 }
 0x159   : > { %p9668_p0 = pnand %p9666_p13, %p10342_p7 }
 0x15a   : > { %p9675_p8 = por %p9674_p6, %p9673_p4 }
 0x15b   : > { %p9669_p1 = pneg %p9668_p0 }
 0x15d   : > { %p9676_p9 = pnand %p9675_p8, %p9669_p1 }
 0x15f   : > { %9679 = shalt.err (!%p9676_p9)
}
 0x160   : > { %9137 = dma.hbm_to_vmem [thread:$0]  (!%p10330_p5), %s10120_s27, 16, %s1458_s18, [#allocation5]  }
 0x161   : > { %s9680_s1 = scalar_lea.hbm %s10135_s20, 32 }
 0x162   : > { %p9681_p10 = scmp.ne.s32.totalorder %s10135_s20, %s9680_s1  ;;  %p9687_p3 = scmp.lt.u32.totalorder %s9680_s1, %s10135_s20 }
 0x164   : > { %p9683_p11 = pnand %p9681_p10, %p10342_p7 }
 0x166   : > { %p9684_p12 = pneg %p9683_p11 }
 0x168   : > { %p9689_p2 = pnand %p9687_p3, %p9684_p12 }
 0x16a   : > { %9692 = shalt.err (!%p9689_p2)
}
 0x16b   : > { %s9693_s3 = scalar_lea.vmem %s10457_s23, 32  ;;  %p9701_p4 = scmp.lt.s32.totalorder %s10457_s23, %s10457_s23 }
 0x16c   : > { %p9694_p13 = scmp.ne.s32.totalorder %s10457_s23, %s9693_s3  ;;  %p9702_p6 = scmp.lt.s32.totalorder %s9693_s3, %s9693_s3 }
 0x16e   : > { %p9696_p0 = pnand %p9694_p13, %p10342_p7  ;;  %p9703_p8 = por %p9702_p6, %p9701_p4 }
 0x170   : > { %p9697_p1 = pneg %p9696_p0 }
 0x172   : > { %p9704_p9 = pnand %p9703_p8, %p9697_p1 }
 0x174   : > { %9707 = shalt.err (!%p9704_p9)
}
 0x175   : > { %9143 = dma.hbm_to_vmem [thread:$0]  (!%p10330_p5), %s10135_s20, 32, %s10457_s23, [#allocation8]  }
 0x176   : > { %s9990_s10 = smov [#allocation12]   ;;  %s9991_s18 = smov [#allocation15]  }
 0x177   : > { %s1510_s16 = sshll.u32 %s9990_s10, 4  ;;  %s1553_s28 = sshll.u32 %s9991_s18, 4  ;;  %s1511_s16 = int_to_ptr.vmem [resolvable:$true] %s1510_s16  ;;  %s10484_s28 = int_to_ptr.vmem [resolvable:$true] %s1553_s28 }
 0x178   : > { %s9708_s22 = scalar_lea.hbm %s10155_s24, 16 }
 0x179   : > { %p9709_p10 = scmp.ne.s32.totalorder %s10155_s24, %s9708_s22  ;;  %p9715_p3 = scmp.lt.u32.totalorder %s9708_s22, %s10155_s24 }
 0x17b   : > { %p9711_p11 = pnand %p9709_p10, %p10342_p7 }
 0x17d   : > { %p9712_p12 = pneg %p9711_p11 }
 0x17f   : > { %p9717_p2 = pnand %p9715_p3, %p9712_p12 }
 0x181   : > { %9720 = shalt.err (!%p9717_p2)
}
 0x182   : > { %s9721_s2 = scalar_lea.vmem %s1511_s16, 16  ;;  %s9728_s23 = scalar_lea.vmem %s1511_s16, 32 }
 0x183   : > { %p9722_p13 = scmp.ne.s32.totalorder %s1511_s16, %s9721_s2  ;;  %p9729_p4 = scmp.lt.s32.totalorder %s1511_s16, %s1511_s16 }
 0x184   : > { %p9730_p6 = scmp.lt.s32.totalorder %s9728_s23, %s9721_s2 }
 0x185   : > { %p9724_p0 = pnand %p9722_p13, %p10342_p7 }
 0x186   : > { %p9731_p8 = por %p9730_p6, %p9729_p4 }
 0x187   : > { %p9725_p1 = pneg %p9724_p0 }
 0x189   : > { %p9732_p9 = pnand %p9731_p8, %p9725_p1 }
 0x18b   : > { %9735 = shalt.err (!%p9732_p9)
}
 0x18c   : > { %9149 = dma.hbm_to_vmem [thread:$0]  (!%p10330_p5), %s10155_s24, 16, %s1511_s16, [#allocation11]  }
 0x18d   : > { %s9736_s1 = scalar_lea.hbm %s11443_s14, 16 }
 0x18e   : > { %p9737_p10 = scmp.ne.s32.totalorder %s11443_s14, %s9736_s1  ;;  %p9743_p3 = scmp.lt.u32.totalorder %s9736_s1, %s11443_s14 }
 0x190   : > { %p9739_p11 = pnand %p9737_p10, %p10342_p7 }
 0x192   : > { %p9740_p12 = pneg %p9739_p11 }
 0x194   : > { %p9745_p2 = pnand %p9743_p3, %p9740_p12 }
 0x196   : > { %9748 = shalt.err (!%p9745_p2)
}
 0x197   : > { %s9749_s3 = scalar_lea.vmem %s10484_s28, 16  ;;  %s9756_s10 = scalar_lea.vmem %s10484_s28, 32 }
 0x198   : > { %p9750_p13 = scmp.ne.s32.totalorder %s10484_s28, %s9749_s3  ;;  %p9757_p4 = scmp.lt.s32.totalorder %s10484_s28, %s10484_s28 }
 0x199   : > { %p9758_p6 = scmp.lt.s32.totalorder %s9756_s10, %s9749_s3 }
 0x19a   : > { %p9752_p0 = pnand %p9750_p13, %p10342_p7 }
 0x19b   : > { %p9759_p8 = por %p9758_p6, %p9757_p4 }
 0x19c   : > { %p9753_p1 = pneg %p9752_p0 }
 0x19e   : > { %p9760_p9 = pnand %p9759_p8, %p9753_p1 }
 0x1a0   : > { %9763 = shalt.err (!%p9760_p9)
}
 0x1a1   : > { %9155 = dma.hbm_to_vmem [thread:$0]  (!%p10330_p5), %s11443_s14, 16, %s10484_s28, [#allocation14]  }
 0x1a2   : > { %s9992_s16 = smov [#allocation18]   ;;  %s9993_s22 = smov [#allocation21]  }
 0x1a3   : > { %s1584_s18 = sshll.u32 %s9992_s16, 4  ;;  %s1615_s2 = sshll.u32 %s9993_s22, 4  ;;  %s1585_s18 = int_to_ptr.vmem [resolvable:$true] %s1584_s18  ;;  %s10512_s2 = int_to_ptr.vmem [resolvable:$true] %s1615_s2 }
 0x1a4   : > { %s9764_s23 = scalar_lea.hbm %s11447_s8, 16 }
 0x1a5   : > { %p9765_p10 = scmp.ne.s32.totalorder %s11447_s8, %s9764_s23  ;;  %p9771_p3 = scmp.lt.u32.totalorder %s9764_s23, %s11447_s8 }
 0x1a7   : > { %p9767_p11 = pnand %p9765_p10, %p10342_p7 }
 0x1a9   : > { %p9768_p12 = pneg %p9767_p11 }
 0x1ab   : > { %p9773_p2 = pnand %p9771_p3, %p9768_p12 }
 0x1ad   : > { %9776 = shalt.err (!%p9773_p2)
}
 0x1ae   : > { %s9777_s1 = scalar_lea.vmem %s1585_s18, 16  ;;  %s9784_s28 = scalar_lea.vmem %s1585_s18, 32 }
 0x1af   : > { %p9778_p13 = scmp.ne.s32.totalorder %s1585_s18, %s9777_s1  ;;  %p9785_p4 = scmp.lt.s32.totalorder %s1585_s18, %s1585_s18 }
 0x1b0   : > { %p9786_p6 = scmp.lt.s32.totalorder %s9784_s28, %s9777_s1 }
 0x1b1   : > { %p9780_p0 = pnand %p9778_p13, %p10342_p7 }
 0x1b2   : > { %p9787_p8 = por %p9786_p6, %p9785_p4 }
 0x1b3   : > { %p9781_p1 = pneg %p9780_p0 }
 0x1b5   : > { %p9788_p9 = pnand %p9787_p8, %p9781_p1 }
 0x1b7   : > { %9791 = shalt.err (!%p9788_p9)
}
 0x1b8   : > { %s11454_s3 = sld [smem:[#allocation78_spill]] }
 0x1b9   : > { %9161 = dma.hbm_to_vmem [thread:$0]  (!%p10330_p5), %s11447_s8, 16, %s1585_s18, [#allocation17]  }
 0x1be   : > { %s9792_s10 = scalar_lea.hbm %s11454_s3, 16 }
 0x1bf   : > { %p9793_p10 = scmp.ne.s32.totalorder %s11454_s3, %s9792_s10  ;;  %p9799_p3 = scmp.lt.u32.totalorder %s9792_s10, %s11454_s3 }
 0x1c1   : > { %p9795_p11 = pnand %p9793_p10, %p10342_p7 }
 0x1c3   : > { %p9796_p12 = pneg %p9795_p11 }
 0x1c5   : > { %p9801_p2 = pnand %p9799_p3, %p9796_p12 }
 0x1c7   : > { %9804 = shalt.err (!%p9801_p2)
}
 0x1c8   : > { %s9805_s16 = scalar_lea.vmem %s10512_s2, 16  ;;  %s9812_s22 = scalar_lea.vmem %s10512_s2, 32 }
 0x1c9   : > { %p9806_p13 = scmp.ne.s32.totalorder %s10512_s2, %s9805_s16  ;;  %p9813_p4 = scmp.lt.s32.totalorder %s10512_s2, %s10512_s2 }
 0x1ca   : > { %p9814_p6 = scmp.lt.s32.totalorder %s9812_s22, %s9805_s16 }
 0x1cb   : > { %p9808_p0 = pnand %p9806_p13, %p10342_p7 }
 0x1cc   : > { %p9815_p8 = por %p9814_p6, %p9813_p4 }
 0x1cd   : > { %p9809_p1 = pneg %p9808_p0 }
 0x1cf   : > { %p9816_p9 = pnand %p9815_p8, %p9809_p1 }
 0x1d1   : > { %9819 = shalt.err (!%p9816_p9)
}
 0x1d2   : > { %s11455_s18 = sld [smem:[#allocation82_spill]]  ;;  %s9994_s23 = smov [#allocation24]  }
 0x1d3   : > { %9167 = dma.hbm_to_vmem [thread:$0]  (!%p10330_p5), %s11454_s3, 16, %s10512_s2, [#allocation20]  }
 0x1d4   : > { %s1646_s1 = sshll.u32 %s9994_s23, 4  ;;  %s9995_s28 = smov [#allocation27]   ;;  %s1647_s1 = int_to_ptr.vmem [resolvable:$true] %s1646_s1 }
 0x1d5   : > { %s1677_s10 = sshll.u32 %s9995_s28, 4  ;;  %s10540_s10 = int_to_ptr.vmem [resolvable:$true] %s1677_s10 }
 0x1d8   : > { %s9820_s16 = scalar_lea.hbm %s11455_s18, 16 }
 0x1d9   : > { %p9821_p10 = scmp.ne.s32.totalorder %s11455_s18, %s9820_s16  ;;  %p9827_p3 = scmp.lt.u32.totalorder %s9820_s16, %s11455_s18 }
 0x1db   : > { %p9823_p11 = pnand %p9821_p10, %p10342_p7 }
 0x1dd   : > { %p9824_p12 = pneg %p9823_p11 }
 0x1df   : > { %p9829_p2 = pnand %p9827_p3, %p9824_p12 }
 0x1e1   : > { %9832 = shalt.err (!%p9829_p2)
}
 0x1e2   : > { %s9833_s22 = scalar_lea.vmem %s1647_s1, 16  ;;  %s9840_s2 = scalar_lea.vmem %s1647_s1, 32 }
 0x1e3   : > { %p9834_p13 = scmp.ne.s32.totalorder %s1647_s1, %s9833_s22  ;;  %p9841_p4 = scmp.lt.s32.totalorder %s1647_s1, %s1647_s1 }
 0x1e4   : > { %p9842_p6 = scmp.lt.s32.totalorder %s9840_s2, %s9833_s22 }
 0x1e5   : > { %p9836_p0 = pnand %p9834_p13, %p10342_p7 }
 0x1e6   : > { %p9843_p8 = por %p9842_p6, %p9841_p4 }
 0x1e7   : > { %p9837_p1 = pneg %p9836_p0 }
 0x1e9   : > { %p9844_p9 = pnand %p9843_p8, %p9837_p1 }
 0x1eb   : > { %9847 = shalt.err (!%p9844_p9)
}
 0x1ec   : > { %9173 = dma.hbm_to_vmem [thread:$0]  (!%p10330_p5), %s11455_s18, 16, %s1647_s1, [#allocation23]  }
 0x1ed   : > { %s9848_s23 = scalar_lea.hbm %s11446_s9, 16 }
 0x1ee   : > { %p9849_p10 = scmp.ne.s32.totalorder %s11446_s9, %s9848_s23  ;;  %p9855_p3 = scmp.lt.u32.totalorder %s9848_s23, %s11446_s9 }
 0x1f0   : > { %p9851_p11 = pnand %p9849_p10, %p10342_p7 }
 0x1f2   : > { %p9852_p12 = pneg %p9851_p11 }
 0x1f4   : > { %p9857_p2 = pnand %p9855_p3, %p9852_p12 }
 0x1f6   : > { %9860 = shalt.err (!%p9857_p2)
}
 0x1f7   : > { %s9861_s28 = scalar_lea.vmem %s10540_s10, 16  ;;  %s9868_s16 = scalar_lea.vmem %s10540_s10, 32 }
 0x1f8   : > { %p9862_p13 = scmp.ne.s32.totalorder %s10540_s10, %s9861_s28  ;;  %p9869_p4 = scmp.lt.s32.totalorder %s10540_s10, %s10540_s10 }
 0x1f9   : > { %p9870_p6 = scmp.lt.s32.totalorder %s9868_s16, %s9861_s28 }
 0x1fa   : > { %p9864_p0 = pnand %p9862_p13, %p10342_p7 }
 0x1fb   : > { %p9871_p8 = por %p9870_p6, %p9869_p4 }
 0x1fc   : > { %p9865_p1 = pneg %p9864_p0 }
 0x1fe   : > { %p9872_p9 = pnand %p9871_p8, %p9865_p1 }
 0x200   : > { %9875 = shalt.err (!%p9872_p9)
}
 0x201   : > { %9179 = dma.hbm_to_vmem [thread:$0]  (!%p10330_p5), %s11446_s9, 16, %s10540_s10, [#allocation26]  }
 0x202   : > { %p11456_p10 = scmp.ne.s32.totalorder %s11451_s15, 0 }
 0x203   : > { %p11457_p11 = scmp.eq.s32.totalorder (!%p11456_p10), %s10313_s11, 0 }
 0x204   : > { %1703 = sbr.rel (%p11456_p10) target bundleno = 16957 (0x423d), region = 248 }
 0x20b   : > { %9881 = dma.done.wait (%p11457_p11), [#allocation3], 256   ;;  %p11458_p7 = pmov %p11457_p11 }
 0x20d   : > { %9883 = vsyncadd (%p11458_p7), [#allocation3], 4294967040  ;;  %p11459_p12 = pmov %p11458_p7 }
 0x20e   : > { %p11460_p3 = pmov %p11458_p7 }
 0x20f   : > { %9885 = dma.done.wait (%p11459_p12), [#allocation5], 32  }
 0x210   : > { %9887 = vsyncadd (%p11460_p3), [#allocation5], 4294967264  ;;  %p11461_p2 = pmov %p11460_p3 }
 0x212   : > { %9889 = dma.done.wait (%p11461_p2), [#allocation8], 48   ;;  %p11462_p5 = pmov %p11461_p2 }
 0x213   : > { %p11463_p13 = pmov %p11461_p2 }
 0x214   : > { %9891 = vsyncadd (%p11462_p5), [#allocation8], 4294967248 }
 0x215   : > { %9893 = dma.done.wait (%p11463_p13), [#allocation11], 32   ;;  %p11464_p0 = pmov %p11461_p2 }
 0x217   : > { %9895 = vsyncadd (%p11464_p0), [#allocation11], 4294967264  ;;  %p11465_p1 = pmov %p11464_p0 }
 0x218   : > { %p11466_p4 = pmov %p11464_p0 }
 0x219   : > { %9897 = dma.done.wait (%p11465_p1), [#allocation14], 48  }
 0x21a   : > { %9899 = vsyncadd (%p11466_p4), [#allocation14], 4294967248  ;;  %p11467_p6 = pmov %p11464_p0 }
 0x21b   : > { %p11468_p8 = pmov %p11464_p0 }
 0x21c   : > { %9901 = dma.done.wait (%p11467_p6), [#allocation17], 32  }
 0x21d   : > { %9903 = vsyncadd (%p11468_p8), [#allocation17], 4294967264  ;;  %p11469_p9 = pmov %p11464_p0 }
 0x21e   : > { %p11470_p10 = pmov %p11464_p0 }
 0x21f   : > { %9905 = dma.done.wait (%p11469_p9), [#allocation20], 32  }
 0x220   : > { %9907 = vsyncadd (%p11470_p10), [#allocation20], 4294967264  ;;  %p11471_p11 = pmov %p11464_p0 }
 0x221   : > { %p11472_p7 = pmov %p11464_p0 }
 0x222   : > { %9909 = dma.done.wait (%p11471_p11), [#allocation23], 32  }
 0x223   : > { %9911 = vsyncadd (%p11472_p7), [#allocation23], 4294967264  ;;  %p11473_p12 = pmov %p11464_p0 }
 0x224   : > { %p11474_p3 = pmov %p11464_p0 }
 0x225   : > { %9913 = dma.done.wait (%p11473_p12), [#allocation26], 32  }
 0x226   : > { %9915 = vsyncadd (%p11474_p3), [#allocation26], 4294967264  ;;  %s11475_s15 = sld [smem:[#allocation38_spill]]  ;;  %s11476_s26 = sld [smem:[#allocation37_spill]]  ;;  %v9996_v0 = vmov 0.0|0.0   ;;  %vm9997_vm0 = vmmov 0  }
 0x227   : > { %8876 = vmatprep.subr.bf16.mxu0 %v9996_v0  ;;  %p1900_p2 = scmp.lt.s32.totalorder %s10313_s11, 1  ;;  %8880 = vmatprep.subr.bf16.mxu1 %v9996_v0  ;;  %v9998_v1 = vmov 0.0   ;;  %vm2100_vm1 = vcmask 1043456   ;;  %s11477_s1 = sld [smem:[#allocation41_spill]]  ;;  %vm9999_vm2 = vmmov 1   ;;  %v1911_v2 = vld [vmem:[#allocation2] sm:$0xff] }
 0x228   : > { %8425 = vmatprep.mubr.msk.f32.mxu0 %vm9997_vm0, %v9998_v1  ;;  %vm8878_vm3 = vmpackc.low %vm2100_vm1, %vm9999_vm2  ;;  %v1912_v3 = vld [vmem:[#allocation2 + $0x8] sm:$0xf]  ;;  %vm2096_vm4 = vcmask 97280   ;;  %s11478_s2 = sld [smem:[#allocation40_spill]]  ;;  %vm2186_vm6 = vcmask 1040384   ;;  %vm2188_vm7 = vcmask 1041408  }
 0x229   : > { %s11527_s11 = smov (!%p1900_p2, %s10313_s11), 1  ;;  %v8877_v5 = vpack.c.bf16 %v1912_v3, %v1911_v2  ;;  %vm2191_vm8 = vcmask 1042432   ;;  %vm2209_vm9 = vcmask 1044480   ;;  %vm2219_vm10 = vcmask 261120   ;;  %s11357_s23 = smov 96  }
 0x22a   : > { %s11347_s0 = sshll.u32 %s11527_s11, 3  ;;  %vm2195_vm11 = vcmask 1046528   ;;  %s11348_s28 = smov 32   ;;  %vm2202_vm12 = vcmask 1045504   ;;  %vm2221_vm13 = vcmask 523264   ;;  %vm2223_vm14 = vcmask 785408  }
 0x22b   : > { %8879 = vmatpush3.bf16.msk.msra.mxu0 %vm8878_vm3, %v8877_v5  ;;  %s11479_s16 = sld [smem:[#allocation43_spill]]  ;;  %vm2490_vm2 = vcmask 64512   ;;  %s11496_s3 = smov 56  }
 0x22c   : > { %s10617_s10 = scalar_lea.vmem %s11475_s15, %s11527_s11  ;;  %s1903_s22 = scalar_lea.vmem %s11476_s26, %s11347_s0  ;;  %8910 = vmatprep.subr.bf16.mxu0 %v9996_v0 }
 0x22d   : > { %v2081_v4 = vld [vmem:[%s1903_s22] sm:$0xff]  ;;  %v1915_v9 = vld [vmem:[%s11477_s1 + $0x8] sm:$0xff]  ;;  %v1916_v10 = vld [vmem:[%s11477_s1 + $0x10] sm:$0xff]  ;;  %s11349_s15 = smov 64   ;;  %s11480_s26 = sld [smem:[#allocation42_spill]] }
 0x22e   : > { %v8116_v6 = vld [vmem:[%s10617_s10] ss:$0 sm:$0xff]  ;;  %v1917_v12 = vld [vmem:[%s11477_s1 + $0x18] sm:$0xff]  ;;  %v1919_v15 = vld [vmem:[%s11477_s1 + $0x28] sm:$0xff]  ;;  %s11481_s22 = sld [smem:[#allocation46_spill]]  ;;  %s11351_s0 = smov 112  }
 0x22f   : > { %v2089_v7 = vsub.f32 %v2081_v4, %v8116_v6  ;;  %v1914_v8 = vld [vmem:[%s11477_s1] sm:$0xff]  ;;  %v8884_v13 = vpack.c.bf16 %v1917_v12, %v1916_v10  ;;  %v1920_v17 = vld [vmem:[%s11477_s1 + $0x30] sm:$0xff]  ;;  %v1921_v18 = vld [vmem:[%s11477_s1 + $0x38] sm:$0xff]  ;;  %s11497_s4 = smov 80   ;;  %s11498_s6 = sld [smem:[#allocation56_spill]] }
 0x230   : > { %v8881_v11 = vpack.c.bf16 %v1915_v9, %v1914_v8  ;;  %v1918_v14 = vld [vmem:[%s11477_s1 + $0x20] sm:$0xff]  ;;  %v8890_v19 = vpack.c.bf16 %v1921_v18, %v1920_v17  ;;  %v1923_v21 = vld [vmem:[%s11477_s1 + $0x48] sm:$0xff]  ;;  %v1924_v23 = vld [vmem:[%s11477_s1 + $0x50] sm:$0xff]  ;;  %s11499_s8 = smov 64   ;;  %s11500_s9 = smov 112  }
 0x231   : > { %8426 = vmatmul.mubr.msk.f32.vlgmr.msra.gmra.mrb[0].mxu0 %vm2096_vm4, %v2089_v7  ;;  %v8887_v16 = vpack.c.bf16 %v1919_v15, %v1918_v14  ;;  %v1922_v20 = vld [vmem:[%s11477_s1 + $0x40] sm:$0xff]  ;;  %v1925_v24 = vld [vmem:[%s11477_s1 + $0x58] sm:$0xff]  ;;  %v1927_v27 = vld [vmem:[%s11477_s1 + $0x68] sm:$0xff]  ;;  %s11501_s12 = smov 72   ;;  %s11502_s13 = smov 104  }
 0x232   : > { %8436 = vmatprep.mubr.msk.f32.mxu0 %vm9997_vm0, %v9998_v1  ;;  %8882 = vmatpush1.bf16.msra.mxu1 %v8881_v11  ;;  %v8893_v22 = vpack.c.bf16 %v1923_v21, %v1922_v20  ;;  %v8896_v25 = vpack.c.bf16 %v1925_v24, %v1924_v23  ;;  %v1926_v26 = vld [vmem:[%s11477_s1 + $0x60] sm:$0xff]  ;;  %v1928_v29 = vld [vmem:[%s11477_s1 + $0x70] sm:$0xff]  ;;  %v1929_v30 = vld [vmem:[%s11477_s1 + $0x78] sm:$0xff]  ;;  %s11503_s14 = smov 48   ;;  %s11512_s17 = sld [smem:[#allocation65_spill]] }
 0x233   : > { %8883 = vmatprep.subr.bf16.mxu1 %v9996_v0  ;;  %v8899_v28 = vpack.c.bf16 %v1927_v27, %v1926_v26  ;;  %v8902_v31 = vpack.c.bf16 %v1929_v30, %v1928_v29  ;;  %v1930_v32 = vld [vmem:[%s11477_s1 + $0x80] sm:$0xff]  ;;  %v1931_v33 = vld [vmem:[%s11477_s1 + $0x88] sm:$0xff]  ;;  %v1932_v39 = vld [vmem:[%s11477_s1 + $0x90] sm:$0xff] }
 0x234   : > { %v8905_v34 = vpack.c.bf16 %v1931_v33, %v1930_v32  ;;  %v8117_v35 = vld [vmem:[%s11478_s2] ss:$0 sm:$0xff]  ;;  %v1933_v40 = vld [vmem:[%s11477_s1 + $0x98] sm:$0xff]  ;;  %v1936_v9 = vld [vmem:[%s11479_s16 + $0x8] sm:$0xff]  ;;  %s11482_s2 = sld [smem:[#allocation44_spill]]  ;;  %s11495_s1 = smov 120  }
 0x235   : > { %v8908_v41 = vpack.c.bf16 %v1933_v40, %v1932_v39  ;;  %v1935_v8 = vld [vmem:[%s11479_s16] sm:$0xff]  ;;  %v1937_v11 = vld [vmem:[%s11479_s16 + $0x10] sm:$0xff]  ;;  %v1938_v12 = vld [vmem:[%s11479_s16 + $0x18] sm:$0xff]  ;;  %s11506_s16 = sld [smem:[#allocation60_spill]] }
 0x236   : > { %8885 = vmatpush1.bf16.msra.mxu1 %v8884_v13  ;;  %v8911_v10 = vpack.c.bf16 %v1936_v9, %v1935_v8  ;;  %v8914_v13 = vpack.c.bf16 %v1938_v12, %v1937_v11  ;;  %v8120_v14 = vld [vmem:[%s11480_s26] ss:$0 sm:$0xff]  ;;  %s11483_s26 = sld [smem:[#allocation45_spill]]  ;;  %v1942_v40 = vld [vmem:[%s11481_s22 + $0x8] sm:$0xff] }
 0x237   : > { %8886 = vmatprep.subr.bf16.mxu1 %v9996_v0  ;;  %v1941_v39 = vld [vmem:[%s11481_s22] sm:$0xff] }
 0x238   : > { %8912 = vmatpush3.bf16.msra.mxu0 %v8911_v10 }
 0x239   : > { %8913 = vmatprep.subr.bf16.mxu0 %v9996_v0 }
 0x23a   : > { %8888 = vmatpush1.bf16.msra.mxu1 %v8887_v16 }
 0x23b   : > { %8889 = vmatprep.subr.bf16.mxu1 %v9996_v0 }
 0x23c   : > { %8915 = vmatpush3.bf16.msra.mxu0 %v8914_v13 }
 0x23d   : > { %8916 = vmatprep.subr.bf16.mxu0 %v9996_v0 }
 0x23e   : > { %8891 = vmatpush1.bf16.msra.mxu1 %v8890_v19 }
 0x23f   : > { %8892 = vmatprep.subr.bf16.mxu1 %v9996_v0 }
 0x242   : > { %8894 = vmatpush1.bf16.msra.mxu1 %v8893_v22 }
 0x243   : > { %8895 = vmatprep.subr.bf16.mxu1 %v9996_v0 }
 0x246   : > { %8897 = vmatpush1.bf16.msra.mxu1 %v8896_v25 }
 0x247   : > { %8898 = vmatprep.subr.bf16.mxu1 %v9996_v0 }
 0x24a   : > { %8900 = vmatpush1.bf16.msra.mxu1 %v8899_v28 }
 0x24b   : > { %8901 = vmatprep.subr.bf16.mxu1 %v9996_v0 }
 0x24e   : > { %8903 = vmatpush1.bf16.msra.mxu1 %v8902_v31 }
 0x24f   : > { %8904 = vmatprep.subr.bf16.mxu1 %v9996_v0 }
 0x252   : > { %8906 = vmatpush1.bf16.msra.mxu1 %v8905_v34 }
 0x253   : > { %8907 = vmatprep.subr.bf16.mxu1 %v9996_v0 }
 0x256   : > { %8909 = vmatpush1.bf16.msra.mxu1 %v8908_v41 }
 0x257   : > { %8480 = vmatprep.subr.mxu1 %v9998_v1 }
 0x304   : > { %v2170_v36 = vpop.f32.mrb[0].mxu0 }
 0x305   : > { %v2171_v37 = vadd.f32 %v8117_v35, %v2170_v36  ;;  %v8427_v38 = vpop.f32.mrb[1].mxu0 }
 0x307   : > { %vm2174_vm5 = vcmp.ge.f32.partialorder %v2171_v37, 0.0  ;;  %v2175_v42 = vmul.f32 0.2, %v2171_v37 }
 0x309   : > { %v2176_v43 = vsel %vm2174_vm5, %v2171_v37, %v2175_v42  ;;  %v8917_v42 = vpack.c.bf16 %v1942_v40, %v1941_v39 }
 0x30a   : > { %v2178_v44 = vrot.slane %v2176_v43, 7  ;;  %v2180_v45 = vrot.slane %v2176_v43, 6  ;;  %v2182_v46 = vrot.slane %v2176_v43, 5  ;;  %v2184_v47 = vrot.slane %v2176_v43, 4 }
 0x30c   : > { %v2187_v48 = vsel %vm2186_vm6, %v2176_v43, %v2178_v44  ;;  %v2190_v49 = vsel %vm2188_vm7, %v2180_v45, %v2182_v46  ;;  %v1943_v44 = vld [vmem:[%s11481_s22 + $0x10] sm:$0xff] }
 0x30d   : > { %v2189_v50 = vsel %vm2188_vm7, %v2187_v48, %v2180_v45  ;;  %v2192_v51 = vsel %vm2191_vm8, %v2190_v49, %v2184_v47  ;;  %v1944_v45 = vld [vmem:[%s11481_s22 + $0x18] sm:$0xff]  ;;  %v8122_v47 = vld [vmem:[%s11482_s2] ss:$0 sm:$0xff]  ;;  %s11355_s2 = smov 120  }
 0x30e   : > { %v2216_v52 = vrot.slane %v2189_v50, 4  ;;  %v2217_v53 = vrot.slane %v2192_v51, 4  ;;  %v2210_v54 = vrot.slane %v2189_v50, 3  ;;  %v2211_v55 = vrot.slane %v2192_v51, 3  ;;  %v1940_v48 = vld [vmem:[%s11483_s26] sm:$0xff] }
 0x30f   : > { %v2196_v56 = vrot.slane %v2189_v50, 1  ;;  %v2197_v57 = vrot.slane %v2192_v51, 1  ;;  %v2203_v61 = vrot.slane %v2189_v50, 2  ;;  %v2204_v62 = vrot.slane %v2192_v51, 2 }
 0x310   : > { %v2218_v58 = vsel %vm2100_vm1, %v2216_v52, %v2217_v53  ;;  %v2212_v59 = vsel %vm2209_vm9, %v2210_v54, %v2211_v55  ;;  %v8920_v46 = vpack.c.bf16 %v1944_v45, %v1943_v44  ;;  %v8124_v53 = vld [vmem:[#allocation4] ss:$0 sm:$0xff] }
 0x311   : > { %8121 = vmatprep.mubr.msk.f32.mxu1 %vm2219_vm10, %v2218_v58  ;;  %2213 = vrot.lane.b32.xlu1 %v2212_v59, %s11357_s23  ;;  %v2198_v60 = vsel %vm2195_vm11, %v2196_v56, %v2197_v57  ;;  %v2205_v63 = vsel %vm2202_vm12, %v2203_v61, %v2204_v62 }
 0x312   : > { %2199 = vrot.lane.b32.xlu0 %v2198_v60, %s11348_s28  ;;  %s11359_s28 = smov 88  }
 0x316   : > { %2206 = vrot.lane.b32.xlu0 %v2205_v63, %s11349_s15 }
 0x383   : > { %v2214_v5 = vpop.permute.xlu1 %2213 }
 0x384   : > { %v2200_v2 = vpop.permute.xlu0 %2199 }
 0x385   : > { %v2220_v3 = vsel %vm2219_vm10, %v2189_v50, %v2200_v2 }
 0x388   : > { %v2207_v4 = vpop.permute.xlu0 %2206 }
 0x389   : > { %v2222_v6 = vsel %vm2221_vm13, %v2220_v3, %v2207_v4 }
 0x38a   : > { %v2224_v7 = vsel %vm2223_vm14, %v2222_v6, %v2214_v5 }
 0x38b   : > { %2298 = vmatmul.mubr.f32.vlgmr.msra.gmra.mrb[0].mxu1 %v2224_v7 }
 0x38c   : > { %8482 = vmatprep.mubr.msk.f32.mxu1 %vm9997_vm0, %v9998_v1 }
 0x45e   : > { %v2299_v15 = vpop.f32.mrb[0].mxu1 }
 0x45f   : > { %v2300_v16 = vadd.f32 %v8120_v14, %v2299_v15  ;;  %v2301_v17 = vpop.f32.mrb[1].mxu1 }
 0x461   : > { %vm2303_vm15 = vcmp.ge.f32.partialorder %v2300_v16, 0.0  ;;  %v2304_v18 = vmul.f32 0.2, %v2300_v16 }
 0x463   : > { %v2305_v19 = vsel %vm2303_vm15, %v2300_v16, %v2304_v18 }
 0x464   : > { %v2306_v20 = vsel %vm2219_vm10, %v2305_v19, 0.0 }
 0x465   : > { %v2307_v21 = vrot.slane %v2306_v20, 4 }
 0x467   : > { %v2308_v22 = vadd.f32 %v2307_v21, %v2306_v20 }
 0x469   : > { %v2309_v23 = vrot.slane %v2308_v22, 2 }
 0x46b   : > { %v2310_v24 = vadd.f32 %v2309_v23, %v2308_v22 }
 0x46d   : > { %v2311_v25 = vrot.slane %v2310_v24, 1 }
 0x46f   : > { %v2312_v26 = vadd.f32 %v2311_v25, %v2310_v24 }
 0x471   : > { %v2314_v27 = vmul.f32 0.125, %v2312_v26 }
 0x473   : > { %v2315_v28 = vsub.f32 %v2305_v19, %v2314_v27 }
 0x475   : > { %v2316_v29 = vmul.f32 %v2315_v28, %v2315_v28 }
 0x477   : > { %v2317_v30 = vsel %vm2219_vm10, %v2316_v29, 0.0 }
 0x478   : > { %v2318_v31 = vrot.slane %v2317_v30, 4 }
 0x47a   : > { %v2319_v32 = vadd.f32 %v2318_v31, %v2317_v30 }
 0x47c   : > { %v2320_v33 = vrot.slane %v2319_v32, 2 }
 0x47e   : > { %v2321_v34 = vadd.f32 %v2320_v33, %v2319_v32 }
 0x480   : > { %v2322_v35 = vrot.slane %v2321_v34, 1 }
 0x482   : > { %v2323_v36 = vadd.f32 %v2322_v35, %v2321_v34 }
 0x484   : > { %v2324_v37 = vmul.f32 0.125, %v2323_v36 }
 0x486   : > { %v2325_v38 = vadd.f32 1e-05, %v2324_v37 }
 0x488   : > { %9314 = vrsqrt.f32 %v2325_v38 }
 0x492   : > { %v9315_v41 = vpop.eup %9314 }
 0x493   : > { %v2327_v43 = vmul.f32 %v9315_v41, %v2315_v28 }
 0x495   : > { %8437 = vmatmul.mubr.msk.f32.vlgmr.msra.gmra.mrb[2].mxu0 %vm2219_vm10, %v2327_v43 }
 0x496   : > { %8918 = vmatpush3.bf16.msra.mxu0 %v8917_v42  ;;  %8447 = vmatprep.mubr.msk.f32.mxu0 %vm9997_vm0, %v9998_v1 }
 0x497   : > { %8919 = vmatprep.subr.bf16.mxu0 %v9996_v0 }
 0x49a   : > { %8921 = vmatpush3.bf16.msra.mxu0 %v8920_v46 }
 0x49b   : > { %8450 = vmatprep.subr.mxu0 %v9998_v1 }
 0x568   : > { %v2403_v49 = vpop.f32.mrb[2].mxu0 }
 0x569   : > { %v2404_v50 = vadd.f32 %v8122_v47, %v2403_v49  ;;  %v8438_v51 = vpop.f32.mrb[3].mxu0 }
 0x56b   : > { %v10696_v52 = vadd.f32 %v2404_v50, %v1940_v48 }
 0x56d   : > { %8448 = vmatmul.mubr.msk.f32.vlgmr.msra.gmra.mrb[4].mxu0 %vm2219_vm10, %v10696_v52 }
 0x56e   : > { %8452 = vmatprep.mubr.msk.f32.mxu0 %vm9997_vm0, %v9998_v1 }
 0x640   : > { %v2483_v54 = vpop.f32.mrb[4].mxu0 }
 0x641   : > { %v10702_v55 = vadd.f32 %v8124_v53, %v2483_v54  ;;  %v8449_v56 = vpop.f32.mrb[5].mxu0 }
 0x643   : > { %2488 = vrot.lane.b32.xlu1 %v10702_v55, %s11357_s23  ;;  %s11367_s23 = smov 72  }
 0x6b5   : > { %v2489_v57 = vpop.permute.xlu1 %2488 }
 0x6b6   : > { %8451 = vmatpush3.xpose.msk.msra.mxu0 %vm2490_vm2, %v2489_v57 }
 0x6b7   : > { %8455 = vmatprep.subr.mxu0 %v9998_v1 }
 0x6b9   : > { %8453 = vmatmul.mubr.msk.f32.vlgmr.msra.gmra.mrb[6].mxu0 %vm2490_vm2, %v10702_v55 }
 0x6ba   : > { %8457 = vmatprep.mubr.msk.f32.mxu0 %vm9997_vm0, %v9998_v1 }
 0x78c   : > { %v2561_v58 = vpop.f32.mrb[6].mxu0 }
 0x78d   : > { %v2565_v59 = vmul.f32 0.35355338, %v2561_v58  ;;  %v8454_v60 = vpop.f32.mrb[7].mxu0 }
 0x78f   : > { %v2566_v61 = vsel %vm2490_vm2, %v2565_v59, -inf }
 0x790   : > { %2567 = vmax.xlane.f32.xlu0 %v2566_v61 }
 0x7a6   : > { %2577 = vrot.lane.b32.xlu0 %v10702_v55, %s11349_s15  ;;  %s11353_s15 = smov 80  }
 0x7aa   : > { %2653 = vrot.lane.b32.xlu0 %v10702_v55, %s11355_s2  ;;  %s11369_s2 = smov 56  }
 0x7ae   : > { %2965 = vrot.lane.b32.xlu0 %v10702_v55, %s11351_s0  ;;  %s11484_s0 = sld [smem:[#allocation47_spill]] }
 0x7b4   : > { %v1947_v37 = vld [vmem:[%s11484_s0 + $0x8] sm:$0xff]  ;;  %v1946_v39 = vld [vmem:[%s11484_s0] sm:$0xff]  ;;  %v1948_v47 = vld [vmem:[%s11484_s0 + $0x10] sm:$0xff] }
 0x81d   : > { %v2568_v62 = vpop.xlane.xlu0 %2567 }
 0x81e   : > { %v2569_v63 = vsub.f32 %v2565_v59, %v2568_v62 }
 0x820   : > { %v2570_v2 = vmul.f32 1.442695, %v2569_v63 }
 0x821   : > { %v2578_v3 = vpop.permute.xlu0 %2577 }
 0x822   : > { %9316 = vpow2.f32 %v2570_v2  ;;  %8456 = vmatpush3.msra.mxu0 %v2578_v3 }
 0x823   : > { %8460 = vmatprep.subr.mxu0 %v9998_v1 }
 0x825   : > { %v2654_v8 = vpop.permute.xlu0 %2653 }
 0x829   : > { %v2966_v11 = vpop.permute.xlu0 %2965 }
 0x82c   : > { %v9317_v4 = vpop.eup %9316 }
 0x82d   : > { %v2572_v5 = vsel %vm2490_vm2, %v9317_v4, 0.0 }
 0x82e   : > { %2573 = vadd.xlane.f32.xlu1 %v2572_v5 }
 0x83f   : > { %2655 = vrot.lane.b32.xlu1 %v10702_v55, %s11359_s28  ;;  %s11363_s28 = smov 104  }
 0x843   : > { %2967 = vrot.lane.b32.xlu1 %v10702_v55, %s11353_s15  ;;  %s11361_s15 = smov 48  }
 0x8bb   : > { %v2574_v6 = vpop.xlane.xlu1 %2573 }
 0x8bc   : > { %9318 = vrcp.f32 %v2574_v6 }
 0x8bf   : > { %v2656_v7 = vpop.permute.xlu1 %2655 }
 0x8c3   : > { %v2968_v9 = vpop.permute.xlu1 %2967 }
 0x8c4   : > { %8481 = vmatpush3.xpose.msk.msra.mxu1 %vm2490_vm2, %v2968_v9 }
 0x8c5   : > { %8490 = vmatprep.subr.mxu1 %v9998_v1 }
 0x8c6   : > { %v9319_v10 = vpop.eup %9318 }
 0x8c7   : > { %v2576_v12 = vmul.f32 %v9319_v10, %v9317_v4  ;;  %8483 = vmatmul.mubr.msk.f32.vlgmr.msra.gmra.mrb[2].mxu1 %vm2490_vm2, %v2966_v11  ;;  %v1949_v4 = vld [vmem:[%s11484_s0 + $0x18] sm:$0xff]  ;;  %s11490_s0 = sld [smem:[#allocation53_spill]] }
 0x8c8   : > { %8492 = vmatprep.mubr.msk.f32.mxu1 %vm9997_vm0, %v9998_v1  ;;  %8491 = vmatpush3.msra.mxu1 %v1948_v47 }
 0x8c9   : > { %8458 = vmatmul.mubr.msk.f32.vlgmr.msra.gmra.mrb[8].mxu0 %vm2490_vm2, %v2576_v12  ;;  %8500 = vmatprep.subr.mxu1 %v9998_v1 }
 0x8ca   : > { %8461 = vmatpush3.xpose.msk.msra.mxu0 %vm2490_vm2, %v2656_v7  ;;  %8462 = vmatprep.mubr.msk.f32.mxu0 %vm9997_vm0, %v9998_v1 }
 0x8cb   : > { %8465 = vmatprep.subr.mxu0 %v9998_v1 }
 0x8cd   : > { %8463 = vmatmul.mubr.msk.f32.vlgmr.msra.gmra.mrb[10].mxu0 %vm2490_vm2, %v2654_v8 }
 0x8ce   : > { %8467 = vmatprep.mubr.msk.f32.mxu0 %vm9997_vm0, %v9998_v1 }
 0x99a   : > { %v3039_v13 = vpop.f32.mrb[2].mxu1 }
 0x99b   : > { %v8484_v14 = vpop.f32.mrb[3].mxu1  ;;  %v3043_v20 = vmul.f32 0.35355338, %v3039_v13 }
 0x99c   : > { %v2649_v15 = vpop.f32.mrb[8].mxu0 }
 0x99d   : > { %v8459_v16 = vpop.f32.mrb[9].mxu0  ;;  %v3044_v22 = vsel %vm2490_vm2, %v3043_v20, -inf }
 0x9a0   : > { %v2727_v17 = vpop.f32.mrb[10].mxu0 }
 0x9a1   : > { %v2731_v18 = vmul.f32 0.35355338, %v2727_v17  ;;  %v8464_v19 = vpop.f32.mrb[11].mxu0 }
 0x9a3   : > { %v2732_v21 = vsel %vm2490_vm2, %v2731_v18, -inf }
 0x9a4   : > { %2733 = vmax.xlane.f32.xlu1 %v2732_v21 }
 0x9a8   : > { %3045 = vmax.xlane.f32.xlu1 %v3044_v22 }
 0xa31   : > { %v2734_v23 = vpop.xlane.xlu1 %2733 }
 0xa32   : > { %v2735_v24 = vsub.f32 %v2731_v18, %v2734_v23 }
 0xa34   : > { %v2736_v25 = vmul.f32 1.442695, %v2735_v24 }
 0xa35   : > { %v3046_v26 = vpop.xlane.xlu1 %3045 }
 0xa36   : > { %9320 = vpow2.f32 %v2736_v25  ;;  %v3047_v27 = vsub.f32 %v3043_v20, %v3046_v26 }
 0xa38   : > { %v3048_v28 = vmul.f32 1.442695, %v3047_v27 }
 0xa3a   : > { %9322 = vpow2.f32 %v3048_v28 }
 0xa40   : > { %v9321_v29 = vpop.eup %9320 }
 0xa41   : > { %v2738_v30 = vsel %vm2490_vm2, %v9321_v29, 0.0 }
 0xa42   : > { %2739 = vadd.xlane.f32.xlu0 %v2738_v30 }
 0xa44   : > { %v9323_v31 = vpop.eup %9322 }
 0xa45   : > { %v3050_v32 = vsel %vm2490_vm2, %v9323_v31, 0.0 }
 0xa46   : > { %3051 = vadd.xlane.f32.xlu1 %v3050_v32 }
 0xa57   : > { %3055 = vrot.lane.b32.xlu1 %v10702_v55, %s11361_s15  ;;  %s11365_s15 = smov 40  }
 0xa58   : > { %2743 = vrot.lane.b32.xlu0 %v10702_v55, %s11369_s2  ;;  %s11489_s2 = sld [smem:[#allocation51_spill]] }
 0xa5c   : > { %3207 = vrot.lane.b32.xlu0 %v10702_v55, %s11367_s23  ;;  %s11487_s23 = sld [smem:[#allocation52_spill]] }
 0xa60   : > { %3205 = vrot.lane.b32.xlu0 %v10702_v55, %s11363_s28  ;;  %s11485_s28 = sld [smem:[#allocation48_spill]] }
 0xa62   : > { %v1957_v30 = vld [vmem:[%s11487_s23] sm:$0xff]  ;;  %v1959_v32 = vld [vmem:[%s11487_s23 + $0x10] sm:$0xff] }
 0xa66   : > { %v8142_v13 = vld [vmem:[%s11485_s28] ss:$0 sm:$0xff]  ;;  %s11488_s28 = sld [smem:[#allocation49_spill]] }
 0xacf   : > { %v2740_v33 = vpop.xlane.xlu0 %2739 }
 0xad0   : > { %9324 = vrcp.f32 %v2740_v33 }
 0xad3   : > { %v2744_v34 = vpop.permute.xlu0 %2743  ;;  %v3052_v38 = vpop.xlane.xlu1 %3051 }
 0xad4   : > { %8466 = vmatpush3.msra.mxu0 %v2744_v34  ;;  %9326 = vrcp.f32 %v3052_v38  ;;  %v1960_v34 = vld [vmem:[%s11487_s23 + $0x18] sm:$0xff] }
 0xad5   : > { %8470 = vmatprep.subr.mxu0 %v9998_v1 }
 0xad7   : > { %v3056_v43 = vpop.permute.xlu1 %3055  ;;  %v3208_v45 = vpop.permute.xlu0 %3207 }
 0xada   : > { %v9325_v35 = vpop.eup %9324 }
 0xadb   : > { %v2742_v36 = vmul.f32 %v9325_v35, %v9321_v29  ;;  %v3206_v46 = vpop.permute.xlu0 %3205  ;;  %v8932_v35 = vpack.c.bf16 %v1960_v34, %v1959_v32 }
 0xadd   : > { %8468 = vmatmul.mubr.msk.f32.vlgmr.msra.gmra.mrb[12].mxu0 %vm2490_vm2, %v2742_v36  ;;  %v1961_v36 = vld [vmem:[%s11487_s23 + $0x20] sm:$0xff] }
 0xade   : > { %8471 = vmatpush3.msra.mxu0 %v1947_v37  ;;  %8472 = vmatprep.mubr.msk.f32.mxu0 %vm9997_vm0, %v9998_v1  ;;  %v9327_v42 = vpop.eup %9326  ;;  %v1962_v37 = vld [vmem:[%s11487_s23 + $0x28] sm:$0xff] }
 0xadf   : > { %8475 = vmatprep.subr.mxu0 %v9998_v1  ;;  %v3054_v44 = vmul.f32 %v9327_v42, %v9323_v31  ;;  %v1958_v31 = vld [vmem:[%s11487_s23 + $0x8] sm:$0xff]  ;;  %v8935_v38 = vpack.c.bf16 %v1962_v37, %v1961_v36 }
 0xae0   : > { %v8929_v33 = vpack.c.bf16 %v1958_v31, %v1957_v30 }
 0xbb0   : > { %v2815_v40 = vpop.f32.mrb[12].mxu0 }
 0xbb1   : > { %v8469_v41 = vpop.f32.mrb[13].mxu0  ;;  %8473 = vmatmul.mubr.msk.f32.vlgmr.msra.gmra.mrb[14].mxu0 %vm2490_vm2, %v2815_v40 }
 0xbb2   : > { %8476 = vmatpush3.msra.mxu0 %v1946_v39  ;;  %8477 = vmatprep.mubr.msk.f32.mxu0 %vm9997_vm0, %v9998_v1  ;;  %v3467_v41 = vlaneseq }
 0xbb3   : > { %8485 = vmatprep.subr.mxu0 %v9998_v1 }
 0xbb5   : > { %8478 = vmatmul.mubr.msk.f32.vlgmr.msra.gmra.mrb[16].mxu0 %vm2490_vm2, %v2649_v15 }
 0xbb6   : > { %8486 = vmatpush3.msra.mxu0 %v3056_v43  ;;  %8487 = vmatprep.mubr.msk.f32.mxu0 %vm9997_vm0, %v9998_v1  ;;  %v3468_v43 = vshrl.u32 %v3467_v41, 7 }
 0xbb7   : > { %8495 = vmatprep.subr.mxu0 %v9998_v1 }
 0xbb9   : > { %8488 = vmatmul.mubr.msk.f32.vlgmr.msra.gmra.mrb[18].mxu0 %vm2490_vm2, %v3054_v44  ;;  %v10810_v44 = vsub.s32 0, %v3468_v43 }
 0xbba   : > { %8497 = vmatprep.mubr.msk.f32.mxu0 %vm9997_vm0, %v9998_v1 }
 0xbbd   : > { %8496 = vmatpush3.xpose.msk.msra.mxu0 %vm2490_vm2, %v3208_v45  ;;  %v1951_v45 = vld [vmem:[%s11488_s28] sm:$0x3]  ;;  %s11491_s28 = sld [smem:[#allocation55_spill]] }
 0xbbe   : > { %8505 = vmatprep.subr.mxu0 %v9998_v1  ;;  %v3470_v47 = vrot.slane %v1951_v45, %v10810_v44 }
 0xbc0   : > { %8498 = vmatmul.mubr.msk.f32.vlgmr.msra.gmra.mrb[20].mxu0 %vm2490_vm2, %v3206_v46  ;;  %v10813_v46 = vsub.s32 1, %v3468_v43 }
 0xbc1   : > { %8507 = vmatprep.mubr.msk.f32.mxu0 %vm9997_vm0, %v9998_v1  ;;  %8506 = vmatpush3.msra.mxu0 %v1949_v4 }
 0xbc2   : > { %8928 = vmatprep.subr.bf16.mxu0 %v9996_v0 }
 0xc84   : > { %v2888_v48 = vpop.f32.mrb[14].mxu0 }
 0xc85   : > { %v8474_v49 = vpop.f32.mrb[15].mxu0 }
 0xc88   : > { %v2961_v50 = vpop.f32.mrb[16].mxu0 }
 0xc89   : > { %v2962_v51 = vadd.f32 %v2961_v50, %v2888_v48  ;;  %v8479_v53 = vpop.f32.mrb[17].mxu0  ;;  %v3475_v50 = vrot.slane %v1951_v45, %v10813_v46 }
 0xc8c   : > { %v3127_v54 = vpop.f32.mrb[18].mxu0 }
 0xc8d   : > { %v8489_v56 = vpop.f32.mrb[19].mxu0  ;;  %8493 = vmatmul.mubr.msk.f32.vlgmr.msra.gmra.mrb[4].mxu1 %vm2490_vm2, %v3127_v54  ;;  %v1963_v54 = vld [vmem:[%s11487_s23 + $0x30] sm:$0xff] }
 0xc8e   : > { %8502 = vmatprep.mubr.msk.f32.mxu1 %vm9997_vm0, %v9998_v1  ;;  %v1964_v56 = vld [vmem:[%s11487_s23 + $0x38] sm:$0xff] }
 0xc93   : > { %v3279_v57 = vpop.f32.mrb[20].mxu0 }
 0xc94   : > { %v3283_v58 = vmul.f32 0.35355338, %v3279_v57  ;;  %v8499_v59 = vpop.f32.mrb[21].mxu0  ;;  %v8938_v57 = vpack.c.bf16 %v1964_v56, %v1963_v54  ;;  %v1973_v54 = vld [vmem:[%s11498_s6 + $0x8] sm:$0xff] }
 0xc96   : > { %v3284_v60 = vsel %vm2490_vm2, %v3283_v58, -inf }
 0xc97   : > { %3285 = vmax.xlane.f32.xlu1 %v3284_v60 }
 0xd24   : > { %v3286_v61 = vpop.xlane.xlu1 %3285 }
 0xd25   : > { %v3287_v62 = vsub.f32 %v3283_v58, %v3286_v61  ;;  %v8143_v58 = vld [vmem:[%s11489_s2] ss:$0 sm:$0xff]  ;;  %s11492_s2 = sld [smem:[#allocation54_spill]] }
 0xd27   : > { %v3288_v63 = vmul.f32 1.442695, %v3287_v62 }
 0xd29   : > { %9328 = vpow2.f32 %v3288_v63  ;;  %v8145_v63 = vld [vmem:[%s11490_s0] ss:$0 sm:$0xff]  ;;  %s11493_s0 = smov 88  }
 0xd33   : > { %v9329_v2 = vpop.eup %9328 }
 0xd34   : > { %v3290_v3 = vsel %vm2490_vm2, %v9329_v2, 0.0 }
 0xd35   : > { %3291 = vadd.xlane.f32.xlu0 %v3290_v3 }
 0xd4b   : > { %3295 = vrot.lane.b32.xlu0 %v10702_v55, %s11365_s15  ;;  %s11486_s15 = sld [smem:[#allocation50_spill]] }
 0xd51   : > { %v1952_v25 = vld [vmem:[%s11486_s15] sm:$0xff]  ;;  %v1953_v26 = vld [vmem:[%s11486_s15 + $0x8] sm:$0xff]  ;;  %v1955_v28 = vld [vmem:[%s11486_s15 + $0x18] sm:$0xff] }
 0xd52   : > { %v8923_v27 = vpack.c.bf16 %v1953_v26, %v1952_v25 }
 0xd60   : > { %v3200_v5 = vpop.f32.mrb[4].mxu1 }
 0xd61   : > { %v3204_v6 = vadd.f32 %v3200_v5, %v2962_v51  ;;  %v8494_v7 = vpop.f32.mrb[5].mxu1 }
 0xdc2   : > { %v3292_v8 = vpop.xlane.xlu0 %3291 }
 0xdc3   : > { %9330 = vrcp.f32 %v3292_v8 }
 0xdc6   : > { %v3296_v9 = vpop.permute.xlu0 %3295 }
 0xdc7   : > { %8501 = vmatpush3.msra.mxu1 %v3296_v9 }
 0xdc8   : > { %8922 = vmatprep.subr.bf16.mxu1 %v9996_v0 }
 0xdcd   : > { %v9331_v10 = vpop.eup %9330 }
 0xdce   : > { %v3294_v11 = vmul.f32 %v9331_v10, %v9329_v2 }
 0xdd0   : > { %8503 = vmatmul.mubr.msk.f32.vlgmr.msra.gmra.mrb[6].mxu1 %vm2490_vm2, %v3294_v11 }
 0xdd1   : > { %8518 = vmatprep.mubr.msk.f32.mxu1 %vm9997_vm0, %v9998_v1  ;;  %8924 = vmatpush3.bf16.msra.mxu1 %v8923_v27  ;;  %v8147_v27 = vld [vmem:[#allocation6] ss:$0 sm:$0xff] }
 0xdd2   : > { %8925 = vmatprep.subr.bf16.mxu1 %v9996_v0 }
 0xea3   : > { %v3367_v55 = vpop.f32.mrb[6].mxu1 }
 0xea4   : > { %v8504_v12 = vpop.f32.mrb[7].mxu1  ;;  %8508 = vmatmul.mubr.msk.f32.vlgmr.msra.gmra.mrb[22].mxu0 %vm2490_vm2, %v3367_v55  ;;  %v1967_v55 = vld [vmem:[%s11491_s28] sm:$0xff] }
 0xea5   : > { %8537 = vmatprep.mubr.msk.f32.mxu0 %vm9997_vm0, %v9998_v1  ;;  %8930 = vmatpush3.bf16.msra.mxu0 %v8929_v33  ;;  %v1968_v12 = vld [vmem:[%s11491_s28 + $0x8] sm:$0xff] }
 0xea6   : > { %8931 = vmatprep.subr.bf16.mxu0 %v9996_v0 }
 0xea9   : > { %8933 = vmatpush3.bf16.msra.mxu0 %v8932_v35 }
 0xeaa   : > { %8934 = vmatprep.subr.bf16.mxu0 %v9996_v0 }
 0xead   : > { %8936 = vmatpush3.bf16.msra.mxu0 %v8935_v38 }
 0xeae   : > { %8937 = vmatprep.subr.bf16.mxu0 %v9996_v0 }
 0xeb1   : > { %8939 = vmatpush3.bf16.msra.mxu0 %v8938_v57 }
 0xeb2   : > { %8556 = vmatprep.subr.mxu0 %v9998_v1 }
 0xf77   : > { %v3440_v14 = vpop.f32.mrb[22].mxu0 }
 0xf78   : > { %v3444_v15 = vadd.f32 %v3440_v14, %v3204_v6  ;;  %v8509_v16 = vpop.f32.mrb[23].mxu0  ;;  %v1969_v14 = vld [vmem:[%s11491_s28 + $0x10] sm:$0xff] }
 0xf7a   : > { %v3451_v17 = vadd.f32 %v8142_v13, %v3444_v15  ;;  %v8941_v13 = vpack.c.bf16 %v1968_v12, %v1967_v55  ;;  %v1970_v15 = vld [vmem:[%s11491_s28 + $0x18] sm:$0xff] }
 0xf7b   : > { %v8944_v16 = vpack.c.bf16 %v1970_v15, %v1969_v14 }
 0xf7c   : > { %v3452_v18 = vadd.f32 %v3451_v17, %v10696_v52  ;;  %v1954_v52 = vld [vmem:[%s11486_s15 + $0x10] sm:$0xff]  ;;  %s11504_s15 = smov 40  }
 0xf7d   : > { %v8926_v29 = vpack.c.bf16 %v1955_v28, %v1954_v52 }
 0xf7e   : > { %v3453_v19 = vsel %vm2219_vm10, %v3452_v18, 0.0 }
 0xf7f   : > { %3454 = vadd.xlane.f32.xlu1 %v3453_v19  ;;  %8927 = vmatpush3.bf16.msra.mxu1 %v8926_v29 }
 0xf80   : > { %8940 = vmatprep.subr.bf16.mxu1 %v9996_v0 }
0x100c   : > { %v3455_v20 = vpop.xlane.xlu1 %3454 }
0x100d   : > { %v3457_v21 = vmul.f32 0.03125, %v3455_v20  ;;  %v1966_v20 = vld [vmem:[%s11492_s2] sm:$0x3]  ;;  %s11494_s2 = smov 96  }
0x100f   : > { %v3458_v22 = vsub.f32 %v3452_v18, %v3457_v21  ;;  %v3653_v21 = vrot.slane %v1966_v20, %v10810_v44 }
0x1011   : > { %v3459_v23 = vmul.f32 %v3458_v22, %v3458_v22 }
0x1013   : > { %v3460_v24 = vsel %vm2219_vm10, %v3459_v23, 0.0 }
0x1014   : > { %3461 = vadd.xlane.f32.xlu1 %v3460_v24  ;;  %v3658_v24 = vrot.slane %v1966_v20, %v10813_v46 }
0x10a1   : > { %v3462_v39 = vpop.xlane.xlu1 %3461 }
0x10a2   : > { %v3463_v40 = vmul.f32 0.03125, %v3462_v39 }
0x10a4   : > { %v3464_v42 = vadd.f32 1e-05, %v3463_v40 }
0x10a6   : > { %9332 = vrsqrt.f32 %v3464_v42 }
0x10b0   : > { %v9333_v48 = vpop.eup %9332 }
0x10b1   : > { %v3466_v49 = vmul.f32 %v9333_v48, %v3458_v22 }
0x10b3   : > { %v3471_v51 = vmul.f32 %v3470_v47, %v3466_v49 }
0x10b5   : > { %v3476_v53 = vadd.f32 %v3475_v50, %v3471_v51 }
0x10b7   : > { %8519 = vmatmul.mubr.msk.f32.vlgmr.msra.gmra.mrb[8].mxu1 %vm2219_vm10, %v3476_v53 }
0x10b8   : > { %8548 = vmatprep.mubr.msk.f32.mxu1 %vm9997_vm0, %v9998_v1  ;;  %8942 = vmatpush3.bf16.msra.mxu1 %v8941_v13 }
0x10b9   : > { %8943 = vmatprep.subr.bf16.mxu1 %v9996_v0 }
0x10bc   : > { %8945 = vmatpush3.bf16.msra.mxu1 %v8944_v16 }
0x10bd   : > { %8551 = vmatprep.subr.mxu1 %v9998_v1 }
0x118a   : > { %v3552_v59 = vpop.f32.mrb[8].mxu1 }
0x118b   : > { %v3553_v60 = vadd.f32 %v8143_v58, %v3552_v59  ;;  %v8520_v61 = vpop.f32.mrb[9].mxu1 }
0x118d   : > { %v3556_v62 = vmax.f32 %v3553_v60, 0.0 }
0x118f   : > { %8538 = vmatmul.mubr.msk.f32.vlgmr.msra.gmra.mrb[24].mxu0 %vm2221_vm13, %v3556_v62 }
0x1190   : > { %8558 = vmatprep.mubr.msk.f32.mxu0 %vm9997_vm0, %v9998_v1 }
0x1262   : > { %v3632_v2 = vpop.f32.mrb[24].mxu0 }
0x1263   : > { %v3633_v3 = vadd.f32 %v8145_v63, %v3632_v2  ;;  %v8539_v4 = vpop.f32.mrb[25].mxu0  ;;  %v1972_v2 = vld [vmem:[%s11498_s6] sm:$0xff] }
0x1265   : > { %v3636_v5 = vadd.f32 %v3633_v3, %v3476_v53 }
0x1267   : > { %v3637_v6 = vsel %vm2219_vm10, %v3636_v5, 0.0 }
0x1268   : > { %3638 = vadd.xlane.f32.xlu1 %v3637_v6 }
0x12f5   : > { %v3639_v7 = vpop.xlane.xlu1 %3638 }
0x12f6   : > { %v3640_v8 = vmul.f32 0.03125, %v3639_v7 }
0x12f8   : > { %v3641_v9 = vsub.f32 %v3636_v5, %v3640_v8 }
0x12fa   : > { %v3642_v10 = vmul.f32 %v3641_v9, %v3641_v9 }
0x12fc   : > { %v3643_v11 = vsel %vm2219_vm10, %v3642_v10, 0.0 }
0x12fd   : > { %3644 = vadd.xlane.f32.xlu1 %v3643_v11 }
0x138a   : > { %v3645_v17 = vpop.xlane.xlu1 %3644 }
0x138b   : > { %v3646_v18 = vmul.f32 0.03125, %v3645_v17 }
0x138d   : > { %v3647_v19 = vadd.f32 1e-05, %v3646_v18 }
0x138f   : > { %9334 = vrsqrt.f32 %v3647_v19 }
0x1399   : > { %v9335_v22 = vpop.eup %9334 }
0x139a   : > { %v3649_v23 = vmul.f32 %v9335_v22, %v3641_v9 }
0x139c   : > { %v3654_v25 = vmul.f32 %v3653_v21, %v3649_v23 }
0x139e   : > { %v10839_v26 = vadd.f32 %v3658_v24, %v3654_v25 }
0x13a0   : > { %8549 = vmatmul.mubr.msk.f32.vlgmr.msra.gmra.mrb[10].mxu1 %vm2219_vm10, %v10839_v26 }
0x13a1   : > { %8553 = vmatprep.mubr.msk.f32.mxu1 %vm9997_vm0, %v9998_v1 }
0x1473   : > { %v3735_v52 = vpop.f32.mrb[10].mxu1 }
0x1474   : > { %v10845_v28 = vadd.f32 %v8147_v27, %v3735_v52  ;;  %v8550_v29 = vpop.f32.mrb[11].mxu1 }
0x1475   : > { %v1974_v29 = vld [vmem:[%s11498_s6 + $0x10] sm:$0xff] }
0x1476   : > { %3906 = vrot.lane.b32.xlu0 %v10845_v28, %s11493_s0  ;;  %3740 = vrot.lane.b32.xlu1 %v10845_v28, %s11494_s2 }
0x147a   : > { %3904 = vrot.lane.b32.xlu0 %v10845_v28, %s11495_s1 }
0x14e8   : > { %v3741_v30 = vpop.permute.xlu1 %3740  ;;  %v3907_v31 = vpop.permute.xlu0 %3906 }
0x14e9   : > { %8552 = vmatpush3.xpose.msk.msra.mxu1 %vm2490_vm2, %v3741_v30 }
0x14ea   : > { %8561 = vmatprep.subr.mxu1 %v9998_v1 }
0x14ec   : > { %8554 = vmatmul.mubr.msk.f32.vlgmr.msra.gmra.mrb[12].mxu1 %vm2490_vm2, %v10845_v28  ;;  %v3905_v32 = vpop.permute.xlu0 %3904 }
0x14ed   : > { %8562 = vmatpush3.xpose.msk.msra.mxu1 %vm2490_vm2, %v3907_v31  ;;  %8563 = vmatprep.mubr.msk.f32.mxu1 %vm9997_vm0, %v9998_v1 }
0x14ee   : > { %8571 = vmatprep.subr.mxu1 %v9998_v1 }
0x14f0   : > { %8564 = vmatmul.mubr.msk.f32.vlgmr.msra.gmra.mrb[14].mxu1 %vm2490_vm2, %v3905_v32 }
0x14f1   : > { %8573 = vmatprep.mubr.msk.f32.mxu1 %vm9997_vm0, %v9998_v1  ;;  %8572 = vmatpush3.msra.mxu1 %v1973_v54 }
0x14f2   : > { %8581 = vmatprep.subr.mxu1 %v9998_v1 }
0x15bf   : > { %v3812_v33 = vpop.f32.mrb[12].mxu1 }
0x15c0   : > { %v3816_v34 = vmul.f32 0.35355338, %v3812_v33  ;;  %v8555_v35 = vpop.f32.mrb[13].mxu1 }
0x15c2   : > { %v3817_v36 = vsel %vm2490_vm2, %v3816_v34, -inf }
0x15c3   : > { %3818 = vmax.xlane.f32.xlu0 %v3817_v36  ;;  %v3978_v37 = vpop.f32.mrb[14].mxu1 }
0x15c4   : > { %v3982_v38 = vmul.f32 0.35355338, %v3978_v37  ;;  %v8565_v39 = vpop.f32.mrb[15].mxu1 }
0x15c6   : > { %v3983_v40 = vsel %vm2490_vm2, %v3982_v38, -inf }
0x15c7   : > { %3984 = vmax.xlane.f32.xlu1 %v3983_v40 }
0x15d8   : > { %3994 = vrot.lane.b32.xlu1 %v10845_v28, %s11496_s3 }
0x15dc   : > { %4218 = vrot.lane.b32.xlu1 %v10845_v28, %s11497_s4 }
0x1650   : > { %v3819_v41 = vpop.xlane.xlu0 %3818 }
0x1651   : > { %v3820_v42 = vsub.f32 %v3816_v34, %v3819_v41 }
0x1653   : > { %v3821_v43 = vmul.f32 1.442695, %v3820_v42  ;;  %v1975_v42 = vld [vmem:[%s11498_s6 + $0x18] sm:$0xff]  ;;  %s11505_s6 = sld [smem:[#allocation58_spill]] }
0x1654   : > { %v3985_v45 = vpop.xlane.xlu1 %3984 }
0x1655   : > { %9336 = vpow2.f32 %v3821_v43  ;;  %v3986_v47 = vsub.f32 %v3982_v38, %v3985_v45 }
0x1657   : > { %v3987_v48 = vmul.f32 1.442695, %v3986_v47 }
0x1658   : > { %v3995_v61 = vpop.permute.xlu1 %3994 }
0x1659   : > { %9338 = vpow2.f32 %v3987_v48 }
0x165c   : > { %v4219_v6 = vpop.permute.xlu1 %4218 }
0x165f   : > { %v9337_v49 = vpop.eup %9336 }
0x1660   : > { %v3823_v50 = vsel %vm2490_vm2, %v9337_v49, 0.0 }
0x1661   : > { %3824 = vadd.xlane.f32.xlu0 %v3823_v50 }
0x1663   : > { %v9339_v51 = vpop.eup %9338 }
0x1664   : > { %v3989_v53 = vsel %vm2490_vm2, %v9339_v51, 0.0 }
0x1665   : > { %3990 = vadd.xlane.f32.xlu0 %v3989_v53  ;;  %v8165_v53 = vld [vmem:[#allocation7] ss:$0 sm:$0xff] }
0x167b   : > { %3828 = vrot.lane.b32.xlu0 %v10845_v28, %s11499_s8 }
0x167f   : > { %4216 = vrot.lane.b32.xlu0 %v10845_v28, %s11500_s9 }
0x16ee   : > { %v3825_v56 = vpop.xlane.xlu0 %3824 }
0x16ef   : > { %9340 = vrcp.f32 %v3825_v56 }
0x16f2   : > { %v3991_v57 = vpop.xlane.xlu0 %3990 }
0x16f3   : > { %9342 = vrcp.f32 %v3991_v57 }
0x16f6   : > { %v3829_v58 = vpop.permute.xlu0 %3828 }
0x16f7   : > { %8557 = vmatpush3.msra.mxu0 %v3829_v58 }
0x16f8   : > { %8566 = vmatprep.subr.mxu0 %v9998_v1 }
0x16f9   : > { %v9341_v59 = vpop.eup %9340 }
0x16fa   : > { %v3827_v60 = vmul.f32 %v9341_v59, %v9337_v49  ;;  %v4217_v8 = vpop.permute.xlu0 %4216 }
0x16fc   : > { %8559 = vmatmul.mubr.msk.f32.vlgmr.msra.gmra.mrb[26].mxu0 %vm2490_vm2, %v3827_v60 }
0x16fd   : > { %v9343_v62 = vpop.eup %9342  ;;  %8567 = vmatpush3.msra.mxu0 %v3995_v61  ;;  %8568 = vmatprep.mubr.msk.f32.mxu0 %vm9997_vm0, %v9998_v1 }
0x16fe   : > { %v3993_v63 = vmul.f32 %v9343_v62, %v9339_v51  ;;  %8576 = vmatprep.subr.mxu0 %v9998_v1 }
0x1700   : > { %8569 = vmatmul.mubr.msk.f32.vlgmr.msra.gmra.mrb[28].mxu0 %vm2490_vm2, %v3993_v63 }
0x1701   : > { %8578 = vmatprep.mubr.msk.f32.mxu0 %vm9997_vm0, %v9998_v1  ;;  %8577 = vmatpush3.msra.mxu0 %v1972_v2 }
0x1702   : > { %8586 = vmatprep.subr.mxu0 %v9998_v1 }
0x17cf   : > { %v3900_v3 = vpop.f32.mrb[26].mxu0 }
0x17d0   : > { %v8560_v4 = vpop.f32.mrb[27].mxu0  ;;  %8579 = vmatmul.mubr.msk.f32.vlgmr.msra.gmra.mrb[30].mxu0 %vm2490_vm2, %v3900_v3 }
0x17d1   : > { %8588 = vmatprep.mubr.msk.f32.mxu0 %vm9997_vm0, %v9998_v1  ;;  %v1978_v4 = vld [vmem:[%s11505_s6] sm:$0xff] }
0x17d3   : > { %v4066_v5 = vpop.f32.mrb[28].mxu0 }
0x17d4   : > { %v8570_v7 = vpop.f32.mrb[29].mxu0  ;;  %8574 = vmatmul.mubr.msk.f32.vlgmr.msra.gmra.mrb[16].mxu1 %vm2490_vm2, %v4066_v5  ;;  %v1979_v5 = vld [vmem:[%s11505_s6 + $0x8] sm:$0xff] }
0x17d5   : > { %8582 = vmatpush3.xpose.msk.msra.mxu1 %vm2490_vm2, %v4219_v6  ;;  %8583 = vmatprep.mubr.msk.f32.mxu1 %vm9997_vm0, %v9998_v1  ;;  %v8947_v6 = vpack.c.bf16 %v1979_v5, %v1978_v4  ;;  %v1981_v7 = vld [vmem:[%s11505_s6 + $0x18] sm:$0xff] }
0x17d6   : > { %8591 = vmatprep.subr.mxu1 %v9998_v1 }
0x17d8   : > { %8584 = vmatmul.mubr.msk.f32.vlgmr.msra.gmra.mrb[18].mxu1 %vm2490_vm2, %v4217_v8 }
0x17d9   : > { %8593 = vmatprep.mubr.msk.f32.mxu1 %vm9997_vm0, %v9998_v1  ;;  %8592 = vmatpush3.msra.mxu1 %v1974_v29  ;;  %v1990_v29 = vld [vmem:[%s11506_s16 + $0x38] sm:$0xff] }
0x17da   : > { %8601 = vmatprep.subr.mxu1 %v9998_v1 }
0x18a3   : > { %v4212_v9 = vpop.f32.mrb[30].mxu0 }
0x18a4   : > { %v8580_v10 = vpop.f32.mrb[31].mxu0 }
0x18a5   : > { %v1984_v10 = vld [vmem:[%s11506_s16 + $0x8] sm:$0xff] }
0x18a7   : > { %v4139_v11 = vpop.f32.mrb[16].mxu1 }
0x18a8   : > { %v4213_v55 = vadd.f32 %v4212_v9, %v4139_v11  ;;  %v8575_v12 = vpop.f32.mrb[17].mxu1  ;;  %v1983_v9 = vld [vmem:[%s11506_s16] sm:$0xff]  ;;  %v1985_v11 = vld [vmem:[%s11506_s16 + $0x10] sm:$0xff] }
0x18a9   : > { %v1986_v12 = vld [vmem:[%s11506_s16 + $0x18] sm:$0xff] }
0x18ab   : > { %v4290_v13 = vpop.f32.mrb[18].mxu1 }
0x18ac   : > { %v4294_v14 = vmul.f32 0.35355338, %v4290_v13  ;;  %v8585_v15 = vpop.f32.mrb[19].mxu1  ;;  %v8956_v13 = vpack.c.bf16 %v1986_v12, %v1985_v11 }
0x18ad   : > { %v1988_v15 = vld [vmem:[%s11506_s16 + $0x28] sm:$0xff] }
0x18ae   : > { %v4295_v16 = vsel %vm2490_vm2, %v4294_v14, -inf }
0x18af   : > { %4296 = vmax.xlane.f32.xlu1 %v4295_v16 }
0x18c0   : > { %4458 = vrot.lane.b32.xlu1 %v10845_v28, %s11501_s12 }
0x18c4   : > { %4456 = vrot.lane.b32.xlu1 %v10845_v28, %s11502_s13 }
0x193c   : > { %v4297_v17 = vpop.xlane.xlu1 %4296 }
0x193d   : > { %v4298_v18 = vsub.f32 %v4294_v14, %v4297_v17  ;;  %v1987_v14 = vld [vmem:[%s11506_s16 + $0x20] sm:$0xff] }
0x193e   : > { %v8959_v16 = vpack.c.bf16 %v1988_v15, %v1987_v14 }
0x193f   : > { %v4299_v19 = vmul.f32 1.442695, %v4298_v18 }
0x1940   : > { %v4459_v25 = vpop.permute.xlu1 %4458 }
0x1941   : > { %9344 = vpow2.f32 %v4299_v19 }
0x1944   : > { %v4457_v52 = vpop.permute.xlu1 %4456 }
0x194b   : > { %v9345_v20 = vpop.eup %9344 }
0x194c   : > { %v4301_v21 = vsel %vm2490_vm2, %v9345_v20, 0.0 }
0x194d   : > { %4302 = vadd.xlane.f32.xlu0 %v4301_v21 }
0x1963   : > { %4306 = vrot.lane.b32.xlu0 %v10845_v28, %s11503_s14 }
0x19da   : > { %v4303_v22 = vpop.xlane.xlu0 %4302 }
0x19db   : > { %9346 = vrcp.f32 %v4303_v22 }
0x19de   : > { %v4307_v23 = vpop.permute.xlu0 %4306 }
0x19df   : > { %8587 = vmatpush3.msra.mxu0 %v4307_v23 }
0x19e0   : > { %8596 = vmatprep.subr.mxu0 %v9998_v1 }
0x19e5   : > { %v9347_v24 = vpop.eup %9346 }
0x19e6   : > { %v4305_v27 = vmul.f32 %v9347_v24, %v9345_v20  ;;  %v1977_v20 = vld [vmem:[#allocation9] sm:$0x3] }
0x19e7   : > { %v4720_v21 = vrot.slane %v1977_v20, %v10810_v44  ;;  %v4725_v24 = vrot.slane %v1977_v20, %v10813_v46 }
0x19e8   : > { %8589 = vmatmul.mubr.msk.f32.vlgmr.msra.gmra.mrb[32].mxu0 %vm2490_vm2, %v4305_v27 }
0x19e9   : > { %8597 = vmatpush3.xpose.msk.msra.mxu0 %vm2490_vm2, %v4459_v25  ;;  %8598 = vmatprep.mubr.msk.f32.mxu0 %vm9997_vm0, %v9998_v1 }
0x19ea   : > { %8606 = vmatprep.subr.mxu0 %v9998_v1 }
0x19ec   : > { %8599 = vmatmul.mubr.msk.f32.vlgmr.msra.gmra.mrb[34].mxu0 %vm2490_vm2, %v4457_v52  ;;  %v1989_v52 = vld [vmem:[%s11506_s16 + $0x30] sm:$0xff]  ;;  %s11508_s16 = sld [smem:[#allocation64_spill]] }
0x19ed   : > { %8608 = vmatprep.mubr.msk.f32.mxu0 %vm9997_vm0, %v9998_v1  ;;  %8607 = vmatpush3.msra.mxu0 %v1975_v42 }
0x19ee   : > { %8952 = vmatprep.subr.bf16.mxu0 %v9996_v0 }
0x19f2   : > { %v1998_v4 = vld [vmem:[%s11508_s16] sm:$0xff]  ;;  %v1999_v5 = vld [vmem:[%s11508_s16 + $0x8] sm:$0xff]  ;;  %v2005_v12 = vld [vmem:[%s11508_s16 + $0x38] sm:$0xff] }
0x19f3   : > { %v2006_v14 = vld [vmem:[%s11508_s16 + $0x40] sm:$0xff]  ;;  %v2007_v15 = vld [vmem:[%s11508_s16 + $0x48] sm:$0xff] }
0x19f4   : > { %v2010_v20 = vld [vmem:[%s11508_s16 + $0x60] sm:$0xff] }
0x1abb   : > { %v4378_v30 = vpop.f32.mrb[32].mxu0 }
0x1abc   : > { %v8590_v31 = vpop.f32.mrb[33].mxu0  ;;  %8594 = vmatmul.mubr.msk.f32.vlgmr.msra.gmra.mrb[20].mxu1 %vm2490_vm2, %v4378_v30  ;;  %v8962_v30 = vpack.c.bf16 %v1990_v29, %v1989_v52  ;;  %v2015_v52 = vld [vmem:[%s11508_s16 + $0x88] sm:$0xff] }
0x1abd   : > { %8603 = vmatprep.mubr.msk.f32.mxu1 %vm9997_vm0, %v9998_v1  ;;  %v8166_v31 = vld [vmem:[#allocation10] ss:$0 sm:$0xff] }
0x1abf   : > { %v4530_v32 = vpop.f32.mrb[34].mxu0 }
0x1ac0   : > { %v4534_v33 = vmul.f32 0.35355338, %v4530_v32  ;;  %v8600_v34 = vpop.f32.mrb[35].mxu0 }
0x1ac2   : > { %v4535_v35 = vsel %vm2490_vm2, %v4534_v33, -inf }
0x1ac3   : > { %4536 = vmax.xlane.f32.xlu0 %v4535_v35 }
0x1ad9   : > { %4546 = vrot.lane.b32.xlu0 %v10845_v28, %s11504_s15 }
0x1b50   : > { %v4537_v36 = vpop.xlane.xlu0 %4536 }
0x1b51   : > { %v4538_v37 = vsub.f32 %v4534_v33, %v4537_v36  ;;  %v8168_v36 = vld [vmem:[#allocation12] ss:$0 sm:$0xff] }
0x1b53   : > { %v4539_v38 = vmul.f32 1.442695, %v4538_v37 }
0x1b54   : > { %v4547_v39 = vpop.permute.xlu0 %4546 }
0x1b55   : > { %9348 = vpow2.f32 %v4539_v38  ;;  %8602 = vmatpush3.msra.mxu1 %v4547_v39 }
0x1b56   : > { %8946 = vmatprep.subr.bf16.mxu1 %v9996_v0 }
0x1b5f   : > { %v9349_v40 = vpop.eup %9348 }
0x1b60   : > { %v4541_v41 = vsel %vm2490_vm2, %v9349_v40, 0.0 }
0x1b61   : > { %4542 = vadd.xlane.f32.xlu1 %v4541_v41 }
0x1b8f   : > { %v4451_v43 = vpop.f32.mrb[20].mxu1 }
0x1b90   : > { %v4455_v45 = vadd.f32 %v4451_v43, %v4213_v55  ;;  %v8595_v47 = vpop.f32.mrb[21].mxu1  ;;  %v8953_v55 = vpack.c.bf16 %v1984_v10, %v1983_v9  ;;  %v2002_v9 = vld [vmem:[%s11508_s16 + $0x20] sm:$0xff]  ;;  %v2003_v10 = vld [vmem:[%s11508_s16 + $0x28] sm:$0xff] }
0x1b91   : > { %v8977_v11 = vpack.c.bf16 %v2003_v10, %v2002_v9  ;;  %v8172_v9 = vld [vmem:[%s11512_s17] ss:$0 sm:$0xff]  ;;  %s11514_s17 = sld [smem:[#allocation67_spill]] }
0x1bee   : > { %v4543_v28 = vpop.xlane.xlu1 %4542 }
0x1bef   : > { %9350 = vrcp.f32 %v4543_v28 }
0x1bf9   : > { %v9351_v48 = vpop.eup %9350 }
0x1bfa   : > { %v4545_v49 = vmul.f32 %v9351_v48, %v9349_v40 }
0x1bfc   : > { %8604 = vmatmul.mubr.msk.f32.vlgmr.msra.gmra.mrb[22].mxu1 %vm2490_vm2, %v4545_v49 }
0x1bfd   : > { %8619 = vmatprep.mubr.msk.f32.mxu1 %vm9997_vm0, %v9998_v1  ;;  %8948 = vmatpush3.bf16.msra.mxu1 %v8947_v6  ;;  %v2000_v6 = vld [vmem:[%s11508_s16 + $0x10] sm:$0xff] }
0x1bfe   : > { %8949 = vmatprep.subr.bf16.mxu1 %v9996_v0 }
0x1ccf   : > { %v4618_v50 = vpop.f32.mrb[22].mxu1 }
0x1cd0   : > { %v8605_v51 = vpop.f32.mrb[23].mxu1  ;;  %8609 = vmatmul.mubr.msk.f32.vlgmr.msra.gmra.mrb[36].mxu0 %vm2490_vm2, %v4618_v50 }
0x1cd1   : > { %8638 = vmatprep.mubr.msk.f32.mxu0 %vm9997_vm0, %v9998_v1  ;;  %8954 = vmatpush3.bf16.msra.mxu0 %v8953_v55  ;;  %v2004_v55 = vld [vmem:[%s11508_s16 + $0x30] sm:$0xff] }
0x1cd2   : > { %8955 = vmatprep.subr.bf16.mxu0 %v9996_v0 }
0x1cd5   : > { %8957 = vmatpush3.bf16.msra.mxu0 %v8956_v13  ;;  %v8980_v13 = vpack.c.bf16 %v2005_v12, %v2004_v55 }
0x1cd6   : > { %8958 = vmatprep.subr.bf16.mxu0 %v9996_v0 }
0x1cd9   : > { %8960 = vmatpush3.bf16.msra.mxu0 %v8959_v16  ;;  %v8983_v16 = vpack.c.bf16 %v2007_v15, %v2006_v14 }
0x1cda   : > { %8961 = vmatprep.subr.bf16.mxu0 %v9996_v0 }
0x1cdd   : > { %8963 = vmatpush3.bf16.msra.mxu0 %v8962_v30  ;;  %v2016_v30 = vld [vmem:[%s11508_s16 + $0x90] sm:$0xff] }
0x1cde   : > { %9000 = vmatprep.subr.bf16.mxu0 %v9996_v0 }
0x1da3   : > { %v4691_v54 = vpop.f32.mrb[36].mxu0 }
0x1da4   : > { %v4695_v56 = vadd.f32 %v4691_v54, %v4455_v45  ;;  %v8610_v57 = vpop.f32.mrb[37].mxu0 }
0x1da6   : > { %v4702_v58 = vadd.f32 %v8165_v53, %v4695_v56 }
0x1da8   : > { %v4703_v59 = vadd.f32 %v4702_v58, %v10839_v26  ;;  %v1980_v26 = vld [vmem:[%s11505_s6 + $0x10] sm:$0xff]  ;;  %s11507_s6 = sld [smem:[#allocation62_spill]] }
0x1da9   : > { %v8950_v8 = vpack.c.bf16 %v1981_v7, %v1980_v26  ;;  %v8971_v26 = vpack.c.bf16 %v1999_v5, %v1998_v4  ;;  %v2001_v7 = vld [vmem:[%s11508_s16 + $0x18] sm:$0xff] }
0x1daa   : > { %v4704_v60 = vsel %vm2219_vm10, %v4703_v59, 0.0 }
0x1dab   : > { %4705 = vadd.xlane.f32.xlu1 %v4704_v60  ;;  %8951 = vmatpush3.bf16.msra.mxu1 %v8950_v8  ;;  %v8974_v8 = vpack.c.bf16 %v2001_v7, %v2000_v6 }
0x1dac   : > { %8964 = vmatprep.subr.bf16.mxu1 %v9996_v0 }
0x1dae   : > { %v1993_v48 = vld [vmem:[%s11507_s6] sm:$0xff]  ;;  %v1994_v49 = vld [vmem:[%s11507_s6 + $0x8] sm:$0xff]  ;;  %v1995_v51 = vld [vmem:[%s11507_s6 + $0x10] sm:$0xff] }
0x1daf   : > { %v8965_v50 = vpack.c.bf16 %v1994_v49, %v1993_v48  ;;  %v1996_v53 = vld [vmem:[%s11507_s6 + $0x18] sm:$0xff]  ;;  %s11509_s6 = sld [smem:[#allocation63_spill]] }
0x1db0   : > { %v8968_v54 = vpack.c.bf16 %v1996_v53, %v1995_v51 }
0x1e38   : > { %v4706_v61 = vpop.xlane.xlu1 %4705 }
0x1e39   : > { %v4707_v62 = vmul.f32 0.03125, %v4706_v61 }
0x1e3b   : > { %v4708_v63 = vsub.f32 %v4703_v59, %v4707_v62  ;;  %v1992_v59 = vld [vmem:[#allocation13] sm:$0x3] }
0x1e3c   : > { %v4903_v60 = vrot.slane %v1992_v59, %v10810_v44 }
0x1e3d   : > { %v4709_v2 = vmul.f32 %v4708_v63, %v4708_v63 }
0x1e3f   : > { %v4710_v3 = vsel %vm2219_vm10, %v4709_v2, 0.0 }
0x1e40   : > { %4711 = vadd.xlane.f32.xlu1 %v4710_v3 }
0x1ecd   : > { %v4712_v17 = vpop.xlane.xlu1 %4711 }
0x1ece   : > { %v4713_v18 = vmul.f32 0.03125, %v4712_v17  ;;  %v2008_v17 = vld [vmem:[%s11508_s16 + $0x50] sm:$0xff] }
0x1ed0   : > { %v4714_v19 = vadd.f32 1e-05, %v4713_v18  ;;  %v2009_v18 = vld [vmem:[%s11508_s16 + $0x58] sm:$0xff] }
0x1ed2   : > { %9352 = vrsqrt.f32 %v4714_v19  ;;  %v8986_v19 = vpack.c.bf16 %v2009_v18, %v2008_v17 }
0x1edc   : > { %v9353_v22 = vpop.eup %9352 }
0x1edd   : > { %v4716_v23 = vmul.f32 %v9353_v22, %v4708_v63  ;;  %v4908_v63 = vrot.slane %v1992_v59, %v10813_v46 }
0x1edf   : > { %v4721_v25 = vmul.f32 %v4720_v21, %v4716_v23  ;;  %v2011_v21 = vld [vmem:[%s11508_s16 + $0x68] sm:$0xff]  ;;  %v2012_v23 = vld [vmem:[%s11508_s16 + $0x70] sm:$0xff] }
0x1ee0   : > { %v8989_v22 = vpack.c.bf16 %v2011_v21, %v2010_v20 }
0x1ee1   : > { %v4726_v27 = vadd.f32 %v4725_v24, %v4721_v25  ;;  %v2013_v24 = vld [vmem:[%s11508_s16 + $0x78] sm:$0xff] }
0x1ee2   : > { %v8992_v25 = vpack.c.bf16 %v2013_v24, %v2012_v23 }
0x1ee3   : > { %8620 = vmatmul.mubr.msk.f32.vlgmr.msra.gmra.mrb[24].mxu1 %vm2219_vm10, %v4726_v27 }
0x1ee4   : > { %8649 = vmatprep.mubr.msk.f32.mxu1 %vm9997_vm0, %v9998_v1  ;;  %8966 = vmatpush3.bf16.msra.mxu1 %v8965_v50 }
0x1ee5   : > { %8967 = vmatprep.subr.bf16.mxu1 %v9996_v0 }
0x1ee8   : > { %8969 = vmatpush3.bf16.msra.mxu1 %v8968_v54 }
0x1ee9   : > { %8970 = vmatprep.subr.bf16.mxu1 %v9996_v0 }
0x1fb6   : > { %v4802_v32 = vpop.f32.mrb[24].mxu1 }
0x1fb7   : > { %v4803_v33 = vadd.f32 %v8166_v31, %v4802_v32  ;;  %v8621_v34 = vpop.f32.mrb[25].mxu1  ;;  %v2017_v31 = vld [vmem:[%s11508_s16 + $0x98] sm:$0xff]  ;;  %v8170_v32 = vld [vmem:[%s11509_s6] ss:$0 sm:$0xff]  ;;  %s11510_s6 = sld [smem:[#allocation66_spill]] }
0x1fb9   : > { %v4806_v35 = vmax.f32 %v4803_v33, 0.0  ;;  %v8998_v33 = vpack.c.bf16 %v2017_v31, %v2016_v30 }
0x1fbb   : > { %8639 = vmatmul.mubr.msk.f32.vlgmr.msra.gmra.mrb[38].mxu0 %vm2221_vm13, %v4806_v35 }
0x1fbc   : > { %8660 = vmatprep.mubr.msk.f32.mxu0 %vm9997_vm0, %v9998_v1 }
0x1fbd   : > { %v2019_v4 = vld [vmem:[%s11510_s6] sm:$0xff]  ;;  %v2020_v5 = vld [vmem:[%s11510_s6 + $0x8] sm:$0xff]  ;;  %v2022_v7 = vld [vmem:[%s11510_s6 + $0x18] sm:$0xff] }
0x1fbe   : > { %v9001_v6 = vpack.c.bf16 %v2020_v5, %v2019_v4 }
0x1fc0   : > { %9002 = vmatpush3.bf16.msra.mxu0 %v9001_v6 }
0x1fc1   : > { %9003 = vmatprep.subr.bf16.mxu0 %v9996_v0 }
0x208e   : > { %v4882_v37 = vpop.f32.mrb[38].mxu0 }
0x208f   : > { %v4883_v38 = vadd.f32 %v8168_v36, %v4882_v37  ;;  %v8640_v39 = vpop.f32.mrb[39].mxu0 }
0x2091   : > { %v4886_v40 = vadd.f32 %v4883_v38, %v4726_v27  ;;  %v2014_v27 = vld [vmem:[%s11508_s16 + $0x80] sm:$0xff]  ;;  %s11511_s16 = smov 32  }
0x2092   : > { %v8995_v29 = vpack.c.bf16 %v2015_v52, %v2014_v27 }
0x2093   : > { %v4887_v41 = vsel %vm2219_vm10, %v4886_v40, 0.0 }
0x2094   : > { %4888 = vadd.xlane.f32.xlu1 %v4887_v41 }
0x2121   : > { %v4889_v42 = vpop.xlane.xlu1 %4888 }
0x2122   : > { %v4890_v43 = vmul.f32 0.03125, %v4889_v42 }
0x2124   : > { %v4891_v45 = vsub.f32 %v4886_v40, %v4890_v43 }
0x2126   : > { %v4892_v47 = vmul.f32 %v4891_v45, %v4891_v45 }
0x2128   : > { %v4893_v28 = vsel %vm2219_vm10, %v4892_v47, 0.0 }
0x2129   : > { %4894 = vadd.xlane.f32.xlu1 %v4893_v28 }
0x21b6   : > { %v4895_v56 = vpop.xlane.xlu1 %4894 }
0x21b7   : > { %v4896_v57 = vmul.f32 0.03125, %v4895_v56 }
0x21b9   : > { %v4897_v58 = vadd.f32 1e-05, %v4896_v57 }
0x21bb   : > { %9354 = vrsqrt.f32 %v4897_v58 }
0x21c5   : > { %v9355_v61 = vpop.eup %9354 }
0x21c6   : > { %v4899_v62 = vmul.f32 %v9355_v61, %v4891_v45 }
0x21c8   : > { %v4904_v2 = vmul.f32 %v4903_v60, %v4899_v62 }
0x21ca   : > { %v4909_v3 = vadd.f32 %v4908_v63, %v4904_v2 }
0x21cc   : > { %8650 = vmatmul.mubr.msk.f32.vlgmr.msra.gmra.mrb[26].mxu1 %vm2219_vm10, %v4909_v3 }
0x21cd   : > { %8972 = vmatpush1.bf16.msra.mxu1 %v8971_v26  ;;  %v2021_v26 = vld [vmem:[%s11510_s6 + $0x10] sm:$0xff]  ;;  %s11516_s6 = sld [smem:[#allocation72_spill]] }
0x21ce   : > { %8973 = vmatprep.subr.bf16.mxu1 %v9996_v0 }
0x21d1   : > { %8975 = vmatpush1.bf16.msra.mxu1 %v8974_v8  ;;  %v9004_v8 = vpack.c.bf16 %v2022_v7, %v2021_v26 }
0x21d2   : > { %8976 = vmatprep.subr.bf16.mxu1 %v9996_v0 }
0x21d3   : > { %9005 = vmatpush3.bf16.msra.mxu0 %v9004_v8 }
0x21d4   : > { %9006 = vmatprep.subr.bf16.mxu0 %v9996_v0 }
0x21d5   : > { %8978 = vmatpush1.bf16.msra.mxu1 %v8977_v11 }
0x21d6   : > { %8979 = vmatprep.subr.bf16.mxu1 %v9996_v0 }
0x21d9   : > { %8981 = vmatpush1.bf16.msra.mxu1 %v8980_v13 }
0x21da   : > { %8982 = vmatprep.subr.bf16.mxu1 %v9996_v0 }
0x21dd   : > { %8984 = vmatpush1.bf16.msra.mxu1 %v8983_v16 }
0x21de   : > { %8985 = vmatprep.subr.bf16.mxu1 %v9996_v0 }
0x21e1   : > { %8987 = vmatpush1.bf16.msra.mxu1 %v8986_v19 }
0x21e2   : > { %8988 = vmatprep.subr.bf16.mxu1 %v9996_v0 }
0x21e5   : > { %8990 = vmatpush1.bf16.msra.mxu1 %v8989_v22 }
0x21e6   : > { %8991 = vmatprep.subr.bf16.mxu1 %v9996_v0 }
0x21e9   : > { %8993 = vmatpush1.bf16.msra.mxu1 %v8992_v25 }
0x21ea   : > { %8994 = vmatprep.subr.bf16.mxu1 %v9996_v0 }
0x21ed   : > { %8996 = vmatpush1.bf16.msra.mxu1 %v8995_v29 }
0x21ee   : > { %8997 = vmatprep.subr.bf16.mxu1 %v9996_v0 }
0x21f1   : > { %8999 = vmatpush1.bf16.msra.mxu1 %v8998_v33 }
0x21f2   : > { %8704 = vmatprep.subr.mxu1 %v9998_v1 }
0x229f   : > { %v4985_v34 = vpop.f32.mrb[26].mxu1 }
0x22a0   : > { %v4986_v35 = vadd.f32 %v8170_v32, %v4985_v34  ;;  %v8651_v36 = vpop.f32.mrb[27].mxu1 }
0x22a2   : > { %v4990_v37 = vrot.slane %v4986_v35, 7  ;;  %v4992_v38 = vrot.slane %v4986_v35, 6  ;;  %v4994_v39 = vrot.slane %v4986_v35, 5  ;;  %v4996_v40 = vrot.slane %v4986_v35, 4 }
0x22a4   : > { %v4998_v41 = vsel %vm2186_vm6, %v4986_v35, %v4990_v37  ;;  %v5000_v42 = vsel %vm2188_vm7, %v4992_v38, %v4994_v39 }
0x22a5   : > { %v4999_v43 = vsel %vm2188_vm7, %v4998_v41, %v4992_v38  ;;  %v5001_v45 = vsel %vm2191_vm8, %v5000_v42, %v4996_v40  ;;  %v8174_v42 = vld [vmem:[%s11514_s17] ss:$0 sm:$0xff]  ;;  %s11515_s17 = sld [smem:[#allocation70_spill]] }
0x22a6   : > { %v5022_v47 = vrot.slane %v4999_v43, 4  ;;  %v5023_v28 = vrot.slane %v5001_v45, 4  ;;  %v5010_v48 = vrot.slane %v4999_v43, 2  ;;  %v5011_v49 = vrot.slane %v5001_v45, 2 }
0x22a7   : > { %v5004_v50 = vrot.slane %v4999_v43, 1  ;;  %v5005_v51 = vrot.slane %v5001_v45, 1  ;;  %v5016_v56 = vrot.slane %v4999_v43, 3  ;;  %v5017_v57 = vrot.slane %v5001_v45, 3 }
0x22a8   : > { %v5024_v53 = vsel %vm2100_vm1, %v5022_v47, %v5023_v28  ;;  %v5012_v54 = vsel %vm2202_vm12, %v5010_v48, %v5011_v49  ;;  %v9398_v28 = vld [vmem:[%s11483_s26] sm:$0xff]  ;;  %v8176_v49 = vld [vmem:[#allocation15] ss:$0 sm:$0xff] }
0x22a9   : > { %8173 = vmatprep.mubr.msk.f32.mxu1 %vm2219_vm10, %v5024_v53  ;;  %5013 = vrot.lane.b32.xlu0 %v5012_v54, %s11499_s8  ;;  %v5006_v58 = vsel %vm2195_vm11, %v5004_v50, %v5005_v51  ;;  %v5018_v59 = vsel %vm2209_vm9, %v5016_v56, %v5017_v57 }
0x22aa   : > { %5007 = vrot.lane.b32.xlu1 %v5006_v58, %s11511_s16  ;;  %s11513_s16 = sld [smem:[#allocation68_spill]] }
0x22ad   : > { %5019 = vrot.lane.b32.xlu0 %v5018_v59, %s11494_s2 }
0x22b0   : > { %v2024_v34 = vld [vmem:[%s11513_s16] sm:$0xff]  ;;  %v2025_v35 = vld [vmem:[%s11513_s16 + $0x8] sm:$0xff]  ;;  %v2026_v39 = vld [vmem:[%s11513_s16 + $0x10] sm:$0xff] }
0x22b1   : > { %v9007_v37 = vpack.c.bf16 %v2025_v35, %v2024_v34  ;;  %v2027_v40 = vld [vmem:[%s11513_s16 + $0x18] sm:$0xff]  ;;  %v2030_v34 = vld [vmem:[%s11515_s17 + $0x8] sm:$0xff]  ;;  %s11517_s16 = sld [smem:[#allocation74_spill]] }
0x22b2   : > { %v9010_v41 = vpack.c.bf16 %v2027_v40, %v2026_v39 }
0x231b   : > { %v5014_v60 = vpop.permute.xlu0 %5013 }
0x231c   : > { %v5008_v61 = vpop.permute.xlu1 %5007 }
0x231d   : > { %v5025_v62 = vsel %vm2219_vm10, %v4999_v43, %v5008_v61 }
0x231e   : > { %v5026_v2 = vsel %vm2221_vm13, %v5025_v62, %v5014_v60 }
0x231f   : > { %v5020_v63 = vpop.permute.xlu0 %5019 }
0x2320   : > { %v5027_v3 = vsel %vm2223_vm14, %v5026_v2, %v5020_v63 }
0x2321   : > { %5101 = vmatmul.mubr.f32.vlgmr.msra.gmra.mrb[28].mxu1 %v5027_v3 }
0x2322   : > { %8706 = vmatprep.mubr.msk.f32.mxu1 %vm9997_vm0, %v9998_v1 }
0x23f4   : > { %v5102_v10 = vpop.f32.mrb[28].mxu1 }
0x23f5   : > { %v5103_v11 = vadd.f32 %v8172_v9, %v5102_v10  ;;  %v5104_v55 = vpop.f32.mrb[29].mxu1 }
0x23f7   : > { %vm5106_vm1 = vcmp.ge.f32.partialorder %v5103_v11, 0.0  ;;  %v5107_v12 = vmul.f32 0.2, %v5103_v11 }
0x23f9   : > { %v5108_v13 = vsel %vm5106_vm1, %v5103_v11, %v5107_v12 }
0x23fa   : > { %v5109_v14 = vsel %vm2219_vm10, %v5108_v13, 0.0 }
0x23fb   : > { %v5110_v15 = vrot.slane %v5109_v14, 4 }
0x23fd   : > { %v5111_v16 = vadd.f32 %v5110_v15, %v5109_v14 }
0x23ff   : > { %v5112_v17 = vrot.slane %v5111_v16, 2 }
0x2401   : > { %v5113_v18 = vadd.f32 %v5112_v17, %v5111_v16 }
0x2403   : > { %v5114_v19 = vrot.slane %v5113_v18, 1 }
0x2405   : > { %v5115_v20 = vadd.f32 %v5114_v19, %v5113_v18 }
0x2407   : > { %v5116_v21 = vmul.f32 0.125, %v5115_v20 }
0x2409   : > { %v5117_v22 = vsub.f32 %v5108_v13, %v5116_v21 }
0x240b   : > { %v5118_v23 = vmul.f32 %v5117_v22, %v5117_v22 }
0x240d   : > { %v5119_v24 = vsel %vm2219_vm10, %v5118_v23, 0.0 }
0x240e   : > { %v5120_v25 = vrot.slane %v5119_v24, 4 }
0x2410   : > { %v5121_v27 = vadd.f32 %v5120_v25, %v5119_v24 }
0x2412   : > { %v5122_v52 = vrot.slane %v5121_v27, 2 }
0x2414   : > { %v5123_v29 = vadd.f32 %v5122_v52, %v5121_v27 }
0x2416   : > { %v5124_v30 = vrot.slane %v5123_v29, 1 }
0x2418   : > { %v5125_v31 = vadd.f32 %v5124_v30, %v5123_v29 }
0x241a   : > { %v5126_v32 = vmul.f32 0.125, %v5125_v31 }
0x241c   : > { %v5127_v33 = vadd.f32 1e-05, %v5126_v32 }
0x241e   : > { %9356 = vrsqrt.f32 %v5127_v33 }
0x2428   : > { %v9357_v36 = vpop.eup %9356 }
0x2429   : > { %v5129_v38 = vmul.f32 %v9357_v36, %v5117_v22  ;;  %v2029_v36 = vld [vmem:[%s11515_s17] sm:$0xff] }
0x242b   : > { %8661 = vmatmul.mubr.msk.f32.vlgmr.msra.gmra.mrb[40].mxu0 %vm2219_vm10, %v5129_v38 }
0x242c   : > { %9008 = vmatpush3.bf16.msra.mxu0 %v9007_v37  ;;  %8671 = vmatprep.mubr.msk.f32.mxu0 %vm9997_vm0, %v9998_v1 }
0x242d   : > { %9009 = vmatprep.subr.bf16.mxu0 %v9996_v0 }
0x2430   : > { %9011 = vmatpush3.bf16.msra.mxu0 %v9010_v41 }
0x2431   : > { %8674 = vmatprep.subr.mxu0 %v9998_v1 }
0x24fe   : > { %v5205_v43 = vpop.f32.mrb[40].mxu0 }
0x24ff   : > { %v5206_v45 = vadd.f32 %v8174_v42, %v5205_v43  ;;  %v8662_v47 = vpop.f32.mrb[41].mxu0 }
0x2501   : > { %v11042_v48 = vadd.f32 %v9398_v28, %v5206_v45  ;;  %v2031_v45 = vld [vmem:[%s11515_s17 + $0x10] sm:$0xff] }
0x2503   : > { %8672 = vmatmul.mubr.msk.f32.vlgmr.msra.gmra.mrb[42].mxu0 %vm2219_vm10, %v11042_v48 }
0x2504   : > { %8676 = vmatprep.mubr.msk.f32.mxu0 %vm9997_vm0, %v9998_v1 }
0x25d6   : > { %v5285_v50 = vpop.f32.mrb[42].mxu0 }
0x25d7   : > { %v11048_v51 = vadd.f32 %v8176_v49, %v5285_v50  ;;  %v8673_v53 = vpop.f32.mrb[43].mxu0 }
0x25d9   : > { %5290 = vrot.lane.b32.xlu0 %v11048_v51, %s11494_s2 }
0x264b   : > { %v5291_v54 = vpop.permute.xlu0 %5290 }
0x264c   : > { %8675 = vmatpush3.xpose.msk.msra.mxu0 %vm2490_vm2, %v5291_v54 }
0x264d   : > { %8679 = vmatprep.subr.mxu0 %v9998_v1 }
0x264f   : > { %8677 = vmatmul.mubr.msk.f32.vlgmr.msra.gmra.mrb[44].mxu0 %vm2490_vm2, %v11048_v51 }
0x2650   : > { %8681 = vmatprep.mubr.msk.f32.mxu0 %vm9997_vm0, %v9998_v1 }
0x2722   : > { %v5362_v56 = vpop.f32.mrb[44].mxu0 }
0x2723   : > { %v5366_v57 = vmul.f32 0.35355338, %v5362_v56  ;;  %v8678_v58 = vpop.f32.mrb[45].mxu0 }
0x2725   : > { %v5367_v59 = vsel %vm2490_vm2, %v5366_v57, -inf }
0x2726   : > { %5368 = vmax.xlane.f32.xlu0 %v5367_v59 }
0x273c   : > { %5378 = vrot.lane.b32.xlu0 %v11048_v51, %s11499_s8 }
0x2740   : > { %5454 = vrot.lane.b32.xlu0 %v11048_v51, %s11495_s1 }
0x2744   : > { %5768 = vrot.lane.b32.xlu0 %v11048_v51, %s11497_s4 }
0x27b3   : > { %v5369_v60 = vpop.xlane.xlu0 %5368 }
0x27b4   : > { %v5370_v61 = vsub.f32 %v5366_v57, %v5369_v60 }
0x27b6   : > { %v5371_v62 = vmul.f32 1.442695, %v5370_v61 }
0x27b7   : > { %v5379_v63 = vpop.permute.xlu0 %5378 }
0x27b8   : > { %9358 = vpow2.f32 %v5371_v62  ;;  %8680 = vmatpush3.msra.mxu0 %v5379_v63 }
0x27b9   : > { %8684 = vmatprep.subr.mxu0 %v9998_v1 }
0x27bb   : > { %v5455_v2 = vpop.permute.xlu0 %5454 }
0x27bf   : > { %v5769_v3 = vpop.permute.xlu0 %5768 }
0x27c0   : > { %8705 = vmatpush3.xpose.msk.msra.mxu1 %vm2490_vm2, %v5769_v3 }
0x27c1   : > { %8714 = vmatprep.subr.mxu1 %v9998_v1 }
0x27c2   : > { %v9359_v4 = vpop.eup %9358 }
0x27c3   : > { %v5373_v5 = vsel %vm2490_vm2, %v9359_v4, 0.0 }
0x27c4   : > { %5374 = vadd.xlane.f32.xlu1 %v5373_v5  ;;  %v2032_v5 = vld [vmem:[%s11515_s17 + $0x18] sm:$0xff]  ;;  %s11518_s17 = sld [smem:[#allocation71_spill]] }
0x27d5   : > { %5456 = vrot.lane.b32.xlu1 %v11048_v51, %s11493_s0 }
0x27d9   : > { %5766 = vrot.lane.b32.xlu1 %v11048_v51, %s11500_s9 }
0x2851   : > { %v5375_v6 = vpop.xlane.xlu1 %5374 }
0x2852   : > { %9360 = vrcp.f32 %v5375_v6 }
0x2855   : > { %v5457_v26 = vpop.permute.xlu1 %5456 }
0x2859   : > { %v5767_v7 = vpop.permute.xlu1 %5766 }
0x285a   : > { %8707 = vmatmul.mubr.msk.f32.vlgmr.msra.gmra.mrb[30].mxu1 %vm2490_vm2, %v5767_v7 }
0x285b   : > { %8716 = vmatprep.mubr.msk.f32.mxu1 %vm9997_vm0, %v9998_v1  ;;  %8715 = vmatpush3.msra.mxu1 %v2031_v45 }
0x285c   : > { %v9361_v8 = vpop.eup %9360  ;;  %8724 = vmatprep.subr.mxu1 %v9998_v1 }
0x285d   : > { %v5377_v9 = vmul.f32 %v9361_v8, %v9359_v4 }
0x285f   : > { %8682 = vmatmul.mubr.msk.f32.vlgmr.msra.gmra.mrb[46].mxu0 %vm2490_vm2, %v5377_v9 }
0x2860   : > { %8685 = vmatpush3.xpose.msk.msra.mxu0 %vm2490_vm2, %v5457_v26  ;;  %8686 = vmatprep.mubr.msk.f32.mxu0 %vm9997_vm0, %v9998_v1 }
0x2861   : > { %8689 = vmatprep.subr.mxu0 %v9998_v1 }
0x2863   : > { %8687 = vmatmul.mubr.msk.f32.vlgmr.msra.gmra.mrb[48].mxu0 %vm2490_vm2, %v5455_v2 }
0x2864   : > { %8691 = vmatprep.mubr.msk.f32.mxu0 %vm9997_vm0, %v9998_v1 }
0x292d   : > { %v5840_v10 = vpop.f32.mrb[30].mxu1 }
0x292e   : > { %v8708_v11 = vpop.f32.mrb[31].mxu1  ;;  %v5844_v22 = vmul.f32 0.35355338, %v5840_v10 }
0x2930   : > { %v5845_v24 = vsel %vm2490_vm2, %v5844_v22, -inf }
0x2932   : > { %v5450_v55 = vpop.f32.mrb[46].mxu0 }
0x2933   : > { %v8683_v12 = vpop.f32.mrb[47].mxu0 }
0x2936   : > { %v5528_v13 = vpop.f32.mrb[48].mxu0 }
0x2937   : > { %v5532_v14 = vmul.f32 0.35355338, %v5528_v13  ;;  %v8688_v15 = vpop.f32.mrb[49].mxu0 }
0x2939   : > { %v5533_v16 = vsel %vm2490_vm2, %v5532_v14, -inf }
0x293a   : > { %5534 = vmax.xlane.f32.xlu0 %v5533_v16 }
0x2950   : > { %5544 = vrot.lane.b32.xlu0 %v11048_v51, %s11496_s3 }
0x2954   : > { %6008 = vrot.lane.b32.xlu0 %v11048_v51, %s11501_s12 }
0x2958   : > { %6006 = vrot.lane.b32.xlu0 %v11048_v51, %s11502_s13 }
0x29c7   : > { %v5535_v17 = vpop.xlane.xlu0 %5534 }
0x29c8   : > { %v5536_v18 = vsub.f32 %v5532_v14, %v5535_v17 }
0x29ca   : > { %v5537_v19 = vmul.f32 1.442695, %v5536_v18 }
0x29cb   : > { %v5545_v20 = vpop.permute.xlu0 %5544 }
0x29cc   : > { %9362 = vpow2.f32 %v5537_v19  ;;  %8690 = vmatpush3.msra.mxu0 %v5545_v20 }
0x29cd   : > { %8694 = vmatprep.subr.mxu0 %v9998_v1 }
0x29cf   : > { %v6009_v42 = vpop.permute.xlu0 %6008 }
0x29d3   : > { %v6007_v43 = vpop.permute.xlu0 %6006 }
0x29d6   : > { %v9363_v21 = vpop.eup %9362 }
0x29d7   : > { %v5539_v23 = vsel %vm2490_vm2, %v9363_v21, 0.0 }
0x29d8   : > { %5540 = vadd.xlane.f32.xlu1 %v5539_v23  ;;  %v2035_v23 = vld [vmem:[%s11516_s6] sm:$0xff] }
0x29dc   : > { %5846 = vmax.xlane.f32.xlu1 %v5845_v24  ;;  %v2036_v24 = vld [vmem:[%s11516_s6 + $0x8] sm:$0xff] }
0x2a65   : > { %v5541_v25 = vpop.xlane.xlu1 %5540 }
0x2a66   : > { %9364 = vrcp.f32 %v5541_v25  ;;  %v9013_v25 = vpack.c.bf16 %v2036_v24, %v2035_v23  ;;  %v8199_v23 = vld [vmem:[#allocation21] ss:$0 sm:$0xff] }
0x2a69   : > { %v5847_v27 = vpop.xlane.xlu1 %5846 }
0x2a6a   : > { %v5848_v52 = vsub.f32 %v5844_v22, %v5847_v27  ;;  %v2038_v27 = vld [vmem:[%s11516_s6 + $0x18] sm:$0xff] }
0x2a6c   : > { %v5849_v29 = vmul.f32 1.442695, %v5848_v52 }
0x2a6e   : > { %9366 = vpow2.f32 %v5849_v29  ;;  %v2040_v29 = vld [vmem:[%s11517_s16] sm:$0xff] }
0x2a70   : > { %v9365_v30 = vpop.eup %9364 }
0x2a71   : > { %v5543_v31 = vmul.f32 %v9365_v30, %v9363_v21  ;;  %v2041_v30 = vld [vmem:[%s11517_s16 + $0x8] sm:$0xff] }
0x2a73   : > { %8692 = vmatmul.mubr.msk.f32.vlgmr.msra.gmra.mrb[50].mxu0 %vm2490_vm2, %v5543_v31  ;;  %v2042_v31 = vld [vmem:[%s11517_s16 + $0x10] sm:$0xff] }
0x2a74   : > { %8696 = vmatprep.mubr.msk.f32.mxu0 %vm9997_vm0, %v9998_v1  ;;  %8695 = vmatpush3.msra.mxu0 %v2030_v34 }
0x2a75   : > { %8699 = vmatprep.subr.mxu0 %v9998_v1 }
0x2a78   : > { %v9367_v32 = vpop.eup %9366 }
0x2a79   : > { %v5851_v33 = vsel %vm2490_vm2, %v9367_v32, 0.0 }
0x2a7a   : > { %5852 = vadd.xlane.f32.xlu1 %v5851_v33  ;;  %v2043_v33 = vld [vmem:[%s11517_s16 + $0x18] sm:$0xff] }
0x2a7b   : > { %v9022_v34 = vpack.c.bf16 %v2043_v33, %v2042_v31 }
0x2a8b   : > { %5856 = vrot.lane.b32.xlu1 %v11048_v51, %s11503_s14 }
0x2b07   : > { %v5853_v35 = vpop.xlane.xlu1 %5852 }
0x2b08   : > { %9368 = vrcp.f32 %v5853_v35  ;;  %v2044_v35 = vld [vmem:[%s11517_s16 + $0x20] sm:$0xff] }
0x2b0b   : > { %v5857_v40 = vpop.permute.xlu1 %5856 }
0x2b12   : > { %v9369_v39 = vpop.eup %9368 }
0x2b13   : > { %v5855_v41 = vmul.f32 %v9369_v39, %v9367_v32  ;;  %v9019_v32 = vpack.c.bf16 %v2041_v30, %v2040_v29 }
0x2b46   : > { %v5616_v37 = vpop.f32.mrb[50].mxu0 }
0x2b47   : > { %v8693_v38 = vpop.f32.mrb[51].mxu0  ;;  %8697 = vmatmul.mubr.msk.f32.vlgmr.msra.gmra.mrb[52].mxu0 %vm2490_vm2, %v5616_v37 }
0x2b48   : > { %8700 = vmatpush3.msra.mxu0 %v2029_v36  ;;  %8701 = vmatprep.mubr.msk.f32.mxu0 %vm9997_vm0, %v9998_v1  ;;  %v2045_v36 = vld [vmem:[%s11517_s16 + $0x28] sm:$0xff] }
0x2b49   : > { %8709 = vmatprep.subr.mxu0 %v9998_v1  ;;  %v9025_v37 = vpack.c.bf16 %v2045_v36, %v2044_v35 }
0x2b4b   : > { %8702 = vmatmul.mubr.msk.f32.vlgmr.msra.gmra.mrb[54].mxu0 %vm2490_vm2, %v5450_v55  ;;  %v8194_v55 = vld [vmem:[#allocation16] ss:$0 sm:$0xff] }
0x2b4c   : > { %8710 = vmatpush3.msra.mxu0 %v5857_v40  ;;  %8711 = vmatprep.mubr.msk.f32.mxu0 %vm9997_vm0, %v9998_v1 }
0x2b4d   : > { %8719 = vmatprep.subr.mxu0 %v9998_v1 }
0x2b4f   : > { %8712 = vmatmul.mubr.msk.f32.vlgmr.msra.gmra.mrb[56].mxu0 %vm2490_vm2, %v5855_v41  ;;  %v2034_v41 = vld [vmem:[%s11518_s17] sm:$0x3]  ;;  %s11519_s17 = sld [smem:[#allocation77_spill]] }
0x2b50   : > { %8721 = vmatprep.mubr.msk.f32.mxu0 %vm9997_vm0, %v9998_v1 }
0x2b53   : > { %8720 = vmatpush3.xpose.msk.msra.mxu0 %vm2490_vm2, %v6009_v42  ;;  %v6270_v42 = vrot.slane %v2034_v41, %v10810_v44 }
0x2b54   : > { %8729 = vmatprep.subr.mxu0 %v9998_v1 }
0x2b56   : > { %8722 = vmatmul.mubr.msk.f32.vlgmr.msra.gmra.mrb[58].mxu0 %vm2490_vm2, %v6007_v43 }
0x2b57   : > { %8731 = vmatprep.mubr.msk.f32.mxu0 %vm9997_vm0, %v9998_v1  ;;  %8730 = vmatpush3.msra.mxu0 %v2032_v5 }
0x2b58   : > { %9018 = vmatprep.subr.bf16.mxu0 %v9996_v0 }
0x2c1a   : > { %v5689_v47 = vpop.f32.mrb[52].mxu0 }
0x2c1b   : > { %v8698_v28 = vpop.f32.mrb[53].mxu0 }
0x2c1e   : > { %v5762_v49 = vpop.f32.mrb[54].mxu0 }
0x2c1f   : > { %v5763_v50 = vadd.f32 %v5762_v49, %v5689_v47  ;;  %v8703_v53 = vpop.f32.mrb[55].mxu0  ;;  %v6275_v47 = vrot.slane %v2034_v41, %v10813_v46 }
0x2c20   : > { %v2047_v53 = vld [vmem:[%s11517_s16 + $0x38] sm:$0xff] }
0x2c22   : > { %v5928_v54 = vpop.f32.mrb[56].mxu0 }
0x2c23   : > { %v8713_v56 = vpop.f32.mrb[57].mxu0  ;;  %8717 = vmatmul.mubr.msk.f32.vlgmr.msra.gmra.mrb[32].mxu1 %vm2490_vm2, %v5928_v54 }
0x2c24   : > { %8726 = vmatprep.mubr.msk.f32.mxu1 %vm9997_vm0, %v9998_v1  ;;  %v8195_v56 = vld [vmem:[#allocation18] ss:$0 sm:$0xff] }
0x2c29   : > { %v6080_v57 = vpop.f32.mrb[58].mxu0 }
0x2c2a   : > { %v6084_v58 = vmul.f32 0.35355338, %v6080_v57  ;;  %v8723_v59 = vpop.f32.mrb[59].mxu0 }
0x2c2c   : > { %v6085_v60 = vsel %vm2490_vm2, %v6084_v58, -inf }
0x2c2d   : > { %6086 = vmax.xlane.f32.xlu0 %v6085_v60 }
0x2c43   : > { %6096 = vrot.lane.b32.xlu0 %v11048_v51, %s11504_s15 }
0x2cba   : > { %v6087_v61 = vpop.xlane.xlu0 %6086 }
0x2cbb   : > { %v6088_v62 = vsub.f32 %v6084_v58, %v6087_v61  ;;  %v8197_v61 = vld [vmem:[#allocation19] ss:$0 sm:$0xff] }
0x2cbd   : > { %v6089_v63 = vmul.f32 1.442695, %v6088_v62 }
0x2cbe   : > { %v6097_v2 = vpop.permute.xlu0 %6096 }
0x2cbf   : > { %9370 = vpow2.f32 %v6089_v63  ;;  %8725 = vmatpush3.msra.mxu1 %v6097_v2 }
0x2cc0   : > { %9012 = vmatprep.subr.bf16.mxu1 %v9996_v0 }
0x2cc9   : > { %v9371_v3 = vpop.eup %9370 }
0x2cca   : > { %v6091_v4 = vsel %vm2490_vm2, %v9371_v3, 0.0 }
0x2ccb   : > { %6092 = vadd.xlane.f32.xlu1 %v6091_v4 }
0x2cf6   : > { %v6001_v6 = vpop.f32.mrb[32].mxu1 }
0x2cf7   : > { %v6005_v26 = vadd.f32 %v6001_v6, %v5763_v50  ;;  %v8718_v7 = vpop.f32.mrb[33].mxu1  ;;  %v2046_v50 = vld [vmem:[%s11517_s16 + $0x30] sm:$0xff] }
0x2cf8   : > { %v9028_v54 = vpack.c.bf16 %v2047_v53, %v2046_v50 }
0x2d58   : > { %v6093_v51 = vpop.xlane.xlu1 %6092 }
0x2d59   : > { %9372 = vrcp.f32 %v6093_v51 }
0x2d63   : > { %v9373_v8 = vpop.eup %9372 }
0x2d64   : > { %v6095_v9 = vmul.f32 %v9373_v8, %v9371_v3  ;;  %v2050_v8 = vld [vmem:[%s11519_s17] sm:$0xff] }
0x2d66   : > { %8727 = vmatmul.mubr.msk.f32.vlgmr.msra.gmra.mrb[34].mxu1 %vm2490_vm2, %v6095_v9  ;;  %v2051_v9 = vld [vmem:[%s11519_s17 + $0x8] sm:$0xff] }
0x2d67   : > { %8742 = vmatprep.mubr.msk.f32.mxu1 %vm9997_vm0, %v9998_v1  ;;  %9014 = vmatpush3.bf16.msra.mxu1 %v9013_v25 }
0x2d68   : > { %9015 = vmatprep.subr.bf16.mxu1 %v9996_v0 }
0x2e39   : > { %v6168_v10 = vpop.f32.mrb[34].mxu1 }
0x2e3a   : > { %v8728_v11 = vpop.f32.mrb[35].mxu1  ;;  %8732 = vmatmul.mubr.msk.f32.vlgmr.msra.gmra.mrb[60].mxu0 %vm2490_vm2, %v6168_v10  ;;  %v9031_v10 = vpack.c.bf16 %v2051_v9, %v2050_v8 }
0x2e3b   : > { %8761 = vmatprep.mubr.msk.f32.mxu0 %vm9997_vm0, %v9998_v1  ;;  %9020 = vmatpush3.bf16.msra.mxu0 %v9019_v32  ;;  %v2052_v11 = vld [vmem:[%s11519_s17 + $0x10] sm:$0xff] }
0x2e3c   : > { %9021 = vmatprep.subr.bf16.mxu0 %v9996_v0 }
0x2e3f   : > { %9023 = vmatpush3.bf16.msra.mxu0 %v9022_v34 }
0x2e40   : > { %9024 = vmatprep.subr.bf16.mxu0 %v9996_v0 }
0x2e43   : > { %9026 = vmatpush3.bf16.msra.mxu0 %v9025_v37 }
0x2e44   : > { %9027 = vmatprep.subr.bf16.mxu0 %v9996_v0 }
0x2e47   : > { %9029 = vmatpush3.bf16.msra.mxu0 %v9028_v54 }
0x2e48   : > { %8780 = vmatprep.subr.mxu0 %v9998_v1 }
0x2f0d   : > { %v6241_v12 = vpop.f32.mrb[60].mxu0 }
0x2f0e   : > { %v6245_v13 = vadd.f32 %v6241_v12, %v6005_v26  ;;  %v8733_v14 = vpop.f32.mrb[61].mxu0 }
0x2f10   : > { %v6252_v15 = vadd.f32 %v8194_v55, %v6245_v13  ;;  %v2053_v55 = vld [vmem:[%s11519_s17 + $0x18] sm:$0xff] }
0x2f11   : > { %v9034_v12 = vpack.c.bf16 %v2053_v55, %v2052_v11 }
0x2f12   : > { %v6253_v16 = vadd.f32 %v6252_v15, %v11042_v48  ;;  %v2037_v48 = vld [vmem:[%s11516_s6 + $0x10] sm:$0xff]  ;;  %s11520_s6 = sld [smem:[#allocation76_spill]] }
0x2f13   : > { %v9016_v52 = vpack.c.bf16 %v2038_v27, %v2037_v48 }
0x2f14   : > { %v6254_v17 = vsel %vm2219_vm10, %v6253_v16, 0.0 }
0x2f15   : > { %6255 = vadd.xlane.f32.xlu1 %v6254_v17  ;;  %9017 = vmatpush3.bf16.msra.mxu1 %v9016_v52 }
0x2f16   : > { %9030 = vmatprep.subr.bf16.mxu1 %v9996_v0 }
0x2fa2   : > { %v6256_v18 = vpop.xlane.xlu1 %6255 }
0x2fa3   : > { %v6257_v19 = vmul.f32 0.03125, %v6256_v18 }
0x2fa5   : > { %v6258_v20 = vsub.f32 %v6253_v16, %v6257_v19  ;;  %v2049_v16 = vld [vmem:[%s11520_s6] sm:$0x3] }
0x2fa6   : > { %v6453_v17 = vrot.slane %v2049_v16, %v10810_v44 }
0x2fa7   : > { %v6259_v21 = vmul.f32 %v6258_v20, %v6258_v20 }
0x2fa9   : > { %v6260_v22 = vsel %vm2219_vm10, %v6259_v21, 0.0 }
0x2faa   : > { %6261 = vadd.xlane.f32.xlu1 %v6260_v22 }
0x3037   : > { %v6262_v38 = vpop.xlane.xlu1 %6261 }
0x3038   : > { %v6263_v39 = vmul.f32 0.03125, %v6262_v38 }
0x303a   : > { %v6264_v40 = vadd.f32 1e-05, %v6263_v39 }
0x303c   : > { %9374 = vrsqrt.f32 %v6264_v40 }
0x3046   : > { %v9375_v43 = vpop.eup %9374 }
0x3047   : > { %v6266_v45 = vmul.f32 %v9375_v43, %v6258_v20  ;;  %v6458_v20 = vrot.slane %v2049_v16, %v10813_v46 }
0x3049   : > { %v6271_v28 = vmul.f32 %v6270_v42, %v6266_v45 }
0x304b   : > { %v6276_v49 = vadd.f32 %v6275_v47, %v6271_v28 }
0x304d   : > { %8743 = vmatmul.mubr.msk.f32.vlgmr.msra.gmra.mrb[36].mxu1 %vm2219_vm10, %v6276_v49 }
0x304e   : > { %8772 = vmatprep.mubr.msk.f32.mxu1 %vm9997_vm0, %v9998_v1  ;;  %9032 = vmatpush3.bf16.msra.mxu1 %v9031_v10 }
0x304f   : > { %9033 = vmatprep.subr.bf16.mxu1 %v9996_v0 }
0x3052   : > { %9035 = vmatpush3.bf16.msra.mxu1 %v9034_v12 }
0x3053   : > { %8775 = vmatprep.subr.mxu1 %v9998_v1 }
0x3120   : > { %v6352_v57 = vpop.f32.mrb[36].mxu1 }
0x3121   : > { %v6353_v58 = vadd.f32 %v8195_v56, %v6352_v57  ;;  %v8744_v59 = vpop.f32.mrb[37].mxu1 }
0x3123   : > { %v6356_v60 = vmax.f32 %v6353_v58, 0.0 }
0x3125   : > { %8762 = vmatmul.mubr.msk.f32.vlgmr.msra.gmra.mrb[62].mxu0 %vm2221_vm13, %v6356_v60 }
0x3126   : > { %8782 = vmatprep.mubr.msk.f32.mxu0 %vm9997_vm0, %v9998_v1 }
0x31f8   : > { %v6432_v62 = vpop.f32.mrb[62].mxu0 }
0x31f9   : > { %v6433_v63 = vadd.f32 %v8197_v61, %v6432_v62  ;;  %v8763_v2 = vpop.f32.mrb[63].mxu0 }
0x31fb   : > { %v6436_v3 = vadd.f32 %v6433_v63, %v6276_v49 }
0x31fd   : > { %v6437_v4 = vsel %vm2219_vm10, %v6436_v3, 0.0 }
0x31fe   : > { %6438 = vadd.xlane.f32.xlu1 %v6437_v4 }
0x328b   : > { %v6439_v5 = vpop.xlane.xlu1 %6438 }
0x328c   : > { %v6440_v6 = vmul.f32 0.03125, %v6439_v5 }
0x328e   : > { %v6441_v26 = vsub.f32 %v6436_v3, %v6440_v6 }
0x3290   : > { %v6442_v7 = vmul.f32 %v6441_v26, %v6441_v26 }
0x3292   : > { %v6443_v51 = vsel %vm2219_vm10, %v6442_v7, 0.0 }
0x3293   : > { %6444 = vadd.xlane.f32.xlu1 %v6443_v51 }
0x3320   : > { %v6445_v13 = vpop.xlane.xlu1 %6444 }
0x3321   : > { %v6446_v14 = vmul.f32 0.03125, %v6445_v13 }
0x3323   : > { %v6447_v15 = vadd.f32 1e-05, %v6446_v14 }
0x3325   : > { %9376 = vrsqrt.f32 %v6447_v15 }
0x332f   : > { %v9377_v18 = vpop.eup %9376 }
0x3330   : > { %v6449_v19 = vmul.f32 %v9377_v18, %v6441_v26 }
0x3332   : > { %v6454_v21 = vmul.f32 %v6453_v17, %v6449_v19 }
0x3334   : > { %v11178_v22 = vadd.f32 %v6458_v20, %v6454_v21 }
0x3336   : > { %8773 = vmatmul.mubr.msk.f32.vlgmr.msra.gmra.mrb[38].mxu1 %vm2219_vm10, %v11178_v22 }
0x3337   : > { %8777 = vmatprep.mubr.msk.f32.mxu1 %vm9997_vm0, %v9998_v1 }
0x3409   : > { %v6535_v24 = vpop.f32.mrb[38].mxu1 }
0x340a   : > { %v11184_v25 = vadd.f32 %v8199_v23, %v6535_v24  ;;  %v8774_v48 = vpop.f32.mrb[39].mxu1 }
0x340c   : > { %6706 = vrot.lane.b32.xlu0 %v11184_v25, %s11493_s0  ;;  %6540 = vrot.lane.b32.xlu1 %v11184_v25, %s11494_s2 }
0x3410   : > { %6704 = vrot.lane.b32.xlu0 %v11184_v25, %s11495_s1  ;;  %s11521_s1 = sld [smem:[#allocation79_spill]] }
0x3416   : > { %v2056_v50 = vld [vmem:[%s11521_s1 + $0x8] sm:$0xff]  ;;  %v2055_v62 = vld [vmem:[%s11521_s1] sm:$0xff]  ;;  %v2057_v48 = vld [vmem:[%s11521_s1 + $0x10] sm:$0xff] }
0x347e   : > { %v6541_v27 = vpop.permute.xlu1 %6540  ;;  %v6707_v52 = vpop.permute.xlu0 %6706 }
0x347f   : > { %8776 = vmatpush3.xpose.msk.msra.mxu1 %vm2490_vm2, %v6541_v27 }
0x3480   : > { %8785 = vmatprep.subr.mxu1 %v9998_v1 }
0x3482   : > { %8778 = vmatmul.mubr.msk.f32.vlgmr.msra.gmra.mrb[40].mxu1 %vm2490_vm2, %v11184_v25  ;;  %v6705_v29 = vpop.permute.xlu0 %6704 }
0x3483   : > { %8786 = vmatpush3.xpose.msk.msra.mxu1 %vm2490_vm2, %v6707_v52  ;;  %8787 = vmatprep.mubr.msk.f32.mxu1 %vm9997_vm0, %v9998_v1 }
0x3484   : > { %8795 = vmatprep.subr.mxu1 %v9998_v1 }
0x3486   : > { %8788 = vmatmul.mubr.msk.f32.vlgmr.msra.gmra.mrb[42].mxu1 %vm2490_vm2, %v6705_v29 }
0x3487   : > { %8797 = vmatprep.mubr.msk.f32.mxu1 %vm9997_vm0, %v9998_v1  ;;  %8796 = vmatpush3.msra.mxu1 %v2056_v50 }
0x3488   : > { %8805 = vmatprep.subr.mxu1 %v9998_v1 }
0x3555   : > { %v6612_v30 = vpop.f32.mrb[40].mxu1 }
0x3556   : > { %v6616_v31 = vmul.f32 0.35355338, %v6612_v30  ;;  %v8779_v32 = vpop.f32.mrb[41].mxu1 }
0x3558   : > { %v6617_v33 = vsel %vm2490_vm2, %v6616_v31, -inf }
0x3559   : > { %6618 = vmax.xlane.f32.xlu0 %v6617_v33  ;;  %v6778_v34 = vpop.f32.mrb[42].mxu1 }
0x355a   : > { %v6782_v35 = vmul.f32 0.35355338, %v6778_v34  ;;  %v8789_v36 = vpop.f32.mrb[43].mxu1 }
0x355c   : > { %v6783_v37 = vsel %vm2490_vm2, %v6782_v35, -inf }
0x355d   : > { %6784 = vmax.xlane.f32.xlu1 %v6783_v37 }
0x356e   : > { %6794 = vrot.lane.b32.xlu1 %v11184_v25, %s11496_s3 }
0x3572   : > { %7016 = vrot.lane.b32.xlu1 %v11184_v25, %s11500_s9  ;;  %s11522_s9 = sld [smem:[#allocation81_spill]] }
0x35e6   : > { %v6619_v38 = vpop.xlane.xlu0 %6618 }
0x35e7   : > { %v6620_v39 = vsub.f32 %v6616_v31, %v6619_v38  ;;  %v2058_v38 = vld [vmem:[%s11521_s1 + $0x18] sm:$0xff] }
0x35e9   : > { %v6621_v40 = vmul.f32 1.442695, %v6620_v39 }
0x35ea   : > { %v6785_v41 = vpop.xlane.xlu1 %6784 }
0x35eb   : > { %9378 = vpow2.f32 %v6621_v40  ;;  %v6786_v42 = vsub.f32 %v6782_v35, %v6785_v41 }
0x35ed   : > { %v6787_v43 = vmul.f32 1.442695, %v6786_v42 }
0x35ee   : > { %v6795_v59 = vpop.permute.xlu1 %6794 }
0x35ef   : > { %9380 = vpow2.f32 %v6787_v43 }
0x35f2   : > { %v7017_v6 = vpop.permute.xlu1 %7016 }
0x35f5   : > { %v9379_v45 = vpop.eup %9378 }
0x35f6   : > { %v6623_v47 = vsel %vm2490_vm2, %v9379_v45, 0.0 }
0x35f7   : > { %6624 = vadd.xlane.f32.xlu0 %v6623_v47 }
0x35f9   : > { %v9381_v28 = vpop.eup %9380 }
0x35fa   : > { %v6789_v49 = vsel %vm2490_vm2, %v9381_v28, 0.0 }
0x35fb   : > { %6790 = vadd.xlane.f32.xlu0 %v6789_v49  ;;  %v8217_v49 = vld [vmem:[#allocation22] ss:$0 sm:$0xff] }
0x3611   : > { %6628 = vrot.lane.b32.xlu0 %v11184_v25, %s11499_s8  ;;  %s11524_s8 = sld [smem:[#allocation80_spill]] }
0x3615   : > { %7018 = vrot.lane.b32.xlu0 %v11184_v25, %s11497_s4 }
0x3684   : > { %v6625_v53 = vpop.xlane.xlu0 %6624 }
0x3685   : > { %9382 = vrcp.f32 %v6625_v53 }
0x3688   : > { %v6791_v54 = vpop.xlane.xlu0 %6790 }
0x3689   : > { %9384 = vrcp.f32 %v6791_v54 }
0x368c   : > { %v6629_v56 = vpop.permute.xlu0 %6628 }
0x368d   : > { %8781 = vmatpush3.msra.mxu0 %v6629_v56 }
0x368e   : > { %8790 = vmatprep.subr.mxu0 %v9998_v1 }
0x368f   : > { %v9383_v57 = vpop.eup %9382 }
0x3690   : > { %v6627_v58 = vmul.f32 %v9383_v57, %v9379_v45  ;;  %v7019_v4 = vpop.permute.xlu0 %7018 }
0x3692   : > { %8783 = vmatmul.mubr.msk.f32.vlgmr.msra.gmra.mrb[64].mxu0 %vm2490_vm2, %v6627_v58 }
0x3693   : > { %v9385_v60 = vpop.eup %9384  ;;  %8791 = vmatpush3.msra.mxu0 %v6795_v59  ;;  %8792 = vmatprep.mubr.msk.f32.mxu0 %vm9997_vm0, %v9998_v1 }
0x3694   : > { %v6793_v61 = vmul.f32 %v9385_v60, %v9381_v28  ;;  %8800 = vmatprep.subr.mxu0 %v9998_v1 }
0x3696   : > { %8793 = vmatmul.mubr.msk.f32.vlgmr.msra.gmra.mrb[66].mxu0 %vm2490_vm2, %v6793_v61 }
0x3697   : > { %8802 = vmatprep.mubr.msk.f32.mxu0 %vm9997_vm0, %v9998_v1  ;;  %8801 = vmatpush3.msra.mxu0 %v2055_v62 }
0x3698   : > { %8810 = vmatprep.subr.mxu0 %v9998_v1 }
0x3765   : > { %v6700_v63 = vpop.f32.mrb[64].mxu0 }
0x3766   : > { %v8784_v2 = vpop.f32.mrb[65].mxu0  ;;  %8803 = vmatmul.mubr.msk.f32.vlgmr.msra.gmra.mrb[68].mxu0 %vm2490_vm2, %v6700_v63 }
0x3767   : > { %8812 = vmatprep.mubr.msk.f32.mxu0 %vm9997_vm0, %v9998_v1  ;;  %v2061_v2 = vld [vmem:[%s11522_s9] sm:$0xff] }
0x3769   : > { %v6866_v3 = vpop.f32.mrb[66].mxu0 }
0x376a   : > { %v8794_v5 = vpop.f32.mrb[67].mxu0  ;;  %8798 = vmatmul.mubr.msk.f32.vlgmr.msra.gmra.mrb[44].mxu1 %vm2490_vm2, %v6866_v3  ;;  %v2062_v3 = vld [vmem:[%s11522_s9 + $0x8] sm:$0xff] }
0x376b   : > { %8806 = vmatpush3.xpose.msk.msra.mxu1 %vm2490_vm2, %v7019_v4  ;;  %8807 = vmatprep.mubr.msk.f32.mxu1 %vm9997_vm0, %v9998_v1  ;;  %v9037_v4 = vpack.c.bf16 %v2062_v3, %v2061_v2  ;;  %v2064_v5 = vld [vmem:[%s11522_s9 + $0x18] sm:$0xff] }
0x376c   : > { %8815 = vmatprep.subr.mxu1 %v9998_v1 }
0x376e   : > { %8808 = vmatmul.mubr.msk.f32.vlgmr.msra.gmra.mrb[46].mxu1 %vm2490_vm2, %v7017_v6 }
0x376f   : > { %8817 = vmatprep.mubr.msk.f32.mxu1 %vm9997_vm0, %v9998_v1  ;;  %8816 = vmatpush3.msra.mxu1 %v2057_v48 }
0x3770   : > { %8825 = vmatprep.subr.mxu1 %v9998_v1 }
0x3839   : > { %v7012_v26 = vpop.f32.mrb[68].mxu0 }
0x383a   : > { %v8804_v7 = vpop.f32.mrb[69].mxu0 }
0x383d   : > { %v6939_v51 = vpop.f32.mrb[44].mxu1 }
0x383e   : > { %v7013_v8 = vadd.f32 %v7012_v26, %v6939_v51  ;;  %v8799_v9 = vpop.f32.mrb[45].mxu1 }
0x3841   : > { %v7090_v10 = vpop.f32.mrb[46].mxu1 }
0x3842   : > { %v7094_v11 = vmul.f32 0.35355338, %v7090_v10  ;;  %v8809_v55 = vpop.f32.mrb[47].mxu1 }
0x3844   : > { %v7095_v12 = vsel %vm2490_vm2, %v7094_v11, -inf }
0x3845   : > { %7096 = vmax.xlane.f32.xlu0 %v7095_v12 }
0x385b   : > { %7106 = vrot.lane.b32.xlu0 %v11184_v25, %s11503_s14  ;;  %s11525_s14 = sshll.u32 %s11527_s11, 3 }
0x385f   : > { %7256 = vrot.lane.b32.xlu0 %v11184_v25, %s11502_s13  ;;  %s11523_s13 = sld [smem:[#allocation83_spill]] }
0x3865   : > { %v2066_v26 = vld [vmem:[%s11523_s13] sm:$0xff]  ;;  %v2067_v7 = vld [vmem:[%s11523_s13 + $0x8] sm:$0xff]  ;;  %v2068_v51 = vld [vmem:[%s11523_s13 + $0x10] sm:$0xff] }
0x3866   : > { %v2069_v9 = vld [vmem:[%s11523_s13 + $0x18] sm:$0xff]  ;;  %v2071_v55 = vld [vmem:[%s11523_s13 + $0x28] sm:$0xff] }
0x3867   : > { %v9046_v10 = vpack.c.bf16 %v2069_v9, %v2068_v51  ;;  %v2073_v48 = vld [vmem:[%s11523_s13 + $0x38] sm:$0xff] }
0x38d2   : > { %v7097_v13 = vpop.xlane.xlu0 %7096 }
0x38d3   : > { %v7098_v14 = vsub.f32 %v7094_v11, %v7097_v13  ;;  %v2070_v11 = vld [vmem:[%s11523_s13 + $0x20] sm:$0xff] }
0x38d4   : > { %v9049_v12 = vpack.c.bf16 %v2071_v55, %v2070_v11 }
0x38d5   : > { %v7099_v15 = vmul.f32 1.442695, %v7098_v14 }
0x38d6   : > { %v7107_v16 = vpop.permute.xlu0 %7106 }
0x38d7   : > { %9386 = vpow2.f32 %v7099_v15  ;;  %8811 = vmatpush3.msra.mxu0 %v7107_v16  ;;  %v2060_v16 = vld [vmem:[%s11524_s8] sm:$0x3] }
0x38d8   : > { %8820 = vmatprep.subr.mxu0 %v9998_v1 }
0x38da   : > { %v7257_v24 = vpop.permute.xlu0 %7256 }
0x38e1   : > { %v9387_v17 = vpop.eup %9386 }
0x38e2   : > { %v7101_v18 = vsel %vm2490_vm2, %v9387_v17, 0.0 }
0x38e3   : > { %7102 = vadd.xlane.f32.xlu1 %v7101_v18 }
0x38f4   : > { %7258 = vrot.lane.b32.xlu1 %v11184_v25, %s11501_s12  ;;  %s1910_s12 = scalar_lea.vmem %s10305_s29, %s11525_s14 }
0x3970   : > { %v7103_v19 = vpop.xlane.xlu1 %7102 }
0x3971   : > { %9388 = vrcp.f32 %v7103_v19 }
0x3974   : > { %v7259_v23 = vpop.permute.xlu1 %7258 }
0x397b   : > { %v9389_v20 = vpop.eup %9388 }
0x397c   : > { %v7105_v21 = vmul.f32 %v9389_v20, %v9387_v17  ;;  %v7520_v17 = vrot.slane %v2060_v16, %v10810_v44  ;;  %v7525_v20 = vrot.slane %v2060_v16, %v10813_v46 }
0x397e   : > { %8813 = vmatmul.mubr.msk.f32.vlgmr.msra.gmra.mrb[70].mxu0 %vm2490_vm2, %v7105_v21 }
0x397f   : > { %8821 = vmatpush3.xpose.msk.msra.mxu0 %vm2490_vm2, %v7259_v23  ;;  %8822 = vmatprep.mubr.msk.f32.mxu0 %vm9997_vm0, %v9998_v1 }
0x3980   : > { %8830 = vmatprep.subr.mxu0 %v9998_v1 }
0x3982   : > { %8823 = vmatmul.mubr.msk.f32.vlgmr.msra.gmra.mrb[72].mxu0 %vm2490_vm2, %v7257_v24  ;;  %v2072_v24 = vld [vmem:[%s11523_s13 + $0x30] sm:$0xff] }
0x3983   : > { %8832 = vmatprep.mubr.msk.f32.mxu0 %vm9997_vm0, %v9998_v1  ;;  %8831 = vmatpush3.msra.mxu0 %v2058_v38 }
0x3984   : > { %9042 = vmatprep.subr.bf16.mxu0 %v9996_v0 }
0x3a51   : > { %v7178_v27 = vpop.f32.mrb[70].mxu0 }
0x3a52   : > { %v8814_v52 = vpop.f32.mrb[71].mxu0  ;;  %8818 = vmatmul.mubr.msk.f32.vlgmr.msra.gmra.mrb[48].mxu1 %vm2490_vm2, %v7178_v27  ;;  %v9052_v27 = vpack.c.bf16 %v2073_v48, %v2072_v24 }
0x3a53   : > { %8827 = vmatprep.mubr.msk.f32.mxu1 %vm9997_vm0, %v9998_v1  ;;  %v8218_v52 = vld [vmem:[#allocation24] ss:$0 sm:$0xff] }
0x3a55   : > { %v7330_v29 = vpop.f32.mrb[72].mxu0 }
0x3a56   : > { %v7334_v30 = vmul.f32 0.35355338, %v7330_v29  ;;  %v8824_v31 = vpop.f32.mrb[73].mxu0 }
0x3a58   : > { %v7335_v32 = vsel %vm2490_vm2, %v7334_v30, -inf }
0x3a59   : > { %7336 = vmax.xlane.f32.xlu1 %v7335_v32 }
0x3ae6   : > { %v7337_v33 = vpop.xlane.xlu1 %7336 }
0x3ae7   : > { %v7338_v34 = vsub.f32 %v7334_v30, %v7337_v33  ;;  %v8220_v33 = vld [vmem:[#allocation25] ss:$0 sm:$0xff] }
0x3ae9   : > { %v7339_v35 = vmul.f32 1.442695, %v7338_v34 }
0x3aeb   : > { %9390 = vpow2.f32 %v7339_v35 }
0x3af5   : > { %v9391_v36 = vpop.eup %9390 }
0x3af6   : > { %v7341_v37 = vsel %vm2490_vm2, %v9391_v36, 0.0 }
0x3af7   : > { %7342 = vadd.xlane.f32.xlu0 %v7341_v37 }
0x3b0d   : > { %7346 = vrot.lane.b32.xlu0 %v11184_v25, %s11504_s15 }
0x3b25   : > { %v7251_v39 = vpop.f32.mrb[48].mxu1 }
0x3b26   : > { %v7255_v40 = vadd.f32 %v7251_v39, %v7013_v8  ;;  %v8819_v41 = vpop.f32.mrb[49].mxu1  ;;  %v9043_v8 = vpack.c.bf16 %v2067_v7, %v2066_v26 }
0x3b84   : > { %v7343_v42 = vpop.xlane.xlu0 %7342 }
0x3b85   : > { %9392 = vrcp.f32 %v7343_v42 }
0x3b88   : > { %v7347_v43 = vpop.permute.xlu0 %7346 }
0x3b89   : > { %8826 = vmatpush3.msra.mxu1 %v7347_v43  ;;  %v2076_v43 = vld [vmem:[%s10295_s21] sm:$0xff] }
0x3b8a   : > { %9036 = vmatprep.subr.bf16.mxu1 %v9996_v0 }
0x3b8f   : > { %v9393_v45 = vpop.eup %9392 }
0x3b90   : > { %v7345_v47 = vmul.f32 %v9393_v45, %v9391_v36  ;;  %v2077_v45 = vld [vmem:[%s10295_s21 + $0x8] sm:$0xff] }
0x3b92   : > { %8828 = vmatmul.mubr.msk.f32.vlgmr.msra.gmra.mrb[50].mxu1 %vm2490_vm2, %v7345_v47  ;;  %v9055_v47 = vpack.c.bf16 %v2077_v45, %v2076_v43 }
0x3b93   : > { %8843 = vmatprep.mubr.msk.f32.mxu1 %vm9997_vm0, %v9998_v1  ;;  %9038 = vmatpush3.bf16.msra.mxu1 %v9037_v4 }
0x3b94   : > { %9039 = vmatprep.subr.bf16.mxu1 %v9996_v0 }
0x3c65   : > { %v7418_v25 = vpop.f32.mrb[50].mxu1 }
0x3c66   : > { %v8829_v28 = vpop.f32.mrb[51].mxu1  ;;  %8833 = vmatmul.mubr.msk.f32.vlgmr.msra.gmra.mrb[74].mxu0 %vm2490_vm2, %v7418_v25  ;;  %v2078_v25 = vld [vmem:[%s10295_s21 + $0x10] sm:$0xff] }
0x3c67   : > { %8862 = vmatprep.mubr.msk.f32.mxu0 %vm9997_vm0, %v9998_v1  ;;  %9044 = vmatpush3.bf16.msra.mxu0 %v9043_v8  ;;  %v2079_v28 = vld [vmem:[%s10295_s21 + $0x18] sm:$0xff] }
0x3c68   : > { %9045 = vmatprep.subr.bf16.mxu0 %v9996_v0 }
0x3c6b   : > { %9047 = vmatpush3.bf16.msra.mxu0 %v9046_v10 }
0x3c6c   : > { %9048 = vmatprep.subr.bf16.mxu0 %v9996_v0 }
0x3c6f   : > { %9050 = vmatpush3.bf16.msra.mxu0 %v9049_v12 }
0x3c70   : > { %9051 = vmatprep.subr.bf16.mxu0 %v9996_v0 }
0x3c73   : > { %9053 = vmatpush3.bf16.msra.mxu0 %v9052_v27 }
0x3d39   : > { %v7491_v50 = vpop.f32.mrb[74].mxu0 }
0x3d3a   : > { %v7495_v53 = vadd.f32 %v7491_v50, %v7255_v40  ;;  %v8834_v54 = vpop.f32.mrb[75].mxu0 }
0x3d3c   : > { %v7502_v56 = vadd.f32 %v8217_v49, %v7495_v53  ;;  %v9058_v49 = vpack.c.bf16 %v2079_v28, %v2078_v25 }
0x3d3e   : > { %v7503_v57 = vadd.f32 %v7502_v56, %v11178_v22  ;;  %v2063_v22 = vld [vmem:[%s11522_s9 + $0x10] sm:$0xff]  ;;  %v2075_v56 = vld [vmem:[%s10290_s5] sm:$0x3] }
0x3d3f   : > { %v9040_v6 = vpack.c.bf16 %v2064_v5, %v2063_v22  ;;  %v9399_v22 = vld [vmem:[%s10617_s10] ss:$0 sm:$0xff] }
0x3d40   : > { %v7504_v58 = vsel %vm2219_vm10, %v7503_v57, 0.0 }
0x3d41   : > { %7505 = vadd.xlane.f32.xlu1 %v7504_v58  ;;  %9041 = vmatpush3.bf16.msra.mxu1 %v9040_v6 }
0x3d42   : > { %9054 = vmatprep.subr.bf16.mxu1 %v9996_v0 }
0x3dce   : > { %v7506_v59 = vpop.xlane.xlu1 %7505 }
0x3dcf   : > { %v7507_v60 = vmul.f32 0.03125, %v7506_v59 }
0x3dd1   : > { %v7508_v61 = vsub.f32 %v7503_v57, %v7507_v60  ;;  %v7703_v57 = vrot.slane %v2075_v56, %v10810_v44  ;;  %v7708_v60 = vrot.slane %v2075_v56, %v10813_v46 }
0x3dd3   : > { %v7509_v62 = vmul.f32 %v7508_v61, %v7508_v61 }
0x3dd5   : > { %v7510_v63 = vsel %vm2219_vm10, %v7509_v62, 0.0  ;;  %v8222_v62 = vld [vmem:[#allocation27] ss:$0 sm:$0xff] }
0x3dd6   : > { %7511 = vadd.xlane.f32.xlu1 %v7510_v63 }
0x3e63   : > { %v7512_v13 = vpop.xlane.xlu1 %7511 }
0x3e64   : > { %v7513_v14 = vmul.f32 0.03125, %v7512_v13 }
0x3e66   : > { %v7514_v15 = vadd.f32 1e-05, %v7513_v14 }
0x3e68   : > { %9394 = vrsqrt.f32 %v7514_v15 }
0x3e72   : > { %v9395_v18 = vpop.eup %9394 }
0x3e73   : > { %v7516_v19 = vmul.f32 %v9395_v18, %v7508_v61 }
0x3e75   : > { %v7521_v21 = vmul.f32 %v7520_v17, %v7516_v19 }
0x3e77   : > { %v7526_v23 = vadd.f32 %v7525_v20, %v7521_v21 }
0x3e79   : > { %8844 = vmatmul.mubr.msk.f32.vlgmr.msra.gmra.mrb[52].mxu1 %vm2219_vm10, %v7526_v23 }
0x3e7a   : > { %8873 = vmatprep.mubr.msk.f32.mxu1 %vm9997_vm0, %v9998_v1  ;;  %9056 = vmatpush3.bf16.msra.mxu1 %v9055_v47 }
0x3e7b   : > { %9057 = vmatprep.subr.bf16.mxu1 %v9996_v0 }
0x3e7e   : > { %9059 = vmatpush3.bf16.msra.mxu1 %v9058_v49 }
0x3f4c   : > { %v7602_v29 = vpop.f32.mrb[52].mxu1 }
0x3f4d   : > { %v7603_v30 = vadd.f32 %v8218_v52, %v7602_v29  ;;  %v8845_v31 = vpop.f32.mrb[53].mxu1 }
0x3f4f   : > { %v7606_v32 = vmax.f32 %v7603_v30, 0.0 }
0x3f51   : > { %8863 = vmatmul.mubr.msk.f32.vlgmr.msra.gmra.mrb[76].mxu0 %vm2221_vm13, %v7606_v32 }
0x4024   : > { %v7682_v34 = vpop.f32.mrb[76].mxu0 }
0x4025   : > { %v7683_v35 = vadd.f32 %v8220_v33, %v7682_v34  ;;  %v8864_v36 = vpop.f32.mrb[77].mxu0 }
0x4027   : > { %v7686_v1 = vadd.f32 %v7683_v35, %v7526_v23 }
0x4029   : > { %v7687_v37 = vsel %vm2219_vm10, %v7686_v1, 0.0 }
0x402a   : > { %7688 = vadd.xlane.f32.xlu1 %v7687_v37 }
0x40b7   : > { %v7689_v38 = vpop.xlane.xlu1 %7688 }
0x40b8   : > { %v7690_v39 = vmul.f32 0.03125, %v7689_v38 }
0x40ba   : > { %v7691_v40 = vsub.f32 %v7686_v1, %v7690_v39 }
0x40bc   : > { %v7692_v41 = vmul.f32 %v7691_v40, %v7691_v40 }
0x40be   : > { %v7693_v42 = vsel %vm2219_vm10, %v7692_v41, 0.0 }
0x40bf   : > { %7694 = vadd.xlane.f32.xlu1 %v7693_v42 }
0x414c   : > { %v7695_v50 = vpop.xlane.xlu1 %7694 }
0x414d   : > { %v7696_v53 = vmul.f32 0.03125, %v7695_v50 }
0x414f   : > { %v7697_v54 = vadd.f32 1e-05, %v7696_v53 }
0x4151   : > { %9396 = vrsqrt.f32 %v7697_v54 }
0x415b   : > { %v9397_v58 = vpop.eup %9396 }
0x415c   : > { %v7699_v59 = vmul.f32 %v9397_v58, %v7691_v40 }
0x415e   : > { %v7704_v61 = vmul.f32 %v7703_v57, %v7699_v59 }
0x4160   : > { %v7709_v0 = vadd.f32 %v7708_v60, %v7704_v61 }
0x4162   : > { %8874 = vmatmul.mubr.msk.f32.vlgmr.msra.gmra.mrb[54].mxu1 %vm2219_vm10, %v7709_v0 }
0x4235   : > { %v7785_v63 = vpop.f32.mrb[54].mxu1 }
0x4236   : > { %v7786_v2 = vadd.f32 %v8222_v62, %v7785_v63  ;;  %v8875_v3 = vpop.f32.mrb[55].mxu1 }
0x4238   : > { %v7789_v4 = vmul.f32 0.001, %v7786_v2 }
0x423a   : > { %v7790_v5 = vadd.f32 %v9399_v22, %v7789_v4 }
0x423c   : > { %7791 = vst.msk [vmem:[%s1910_s12] sm:$0xff] %vm2096_vm4, %v7790_v5 }
0x423d PF: > { %s134_s7 = sadd.s32 1, %s9918_s7  }
0x423e   : > { %p131_p5 = scmp.ge.s32.totalorder %s134_s7, 4  }
0x4240   :  { %133 = sbr.rel (!%p131_p5) target bundleno = 122 (0x7a), region = 407 }
0x4247   :  { %7811 = vsyncpa [#allocation3], 1 }
0x4248   :  { %7813 = vsyncpa [#allocation3 + $0x1], 1 }
0x4249   :  { %7814 = vsyncpa [#allocation5], 1 }
0x424a   :  { %7815 = vsyncpa [#allocation8], 1 }
0x424b   :  { %7816 = vsyncpa [#allocation11], 1 }
0x424c   :  { %7817 = vsyncpa [#allocation14], 1 }
0x424d   :  { %7818 = vsyncpa [#allocation17], 1 }
0x424e   :  { %7819 = vsyncpa [#allocation20], 1 }
0x424f   :  { %7820 = vsyncpa [#allocation23], 1 }
0x4250   :  { %7821 = vsyncpa [#allocation26], 1 }

</bundles_post_ra>
